<compile_context>
chip_gen: v7x
topology: tpu7x:2x2x1
jax: 0.10.0
libtpu: 0.0.40
codegen_flags: <defaults>
</compile_context>

<pallas_src>
import math
import numpy as np
import jax
import jax.numpy as jnp
from jax import lax
from jax.experimental import pallas as pl
from jax.experimental.pallas import tpu as pltpu

PAD = 0  # C.PAD

# ----------------------------- configuration --------------------------------
N_VOCAB = 64
MAX_SEQ_LEN = 16
D_EMBED = 32
N_LAYERS = 2
N_HEAD = 2
D_K = 16
D_V = 16
D_INPUT = 32   # == D_EMBED
D_INNER = 64
V_PAD = 128    # vocab projection padded to a full vreg lane width

B = 2    # batch
L = 8    # decoder sequence length
LS = 8   # encoder (source) sequence length


# ----------------------------- in-kernel math --------------------------------
def _layer_norm(x, g, b, eps=1e-5):
    mu = jnp.mean(x, axis=-1, keepdims=True)
    xc = x - mu
    var = jnp.mean(xc * xc, axis=-1, keepdims=True)
    return xc * lax.rsqrt(var + eps) * g + b


def _softmax(s):
    m = jnp.max(s, axis=-1, keepdims=True)
    e = jnp.exp(s - m)
    return e * pl.reciprocal(jnp.sum(e, axis=-1, keepdims=True), approx=True)


def _attn_core(q_full, k_full, v_full, bias, wo3, bo, g, be,
               residual, npad, n_head, d_k, d_v):
    """Post-norm MHA on batch-flattened tokens.

    q_full: (Tq, H*dk) f32, k_full: (Tk, H*dk), v_full: (Tk, H*dv).
    bias:   (Tq, Tk) additive mask (0 allowed, -1e9 masked, incl. cross-batch).
    wo3:    (H, dv, D) bf16 — output projection split per head (no concat).
    """
    scale = jnp.float32(1.0 / math.sqrt(d_k))
    o = None
    for h in range(n_head):                      # static, tiny (n_head = 2)
        qh = q_full[:, h * d_k:(h + 1) * d_k].astype(jnp.bfloat16)
        kh = k_full[:, h * d_k:(h + 1) * d_k].astype(jnp.bfloat16)
        vh = v_full[:, h * d_v:(h + 1) * d_v].astype(jnp.bfloat16)
        # scores (Tq, Tk) = qh @ kh^T, f32 accumulation on the MXU
        s = lax.dot_general(qh, kh, (((1,), (1,)), ((), ())),
                            preferred_element_type=jnp.float32) * scale + bias
        p = _softmax(s)
        ctx = jnp.dot(p.astype(jnp.bfloat16), vh,
                      preferred_element_type=jnp.float32)
        oh = jnp.dot(ctx.astype(jnp.bfloat16), wo3[h],
                     preferred_element_type=jnp.float32)
        o = oh if o is None else o + oh
    o = o + bo
    return _layer_norm(o + residual, g, be) * npad


def make_decoder_kernel(n_layers, n_head, d_k, d_v):
    Hk = n_head * d_k
    Hv = n_head * d_v

    def kernel(x_ref, enc_ref, sbias_ref, ebias_ref, npad_ref,
               s_wqkv, s_bqkv, s_wo, s_bo, s_g, s_be,
               e_wq, e_bq, e_wkv, e_bkv, e_wo, e_bo, e_g, e_be,
               wf1, bf1, wf2, bf2, g3, be3,
               wp, out_ref):
        bf16 = jnp.bfloat16
        x = x_ref[...]                         # (T, D)  f32, T = B*L
        enc_bf = enc_ref[...].astype(bf16)     # hoisted: reused by every layer
        sbias = sbias_ref[...]                 # (T, T)
        ebias = ebias_ref[...]                 # (T, Ts)
        npad = npad_ref[...]                   # (T, 1)

        for ll in range(n_layers):             # static layer loop, unrolled
            # ---- masked self-attention (fused QKV: one (T,D)@(D,3*H*dk) matmul)
            qkv = jnp.dot(x.astype(bf16), s_wqkv[ll],
                          preferred_element_type=jnp.float32) + s_bqkv[ll]
            x = _attn_core(qkv[:, :Hk], qkv[:, Hk:2 * Hk], qkv[:, 2 * Hk:2 * Hk + Hv],
                           sbias, s_wo[ll], s_bo[ll], s_g[ll], s_be[ll],
                           x, npad, n_head, d_k, d_v)
            # ---- encoder-decoder attention (Q from x; fused K/V from enc)
            q = jnp.dot(x.astype(bf16), e_wq[ll],
                        preferred_element_type=jnp.float32) + e_bq[ll]
            kv = jnp.dot(enc_bf, e_wkv[ll],
                         preferred_element_type=jnp.float32) + e_bkv[ll]
            x = _attn_core(q, kv[:, :Hk], kv[:, Hk:Hk + Hv],
                           ebias, e_wo[ll], e_bo[ll], e_g[ll], e_be[ll],
                           x, npad, n_head, d_k, d_v)
            # ---- position-wise FFN (1x1 Conv1d pair == two matmuls) + LN + mask
            hid = jnp.maximum(
                jnp.dot(x.astype(bf16), wf1[ll],
                        preferred_element_type=jnp.float32) + bf1[ll], 0.0)
            o = jnp.dot(hid.astype(bf16), wf2[ll],
                        preferred_element_type=jnp.float32) + bf2[ll]
            x = _layer_norm(o + x, g3[ll], be3[ll]) * npad

        # final vocabulary projection, lane-padded to 128 -> one dense store
        out_ref[...] = jnp.dot(x.astype(bf16), wp[...],
                               preferred_element_type=jnp.float32)

    return kernel


# ----------------------------- parameters ------------------------------------
def get_pe_table(n_position, d_hid, padding_idx=0):
    pos = np.arange(n_position)[:, None].astype(np.float64)
    i = np.arange(d_hid)[None, :].astype(np.float64)
    angle = pos / np.power(10000.0, 2.0 * (i // 2) / d_hid)
    table = np.zeros((n_position, d_hid), dtype=np.float32)
    table[:, 0::2] = np.sin(angle[:, 0::2])
    table[:, 1::2] = np.cos(angle[:, 1::2])
    table[padding_idx] = 0.0
    return jnp.asarray(table)


def init_params(key):
    keys = iter(jax.random.split(key, 64))

    def nrm(shape, scale=0.1):
        return scale * jax.random.normal(next(keys), shape, jnp.float32)

    Hk, Hv = N_HEAD * D_K, N_HEAD * D_V
    p = {}
    embed = nrm((N_VOCAB, D_EMBED))
    p["embed"] = embed.at[PAD].set(0.0)                 # padding_idx row zeroed
    p["pe"] = get_pe_table(MAX_SEQ_LEN + 1, D_EMBED)    # frozen sinusoid table

    # self-attention: fused [Wq | Wk | Wv]
    p["self_wqkv"] = jnp.concatenate(
        [nrm((N_LAYERS, D_INPUT, Hk)), nrm((N_LAYERS, D_INPUT, Hk)),
         nrm((N_LAYERS, D_INPUT, Hv))], axis=-1)
    p["self_bqkv"] = jnp.zeros((N_LAYERS, 1, 2 * Hk + Hv), jnp.float32)
    p["self_wo"] = nrm((N_LAYERS, Hv, D_INPUT)).reshape(N_LAYERS, N_HEAD, D_V, D_INPUT)
    p["self_bo"] = jnp.zeros((N_LAYERS, 1, D_INPUT), jnp.float32)
    p["self_g"] = jnp.ones((N_LAYERS, 1, D_INPUT), jnp.float32)
    p["self_be"] = jnp.zeros((N_LAYERS, 1, D_INPUT), jnp.float32)

    # encoder-decoder attention: Q alone, fused [Wk | Wv]
    p["enc_wq"] = nrm((N_LAYERS, D_INPUT, Hk))
    p["enc_bq"] = jnp.zeros((N_LAYERS, 1, Hk), jnp.float32)
    p["enc_wkv"] = jnp.concatenate(
        [nrm((N_LAYERS, D_INPUT, Hk)), nrm((N_LAYERS, D_INPUT, Hv))], axis=-1)
    p["enc_bkv"] = jnp.zeros((N_LAYERS, 1, Hk + Hv), jnp.float32)
    p["enc_wo"] = nrm((N_LAYERS, Hv, D_INPUT)).reshape(N_LAYERS, N_HEAD, D_V, D_INPUT)
    p["enc_bo"] = jnp.zeros((N_LAYERS, 1, D_INPUT), jnp.float32)
    p["enc_g"] = jnp.ones((N_LAYERS, 1, D_INPUT), jnp.float32)
    p["enc_be"] = jnp.zeros((N_LAYERS, 1, D_INPUT), jnp.float32)

    # FFN
    p["wf1"] = nrm((N_LAYERS, D_INPUT, D_INNER))
    p["bf1"] = jnp.zeros((N_LAYERS, 1, D_INNER), jnp.float32)
    p["wf2"] = nrm((N_LAYERS, D_INNER, D_INPUT))
    p["bf2"] = jnp.zeros((N_LAYERS, 1, D_INPUT), jnp.float32)
    p["g3"] = jnp.ones((N_LAYERS, 1, D_INPUT), jnp.float32)
    p["be3"] = jnp.zeros((N_LAYERS, 1, D_INPUT), jnp.float32)

    # vocab projection (bias=False), zero-padded to a 128-lane-dense slab
    wp = nrm((D_INPUT, N_VOCAB))
    p["wp"] = jnp.pad(wp, ((0, 0), (0, V_PAD - N_VOCAB)))
    return p


# ----------------------------- forward wrapper --------------------------------
def transformer_decoder_forward(params, inputs, pos, src_inputs, enc_outputs):
    b, l = inputs.shape
    ls = src_inputs.shape[1]
    T, Ts = b * l, b * ls

    # token + positional embedding lookup (gather = wrapper glue), batch-flattened
    x = (params["embed"][inputs] + params["pe"][pos]).reshape(T, D_EMBED)
    enc = enc_outputs.reshape(Ts, D_INPUT)

    # additive mask biases over batch-flattened token axes (block-diagonal in batch)
    NEG = jnp.float32(-1e9)
    same = jnp.eye(b, dtype=bool)[:, None, :, None]                  # (B,1,B,1)
    subseq = jnp.triu(jnp.ones((l, l), jnp.float32), k=1) > 0        # (L,L) future
    keypad = (inputs == PAD)[:, None, :]                             # (B,1,L)
    allow_self = (~(keypad | subseq[None]))[:, :, None, :]           # (B,L,1,L)
    allow_self = jnp.broadcast_to(same & allow_self, (b, l, b, l))
    self_bias = jnp.where(allow_self.reshape(T, T), 0.0, NEG)

    key_ok = (src_inputs != PAD)[None, None, :, :]                   # (1,1,B,Ls)
    allow_enc = jnp.broadcast_to(same & key_ok, (b, l, b, ls))
    enc_bias = jnp.where(allow_enc.reshape(T, Ts), 0.0, NEG)

    npad = (inputs != PAD).astype(jnp.float32).reshape(T, 1)

    bf = jnp.bfloat16   # weights pre-cast to bf16 (MXU-native, halves weight DMA)
    args = (x, enc, self_bias, enc_bias, npad,
            params["self_wqkv"].astype(bf), params["self_bqkv"],
            params["self_wo"].astype(bf), params["self_bo"],
            params["self_g"], params["self_be"],
            params["enc_wq"].astype(bf), params["enc_bq"],
            params["enc_wkv"].astype(bf), params["enc_bkv"],
            params["enc_wo"].astype(bf), params["enc_bo"],
            params["enc_g"], params["enc_be"],
            params["wf1"].astype(bf), params["bf1"],
            params["wf2"].astype(bf), params["bf2"],
            params["g3"], params["be3"],
            params["wp"].astype(bf))

    kernel = make_decoder_kernel(N_LAYERS, N_HEAD, D_K, D_V)
    out = pl.pallas_call(
        kernel,
        out_shape=jax.ShapeDtypeStruct((T, V_PAD), jnp.float32),
        in_specs=[pl.BlockSpec(memory_space=pltpu.MemorySpace.VMEM)] * len(args),
        out_specs=pl.BlockSpec(memory_space=pltpu.MemorySpace.VMEM),
    )(*args)
    # strip lane padding, restore (B, L, V)
    return out[:, :N_VOCAB].reshape(b, l, N_VOCAB)


# ----------------------------- demo ------------------------------------------
if __name__ == "__main__":
    key = jax.random.PRNGKey(0)
    k_in, k_src, k_enc, k_par = jax.random.split(key, 4)

    inputs = jax.random.randint(k_in, (B, L), 1, N_VOCAB, dtype=jnp.int32)
    inputs = inputs.at[1, L - 2:].set(PAD)                      # some padding
    pos = jnp.where(inputs != PAD,
                    jnp.arange(1, L + 1, dtype=jnp.int32)[None, :], 0)

    src_inputs = jax.random.randint(k_src, (B, LS), 1, N_VOCAB, dtype=jnp.int32)
    src_inputs = src_inputs.at[1, LS - 3:].set(PAD)
    enc_outputs = jax.random.normal(k_enc, (B, LS, D_INPUT), jnp.float32)

    params = init_params(k_par)

    out = transformer_decoder_forward(params, inputs, pos, src_inputs, enc_outputs)
    out = jax.block_until_ready(out)

    assert out.shape == (B, L, N_VOCAB)
    assert bool(jnp.all(jnp.isfinite(out)))
    print("KERNEL_OK")
</pallas_src>

<mosaic_0001>
module attributes {stable_mosaic.version = 11 : i64} {
  func.func @kernel(%arg0: memref<16x32xf32, #tpu.memory_space<vmem>>, %arg1: memref<16x32xf32, #tpu.memory_space<vmem>>, %arg2: memref<16x16xf32, #tpu.memory_space<vmem>>, %arg3: memref<16x16xf32, #tpu.memory_space<vmem>>, %arg4: memref<16x1xf32, #tpu.memory_space<vmem>>, %arg5: memref<2x32x96xbf16, #tpu.memory_space<vmem>>, %arg6: memref<2x1x96xf32, #tpu.memory_space<vmem>>, %arg7: memref<2x2x16x32xbf16, #tpu.memory_space<vmem>>, %arg8: memref<2x1x32xf32, #tpu.memory_space<vmem>>, %arg9: memref<2x1x32xf32, #tpu.memory_space<vmem>>, %arg10: memref<2x1x32xf32, #tpu.memory_space<vmem>>, %arg11: memref<2x32x32xbf16, #tpu.memory_space<vmem>>, %arg12: memref<2x1x32xf32, #tpu.memory_space<vmem>>, %arg13: memref<2x32x64xbf16, #tpu.memory_space<vmem>>, %arg14: memref<2x1x64xf32, #tpu.memory_space<vmem>>, %arg15: memref<2x2x16x32xbf16, #tpu.memory_space<vmem>>, %arg16: memref<2x1x32xf32, #tpu.memory_space<vmem>>, %arg17: memref<2x1x32xf32, #tpu.memory_space<vmem>>, %arg18: memref<2x1x32xf32, #tpu.memory_space<vmem>>, %arg19: memref<2x32x64xbf16, #tpu.memory_space<vmem>>, %arg20: memref<2x1x64xf32, #tpu.memory_space<vmem>>, %arg21: memref<2x64x32xbf16, #tpu.memory_space<vmem>>, %arg22: memref<2x1x32xf32, #tpu.memory_space<vmem>>, %arg23: memref<2x1x32xf32, #tpu.memory_space<vmem>>, %arg24: memref<2x1x32xf32, #tpu.memory_space<vmem>>, %arg25: memref<32x128xbf16, #tpu.memory_space<vmem>>, %arg26: memref<16x128xf32, #tpu.memory_space<vmem>>) attributes {dimension_semantics = [], scalar_prefetch = 0 : i64, scratch_operands = 0 : i64, tpu.core_type = #tpu.core_type<tc>} {
    %c0 = arith.constant 0 : index
    %c0_0 = arith.constant 0 : index
    %0 = vector.load %arg0[%c0, %c0_0] : memref<16x32xf32, #tpu.memory_space<vmem>>, vector<16x32xf32>
    %c0_1 = arith.constant 0 : index
    %c0_2 = arith.constant 0 : index
    %1 = vector.load %arg1[%c0_1, %c0_2] : memref<16x32xf32, #tpu.memory_space<vmem>>, vector<16x32xf32>
    %2 = arith.truncf %1 : vector<16x32xf32> to vector<16x32xbf16>
    %c0_3 = arith.constant 0 : index
    %c0_4 = arith.constant 0 : index
    %3 = vector.load %arg2[%c0_3, %c0_4] : memref<16x16xf32, #tpu.memory_space<vmem>>, vector<16x16xf32>
    %c0_5 = arith.constant 0 : index
    %c0_6 = arith.constant 0 : index
    %4 = vector.load %arg3[%c0_5, %c0_6] : memref<16x16xf32, #tpu.memory_space<vmem>>, vector<16x16xf32>
    %c0_7 = arith.constant 0 : index
    %c0_8 = arith.constant 0 : index
    %5 = vector.load %arg4[%c0_7, %c0_8] : memref<16x1xf32, #tpu.memory_space<vmem>>, vector<16x1xf32>
    %6 = arith.truncf %0 : vector<16x32xf32> to vector<16x32xbf16>
    %c0_9 = arith.constant 0 : index
    %c0_10 = arith.constant 0 : index
    %c0_11 = arith.constant 0 : index
    %7 = vector.load %arg5[%c0_9, %c0_10, %c0_11] : memref<2x32x96xbf16, #tpu.memory_space<vmem>>, vector<1x32x96xbf16>
    %8 = vector.shape_cast %7 : vector<1x32x96xbf16> to vector<32x96xbf16>
    %cst = arith.constant dense<0.000000e+00> : vector<16x96xf32>
    %9 = tpu.matmul %6, %8, %cst {dimension_numbers = #tpu.dot_dimension_numbers<[1], [0], [0], [1], [0, 0, 1, 1], [], []>} : vector<16x32xbf16>, vector<32x96xbf16>, vector<16x96xf32> -> vector<16x96xf32>
    %c0_12 = arith.constant 0 : index
    %c0_13 = arith.constant 0 : index
    %c0_14 = arith.constant 0 : index
    %10 = vector.load %arg6[%c0_12, %c0_13, %c0_14] : memref<2x1x96xf32, #tpu.memory_space<vmem>>, vector<1x1x96xf32>
    %11 = vector.shape_cast %10 : vector<1x1x96xf32> to vector<1x96xf32>
    %12 = vector.broadcast %11 : vector<1x96xf32> to vector<16x96xf32>
    %13 = arith.addf %9, %12 : vector<16x96xf32>
    %14 = vector.extract_strided_slice %13 {offsets = [0, 0], sizes = [16, 32], strides = [1, 1]} : vector<16x96xf32> to vector<16x32xf32>
    %15 = vector.extract_strided_slice %13 {offsets = [0, 32], sizes = [16, 32], strides = [1, 1]} : vector<16x96xf32> to vector<16x32xf32>
    %16 = vector.extract_strided_slice %13 {offsets = [0, 64], sizes = [16, 32], strides = [1, 1]} : vector<16x96xf32> to vector<16x32xf32>
    %c0_15 = arith.constant 0 : index
    %c0_16 = arith.constant 0 : index
    %c0_17 = arith.constant 0 : index
    %c0_18 = arith.constant 0 : index
    %17 = vector.load %arg7[%c0_15, %c0_16, %c0_17, %c0_18] : memref<2x2x16x32xbf16, #tpu.memory_space<vmem>>, vector<1x2x16x32xbf16>
    %18 = vector.shape_cast %17 : vector<1x2x16x32xbf16> to vector<2x16x32xbf16>
    %c0_19 = arith.constant 0 : index
    %c0_20 = arith.constant 0 : index
    %c0_21 = arith.constant 0 : index
    %19 = vector.load %arg8[%c0_19, %c0_20, %c0_21] : memref<2x1x32xf32, #tpu.memory_space<vmem>>, vector<1x1x32xf32>
    %20 = vector.shape_cast %19 : vector<1x1x32xf32> to vector<1x32xf32>
    %c0_22 = arith.constant 0 : index
    %c0_23 = arith.constant 0 : index
    %c0_24 = arith.constant 0 : index
    %21 = vector.load %arg9[%c0_22, %c0_23, %c0_24] : memref<2x1x32xf32, #tpu.memory_space<vmem>>, vector<1x1x32xf32>
    %22 = vector.shape_cast %21 : vector<1x1x32xf32> to vector<1x32xf32>
    %c0_25 = arith.constant 0 : index
    %c0_26 = arith.constant 0 : index
    %c0_27 = arith.constant 0 : index
    %23 = vector.load %arg10[%c0_25, %c0_26, %c0_27] : memref<2x1x32xf32, #tpu.memory_space<vmem>>, vector<1x1x32xf32>
    %24 = vector.shape_cast %23 : vector<1x1x32xf32> to vector<1x32xf32>
    %25 = vector.extract_strided_slice %14 {offsets = [0, 0], sizes = [16, 16], strides = [1, 1]} : vector<16x32xf32> to vector<16x16xf32>
    %26 = arith.truncf %25 : vector<16x16xf32> to vector<16x16xbf16>
    %27 = vector.extract_strided_slice %15 {offsets = [0, 0], sizes = [16, 16], strides = [1, 1]} : vector<16x32xf32> to vector<16x16xf32>
    %28 = arith.truncf %27 : vector<16x16xf32> to vector<16x16xbf16>
    %29 = vector.extract_strided_slice %16 {offsets = [0, 0], sizes = [16, 16], strides = [1, 1]} : vector<16x32xf32> to vector<16x16xf32>
    %30 = arith.truncf %29 : vector<16x16xf32> to vector<16x16xbf16>
    %cst_28 = arith.constant dense<0.000000e+00> : vector<16x16xf32>
    %31 = tpu.matmul %26, %28, %cst_28 {dimension_numbers = #tpu.dot_dimension_numbers<[1], [1], [0], [0], [0, 0, 1, 0], [], []>} : vector<16x16xbf16>, vector<16x16xbf16>, vector<16x16xf32> -> vector<16x16xf32>
    %cst_29 = arith.constant 2.500000e-01 : f32
    %32 = vector.broadcast %cst_29 : f32 to vector<16x16xf32>
    %33 = arith.mulf %31, %32 : vector<16x16xf32>
    %34 = arith.addf %33, %3 : vector<16x16xf32>
    %cst_30 = arith.constant dense<0xFF800000> : vector<16xf32>
    %35 = vector.multi_reduction <maximumf>, %34, %cst_30 [1] : vector<16x16xf32> to vector<16xf32>
    %36 = vector.shape_cast %35 : vector<16xf32> to vector<16x1xf32>
    %37 = vector.broadcast %36 : vector<16x1xf32> to vector<16x16xf32>
    %38 = arith.subf %34, %37 : vector<16x16xf32>
    %39 = math.exp %38 : vector<16x16xf32>
    %cst_31 = arith.constant dense<0.000000e+00> : vector<16xf32>
    %40 = vector.multi_reduction <add>, %39, %cst_31 [1] : vector<16x16xf32> to vector<16xf32>
    %41 = vector.shape_cast %40 : vector<16xf32> to vector<16x1xf32>
    %42 = tpu.reciprocal %41 {approx = true} : vector<16x1xf32> -> vector<16x1xf32>
    %43 = vector.broadcast %42 : vector<16x1xf32> to vector<16x16xf32>
    %44 = arith.mulf %39, %43 : vector<16x16xf32>
    %45 = arith.truncf %44 : vector<16x16xf32> to vector<16x16xbf16>
    %cst_32 = arith.constant dense<0.000000e+00> : vector<16x16xf32>
    %46 = tpu.matmul %45, %30, %cst_32 {dimension_numbers = #tpu.dot_dimension_numbers<[1], [0], [0], [1], [0, 0, 1, 1], [], []>} : vector<16x16xbf16>, vector<16x16xbf16>, vector<16x16xf32> -> vector<16x16xf32>
    %47 = arith.truncf %46 : vector<16x16xf32> to vector<16x16xbf16>
    %48 = vector.extract_strided_slice %18 {offsets = [0, 0, 0], sizes = [1, 16, 32], strides = [1, 1, 1]} : vector<2x16x32xbf16> to vector<1x16x32xbf16>
    %49 = vector.shape_cast %48 : vector<1x16x32xbf16> to vector<16x32xbf16>
    %cst_33 = arith.constant dense<0.000000e+00> : vector<16x32xf32>
    %50 = tpu.matmul %47, %49, %cst_33 {dimension_numbers = #tpu.dot_dimension_numbers<[1], [0], [0], [1], [0, 0, 1, 1], [], []>} : vector<16x16xbf16>, vector<16x32xbf16>, vector<16x32xf32> -> vector<16x32xf32>
    %51 = vector.extract_strided_slice %14 {offsets = [0, 16], sizes = [16, 16], strides = [1, 1]} : vector<16x32xf32> to vector<16x16xf32>
    %52 = arith.truncf %51 : vector<16x16xf32> to vector<16x16xbf16>
    %53 = vector.extract_strided_slice %15 {offsets = [0, 16], sizes = [16, 16], strides = [1, 1]} : vector<16x32xf32> to vector<16x16xf32>
    %54 = arith.truncf %53 : vector<16x16xf32> to vector<16x16xbf16>
    %55 = vector.extract_strided_slice %16 {offsets = [0, 16], sizes = [16, 16], strides = [1, 1]} : vector<16x32xf32> to vector<16x16xf32>
    %56 = arith.truncf %55 : vector<16x16xf32> to vector<16x16xbf16>
    %cst_34 = arith.constant dense<0.000000e+00> : vector<16x16xf32>
    %57 = tpu.matmul %52, %54, %cst_34 {dimension_numbers = #tpu.dot_dimension_numbers<[1], [1], [0], [0], [0, 0, 1, 0], [], []>} : vector<16x16xbf16>, vector<16x16xbf16>, vector<16x16xf32> -> vector<16x16xf32>
    %cst_35 = arith.constant 2.500000e-01 : f32
    %58 = vector.broadcast %cst_35 : f32 to vector<16x16xf32>
    %59 = arith.mulf %57, %58 : vector<16x16xf32>
    %60 = arith.addf %59, %3 : vector<16x16xf32>
    %cst_36 = arith.constant dense<0xFF800000> : vector<16xf32>
    %61 = vector.multi_reduction <maximumf>, %60, %cst_36 [1] : vector<16x16xf32> to vector<16xf32>
    %62 = vector.shape_cast %61 : vector<16xf32> to vector<16x1xf32>
    %63 = vector.broadcast %62 : vector<16x1xf32> to vector<16x16xf32>
    %64 = arith.subf %60, %63 : vector<16x16xf32>
    %65 = math.exp %64 : vector<16x16xf32>
    %cst_37 = arith.constant dense<0.000000e+00> : vector<16xf32>
    %66 = vector.multi_reduction <add>, %65, %cst_37 [1] : vector<16x16xf32> to vector<16xf32>
    %67 = vector.shape_cast %66 : vector<16xf32> to vector<16x1xf32>
    %68 = tpu.reciprocal %67 {approx = true} : vector<16x1xf32> -> vector<16x1xf32>
    %69 = vector.broadcast %68 : vector<16x1xf32> to vector<16x16xf32>
    %70 = arith.mulf %65, %69 : vector<16x16xf32>
    %71 = arith.truncf %70 : vector<16x16xf32> to vector<16x16xbf16>
    %cst_38 = arith.constant dense<0.000000e+00> : vector<16x16xf32>
    %72 = tpu.matmul %71, %56, %cst_38 {dimension_numbers = #tpu.dot_dimension_numbers<[1], [0], [0], [1], [0, 0, 1, 1], [], []>} : vector<16x16xbf16>, vector<16x16xbf16>, vector<16x16xf32> -> vector<16x16xf32>
    %73 = arith.truncf %72 : vector<16x16xf32> to vector<16x16xbf16>
    %74 = vector.extract_strided_slice %18 {offsets = [1, 0, 0], sizes = [1, 16, 32], strides = [1, 1, 1]} : vector<2x16x32xbf16> to vector<1x16x32xbf16>
    %75 = vector.shape_cast %74 : vector<1x16x32xbf16> to vector<16x32xbf16>
    %cst_39 = arith.constant dense<0.000000e+00> : vector<16x32xf32>
    %76 = tpu.matmul %73, %75, %cst_39 {dimension_numbers = #tpu.dot_dimension_numbers<[1], [0], [0], [1], [0, 0, 1, 1], [], []>} : vector<16x16xbf16>, vector<16x32xbf16>, vector<16x32xf32> -> vector<16x32xf32>
    %77 = arith.addf %50, %76 : vector<16x32xf32>
    %78 = vector.broadcast %20 : vector<1x32xf32> to vector<16x32xf32>
    %79 = arith.addf %77, %78 : vector<16x32xf32>
    %80 = arith.addf %79, %0 : vector<16x32xf32>
    %cst_40 = arith.constant dense<0.000000e+00> : vector<16xf32>
    %81 = vector.multi_reduction <add>, %80, %cst_40 [1] : vector<16x32xf32> to vector<16xf32>
    %82 = vector.shape_cast %81 : vector<16xf32> to vector<16x1xf32>
    %cst_41 = arith.constant 3.200000e+01 : f32
    %83 = vector.broadcast %cst_41 : f32 to vector<16x1xf32>
    %84 = arith.divf %82, %83 : vector<16x1xf32>
    %85 = vector.broadcast %84 : vector<16x1xf32> to vector<16x32xf32>
    %86 = arith.subf %80, %85 : vector<16x32xf32>
    %87 = arith.mulf %86, %86 : vector<16x32xf32>
    %cst_42 = arith.constant dense<0.000000e+00> : vector<16xf32>
    %88 = vector.multi_reduction <add>, %87, %cst_42 [1] : vector<16x32xf32> to vector<16xf32>
    %89 = vector.shape_cast %88 : vector<16xf32> to vector<16x1xf32>
    %cst_43 = arith.constant 3.200000e+01 : f32
    %90 = vector.broadcast %cst_43 : f32 to vector<16x1xf32>
    %91 = arith.divf %89, %90 : vector<16x1xf32>
    %cst_44 = arith.constant 9.99999974E-6 : f32
    %92 = vector.broadcast %cst_44 : f32 to vector<16x1xf32>
    %93 = arith.addf %91, %92 : vector<16x1xf32>
    %94 = math.rsqrt %93 : vector<16x1xf32>
    %95 = vector.broadcast %94 : vector<16x1xf32> to vector<16x32xf32>
    %96 = arith.mulf %86, %95 : vector<16x32xf32>
    %97 = vector.broadcast %22 : vector<1x32xf32> to vector<16x32xf32>
    %98 = arith.mulf %96, %97 : vector<16x32xf32>
    %99 = vector.broadcast %24 : vector<1x32xf32> to vector<16x32xf32>
    %100 = arith.addf %98, %99 : vector<16x32xf32>
    %101 = vector.broadcast %5 : vector<16x1xf32> to vector<16x32xf32>
    %102 = arith.mulf %100, %101 : vector<16x32xf32>
    %103 = arith.truncf %102 : vector<16x32xf32> to vector<16x32xbf16>
    %c0_45 = arith.constant 0 : index
    %c0_46 = arith.constant 0 : index
    %c0_47 = arith.constant 0 : index
    %104 = vector.load %arg11[%c0_45, %c0_46, %c0_47] : memref<2x32x32xbf16, #tpu.memory_space<vmem>>, vector<1x32x32xbf16>
    %105 = vector.shape_cast %104 : vector<1x32x32xbf16> to vector<32x32xbf16>
    %cst_48 = arith.constant dense<0.000000e+00> : vector<16x32xf32>
    %106 = tpu.matmul %103, %105, %cst_48 {dimension_numbers = #tpu.dot_dimension_numbers<[1], [0], [0], [1], [0, 0, 1, 1], [], []>} : vector<16x32xbf16>, vector<32x32xbf16>, vector<16x32xf32> -> vector<16x32xf32>
    %c0_49 = arith.constant 0 : index
    %c0_50 = arith.constant 0 : index
    %c0_51 = arith.constant 0 : index
    %107 = vector.load %arg12[%c0_49, %c0_50, %c0_51] : memref<2x1x32xf32, #tpu.memory_space<vmem>>, vector<1x1x32xf32>
    %108 = vector.shape_cast %107 : vector<1x1x32xf32> to vector<1x32xf32>
    %109 = vector.broadcast %108 : vector<1x32xf32> to vector<16x32xf32>
    %110 = arith.addf %106, %109 : vector<16x32xf32>
    %c0_52 = arith.constant 0 : index
    %c0_53 = arith.constant 0 : index
    %c0_54 = arith.constant 0 : index
    %111 = vector.load %arg13[%c0_52, %c0_53, %c0_54] : memref<2x32x64xbf16, #tpu.memory_space<vmem>>, vector<1x32x64xbf16>
    %112 = vector.shape_cast %111 : vector<1x32x64xbf16> to vector<32x64xbf16>
    %cst_55 = arith.constant dense<0.000000e+00> : vector<16x64xf32>
    %113 = tpu.matmul %2, %112, %cst_55 {dimension_numbers = #tpu.dot_dimension_numbers<[1], [0], [0], [1], [0, 0, 1, 1], [], []>} : vector<16x32xbf16>, vector<32x64xbf16>, vector<16x64xf32> -> vector<16x64xf32>
    %c0_56 = arith.constant 0 : index
    %c0_57 = arith.constant 0 : index
    %c0_58 = arith.constant 0 : index
    %114 = vector.load %arg14[%c0_56, %c0_57, %c0_58] : memref<2x1x64xf32, #tpu.memory_space<vmem>>, vector<1x1x64xf32>
    %115 = vector.shape_cast %114 : vector<1x1x64xf32> to vector<1x64xf32>
    %116 = vector.broadcast %115 : vector<1x64xf32> to vector<16x64xf32>
    %117 = arith.addf %113, %116 : vector<16x64xf32>
    %118 = vector.extract_strided_slice %117 {offsets = [0, 0], sizes = [16, 32], strides = [1, 1]} : vector<16x64xf32> to vector<16x32xf32>
    %119 = vector.extract_strided_slice %117 {offsets = [0, 32], sizes = [16, 32], strides = [1, 1]} : vector<16x64xf32> to vector<16x32xf32>
    %c0_59 = arith.constant 0 : index
    %c0_60 = arith.constant 0 : index
    %c0_61 = arith.constant 0 : index
    %c0_62 = arith.constant 0 : index
    %120 = vector.load %arg15[%c0_59, %c0_60, %c0_61, %c0_62] : memref<2x2x16x32xbf16, #tpu.memory_space<vmem>>, vector<1x2x16x32xbf16>
    %121 = vector.shape_cast %120 : vector<1x2x16x32xbf16> to vector<2x16x32xbf16>
    %c0_63 = arith.constant 0 : index
    %c0_64 = arith.constant 0 : index
    %c0_65 = arith.constant 0 : index
    %122 = vector.load %arg16[%c0_63, %c0_64, %c0_65] : memref<2x1x32xf32, #tpu.memory_space<vmem>>, vector<1x1x32xf32>
    %123 = vector.shape_cast %122 : vector<1x1x32xf32> to vector<1x32xf32>
    %c0_66 = arith.constant 0 : index
    %c0_67 = arith.constant 0 : index
    %c0_68 = arith.constant 0 : index
    %124 = vector.load %arg17[%c0_66, %c0_67, %c0_68] : memref<2x1x32xf32, #tpu.memory_space<vmem>>, vector<1x1x32xf32>
    %125 = vector.shape_cast %124 : vector<1x1x32xf32> to vector<1x32xf32>
    %c0_69 = arith.constant 0 : index
    %c0_70 = arith.constant 0 : index
    %c0_71 = arith.constant 0 : index
    %126 = vector.load %arg18[%c0_69, %c0_70, %c0_71] : memref<2x1x32xf32, #tpu.memory_space<vmem>>, vector<1x1x32xf32>
    %127 = vector.shape_cast %126 : vector<1x1x32xf32> to vector<1x32xf32>
    %128 = vector.extract_strided_slice %110 {offsets = [0, 0], sizes = [16, 16], strides = [1, 1]} : vector<16x32xf32> to vector<16x16xf32>
    %129 = arith.truncf %128 : vector<16x16xf32> to vector<16x16xbf16>
    %130 = vector.extract_strided_slice %118 {offsets = [0, 0], sizes = [16, 16], strides = [1, 1]} : vector<16x32xf32> to vector<16x16xf32>
    %131 = arith.truncf %130 : vector<16x16xf32> to vector<16x16xbf16>
    %132 = vector.extract_strided_slice %119 {offsets = [0, 0], sizes = [16, 16], strides = [1, 1]} : vector<16x32xf32> to vector<16x16xf32>
    %133 = arith.truncf %132 : vector<16x16xf32> to vector<16x16xbf16>
    %cst_72 = arith.constant dense<0.000000e+00> : vector<16x16xf32>
    %134 = tpu.matmul %129, %131, %cst_72 {dimension_numbers = #tpu.dot_dimension_numbers<[1], [1], [0], [0], [0, 0, 1, 0], [], []>} : vector<16x16xbf16>, vector<16x16xbf16>, vector<16x16xf32> -> vector<16x16xf32>
    %cst_73 = arith.constant 2.500000e-01 : f32
    %135 = vector.broadcast %cst_73 : f32 to vector<16x16xf32>
    %136 = arith.mulf %134, %135 : vector<16x16xf32>
    %137 = arith.addf %136, %4 : vector<16x16xf32>
    %cst_74 = arith.constant dense<0xFF800000> : vector<16xf32>
    %138 = vector.multi_reduction <maximumf>, %137, %cst_74 [1] : vector<16x16xf32> to vector<16xf32>
    %139 = vector.shape_cast %138 : vector<16xf32> to vector<16x1xf32>
    %140 = vector.broadcast %139 : vector<16x1xf32> to vector<16x16xf32>
    %141 = arith.subf %137, %140 : vector<16x16xf32>
    %142 = math.exp %141 : vector<16x16xf32>
    %cst_75 = arith.constant dense<0.000000e+00> : vector<16xf32>
    %143 = vector.multi_reduction <add>, %142, %cst_75 [1] : vector<16x16xf32> to vector<16xf32>
    %144 = vector.shape_cast %143 : vector<16xf32> to vector<16x1xf32>
    %145 = tpu.reciprocal %144 {approx = true} : vector<16x1xf32> -> vector<16x1xf32>
    %146 = vector.broadcast %145 : vector<16x1xf32> to vector<16x16xf32>
    %147 = arith.mulf %142, %146 : vector<16x16xf32>
    %148 = arith.truncf %147 : vector<16x16xf32> to vector<16x16xbf16>
    %cst_76 = arith.constant dense<0.000000e+00> : vector<16x16xf32>
    %149 = tpu.matmul %148, %133, %cst_76 {dimension_numbers = #tpu.dot_dimension_numbers<[1], [0], [0], [1], [0, 0, 1, 1], [], []>} : vector<16x16xbf16>, vector<16x16xbf16>, vector<16x16xf32> -> vector<16x16xf32>
    %150 = arith.truncf %149 : vector<16x16xf32> to vector<16x16xbf16>
    %151 = vector.extract_strided_slice %121 {offsets = [0, 0, 0], sizes = [1, 16, 32], strides = [1, 1, 1]} : vector<2x16x32xbf16> to vector<1x16x32xbf16>
    %152 = vector.shape_cast %151 : vector<1x16x32xbf16> to vector<16x32xbf16>
    %cst_77 = arith.constant dense<0.000000e+00> : vector<16x32xf32>
    %153 = tpu.matmul %150, %152, %cst_77 {dimension_numbers = #tpu.dot_dimension_numbers<[1], [0], [0], [1], [0, 0, 1, 1], [], []>} : vector<16x16xbf16>, vector<16x32xbf16>, vector<16x32xf32> -> vector<16x32xf32>
    %154 = vector.extract_strided_slice %110 {offsets = [0, 16], sizes = [16, 16], strides = [1, 1]} : vector<16x32xf32> to vector<16x16xf32>
    %155 = arith.truncf %154 : vector<16x16xf32> to vector<16x16xbf16>
    %156 = vector.extract_strided_slice %118 {offsets = [0, 16], sizes = [16, 16], strides = [1, 1]} : vector<16x32xf32> to vector<16x16xf32>
    %157 = arith.truncf %156 : vector<16x16xf32> to vector<16x16xbf16>
    %158 = vector.extract_strided_slice %119 {offsets = [0, 16], sizes = [16, 16], strides = [1, 1]} : vector<16x32xf32> to vector<16x16xf32>
    %159 = arith.truncf %158 : vector<16x16xf32> to vector<16x16xbf16>
    %cst_78 = arith.constant dense<0.000000e+00> : vector<16x16xf32>
    %160 = tpu.matmul %155, %157, %cst_78 {dimension_numbers = #tpu.dot_dimension_numbers<[1], [1], [0], [0], [0, 0, 1, 0], [], []>} : vector<16x16xbf16>, vector<16x16xbf16>, vector<16x16xf32> -> vector<16x16xf32>
    %cst_79 = arith.constant 2.500000e-01 : f32
    %161 = vector.broadcast %cst_79 : f32 to vector<16x16xf32>
    %162 = arith.mulf %160, %161 : vector<16x16xf32>
    %163 = arith.addf %162, %4 : vector<16x16xf32>
    %cst_80 = arith.constant dense<0xFF800000> : vector<16xf32>
    %164 = vector.multi_reduction <maximumf>, %163, %cst_80 [1] : vector<16x16xf32> to vector<16xf32>
    %165 = vector.shape_cast %164 : vector<16xf32> to vector<16x1xf32>
    %166 = vector.broadcast %165 : vector<16x1xf32> to vector<16x16xf32>
    %167 = arith.subf %163, %166 : vector<16x16xf32>
    %168 = math.exp %167 : vector<16x16xf32>
    %cst_81 = arith.constant dense<0.000000e+00> : vector<16xf32>
    %169 = vector.multi_reduction <add>, %168, %cst_81 [1] : vector<16x16xf32> to vector<16xf32>
    %170 = vector.shape_cast %169 : vector<16xf32> to vector<16x1xf32>
    %171 = tpu.reciprocal %170 {approx = true} : vector<16x1xf32> -> vector<16x1xf32>
    %172 = vector.broadcast %171 : vector<16x1xf32> to vector<16x16xf32>
    %173 = arith.mulf %168, %172 : vector<16x16xf32>
    %174 = arith.truncf %173 : vector<16x16xf32> to vector<16x16xbf16>
    %cst_82 = arith.constant dense<0.000000e+00> : vector<16x16xf32>
    %175 = tpu.matmul %174, %159, %cst_82 {dimension_numbers = #tpu.dot_dimension_numbers<[1], [0], [0], [1], [0, 0, 1, 1], [], []>} : vector<16x16xbf16>, vector<16x16xbf16>, vector<16x16xf32> -> vector<16x16xf32>
    %176 = arith.truncf %175 : vector<16x16xf32> to vector<16x16xbf16>
    %177 = vector.extract_strided_slice %121 {offsets = [1, 0, 0], sizes = [1, 16, 32], strides = [1, 1, 1]} : vector<2x16x32xbf16> to vector<1x16x32xbf16>
    %178 = vector.shape_cast %177 : vector<1x16x32xbf16> to vector<16x32xbf16>
    %cst_83 = arith.constant dense<0.000000e+00> : vector<16x32xf32>
    %179 = tpu.matmul %176, %178, %cst_83 {dimension_numbers = #tpu.dot_dimension_numbers<[1], [0], [0], [1], [0, 0, 1, 1], [], []>} : vector<16x16xbf16>, vector<16x32xbf16>, vector<16x32xf32> -> vector<16x32xf32>
    %180 = arith.addf %153, %179 : vector<16x32xf32>
    %181 = vector.broadcast %123 : vector<1x32xf32> to vector<16x32xf32>
    %182 = arith.addf %180, %181 : vector<16x32xf32>
    %183 = arith.addf %182, %102 : vector<16x32xf32>
    %cst_84 = arith.constant dense<0.000000e+00> : vector<16xf32>
    %184 = vector.multi_reduction <add>, %183, %cst_84 [1] : vector<16x32xf32> to vector<16xf32>
    %185 = vector.shape_cast %184 : vector<16xf32> to vector<16x1xf32>
    %cst_85 = arith.constant 3.200000e+01 : f32
    %186 = vector.broadcast %cst_85 : f32 to vector<16x1xf32>
    %187 = arith.divf %185, %186 : vector<16x1xf32>
    %188 = vector.broadcast %187 : vector<16x1xf32> to vector<16x32xf32>
    %189 = arith.subf %183, %188 : vector<16x32xf32>
    %190 = arith.mulf %189, %189 : vector<16x32xf32>
    %cst_86 = arith.constant dense<0.000000e+00> : vector<16xf32>
    %191 = vector.multi_reduction <add>, %190, %cst_86 [1] : vector<16x32xf32> to vector<16xf32>
    %192 = vector.shape_cast %191 : vector<16xf32> to vector<16x1xf32>
    %cst_87 = arith.constant 3.200000e+01 : f32
    %193 = vector.broadcast %cst_87 : f32 to vector<16x1xf32>
    %194 = arith.divf %192, %193 : vector<16x1xf32>
    %cst_88 = arith.constant 9.99999974E-6 : f32
    %195 = vector.broadcast %cst_88 : f32 to vector<16x1xf32>
    %196 = arith.addf %194, %195 : vector<16x1xf32>
    %197 = math.rsqrt %196 : vector<16x1xf32>
    %198 = vector.broadcast %197 : vector<16x1xf32> to vector<16x32xf32>
    %199 = arith.mulf %189, %198 : vector<16x32xf32>
    %200 = vector.broadcast %125 : vector<1x32xf32> to vector<16x32xf32>
    %201 = arith.mulf %199, %200 : vector<16x32xf32>
    %202 = vector.broadcast %127 : vector<1x32xf32> to vector<16x32xf32>
    %203 = arith.addf %201, %202 : vector<16x32xf32>
    %204 = vector.broadcast %5 : vector<16x1xf32> to vector<16x32xf32>
    %205 = arith.mulf %203, %204 : vector<16x32xf32>
    %206 = arith.truncf %205 : vector<16x32xf32> to vector<16x32xbf16>
    %c0_89 = arith.constant 0 : index
    %c0_90 = arith.constant 0 : index
    %c0_91 = arith.constant 0 : index
    %207 = vector.load %arg19[%c0_89, %c0_90, %c0_91] : memref<2x32x64xbf16, #tpu.memory_space<vmem>>, vector<1x32x64xbf16>
    %208 = vector.shape_cast %207 : vector<1x32x64xbf16> to vector<32x64xbf16>
    %cst_92 = arith.constant dense<0.000000e+00> : vector<16x64xf32>
    %209 = tpu.matmul %206, %208, %cst_92 {dimension_numbers = #tpu.dot_dimension_numbers<[1], [0], [0], [1], [0, 0, 1, 1], [], []>} : vector<16x32xbf16>, vector<32x64xbf16>, vector<16x64xf32> -> vector<16x64xf32>
    %c0_93 = arith.constant 0 : index
    %c0_94 = arith.constant 0 : index
    %c0_95 = arith.constant 0 : index
    %210 = vector.load %arg20[%c0_93, %c0_94, %c0_95] : memref<2x1x64xf32, #tpu.memory_space<vmem>>, vector<1x1x64xf32>
    %211 = vector.shape_cast %210 : vector<1x1x64xf32> to vector<1x64xf32>
    %212 = vector.broadcast %211 : vector<1x64xf32> to vector<16x64xf32>
    %213 = arith.addf %209, %212 : vector<16x64xf32>
    %cst_96 = arith.constant 0.000000e+00 : f32
    %214 = vector.broadcast %cst_96 : f32 to vector<16x64xf32>
    %215 = arith.maximumf %213, %214 : vector<16x64xf32>
    %216 = arith.truncf %215 : vector<16x64xf32> to vector<16x64xbf16>
    %c0_97 = arith.constant 0 : index
    %c0_98 = arith.constant 0 : index
    %c0_99 = arith.constant 0 : index
    %217 = vector.load %arg21[%c0_97, %c0_98, %c0_99] : memref<2x64x32xbf16, #tpu.memory_space<vmem>>, vector<1x64x32xbf16>
    %218 = vector.shape_cast %217 : vector<1x64x32xbf16> to vector<64x32xbf16>
    %cst_100 = arith.constant dense<0.000000e+00> : vector<16x32xf32>
    %219 = tpu.matmul %216, %218, %cst_100 {dimension_numbers = #tpu.dot_dimension_numbers<[1], [0], [0], [1], [0, 0, 1, 1], [], []>} : vector<16x64xbf16>, vector<64x32xbf16>, vector<16x32xf32> -> vector<16x32xf32>
    %c0_101 = arith.constant 0 : index
    %c0_102 = arith.constant 0 : index
    %c0_103 = arith.constant 0 : index
    %220 = vector.load %arg22[%c0_101, %c0_102, %c0_103] : memref<2x1x32xf32, #tpu.memory_space<vmem>>, vector<1x1x32xf32>
    %221 = vector.shape_cast %220 : vector<1x1x32xf32> to vector<1x32xf32>
    %222 = vector.broadcast %221 : vector<1x32xf32> to vector<16x32xf32>
    %223 = arith.addf %219, %222 : vector<16x32xf32>
    %224 = arith.addf %223, %205 : vector<16x32xf32>
    %c0_104 = arith.constant 0 : index
    %c0_105 = arith.constant 0 : index
    %c0_106 = arith.constant 0 : index
    %225 = vector.load %arg23[%c0_104, %c0_105, %c0_106] : memref<2x1x32xf32, #tpu.memory_space<vmem>>, vector<1x1x32xf32>
    %226 = vector.shape_cast %225 : vector<1x1x32xf32> to vector<1x32xf32>
    %c0_107 = arith.constant 0 : index
    %c0_108 = arith.constant 0 : index
    %c0_109 = arith.constant 0 : index
    %227 = vector.load %arg24[%c0_107, %c0_108, %c0_109] : memref<2x1x32xf32, #tpu.memory_space<vmem>>, vector<1x1x32xf32>
    %228 = vector.shape_cast %227 : vector<1x1x32xf32> to vector<1x32xf32>
    %cst_110 = arith.constant dense<0.000000e+00> : vector<16xf32>
    %229 = vector.multi_reduction <add>, %224, %cst_110 [1] : vector<16x32xf32> to vector<16xf32>
    %230 = vector.shape_cast %229 : vector<16xf32> to vector<16x1xf32>
    %cst_111 = arith.constant 3.200000e+01 : f32
    %231 = vector.broadcast %cst_111 : f32 to vector<16x1xf32>
    %232 = arith.divf %230, %231 : vector<16x1xf32>
    %233 = vector.broadcast %232 : vector<16x1xf32> to vector<16x32xf32>
    %234 = arith.subf %224, %233 : vector<16x32xf32>
    %235 = arith.mulf %234, %234 : vector<16x32xf32>
    %cst_112 = arith.constant dense<0.000000e+00> : vector<16xf32>
    %236 = vector.multi_reduction <add>, %235, %cst_112 [1] : vector<16x32xf32> to vector<16xf32>
    %237 = vector.shape_cast %236 : vector<16xf32> to vector<16x1xf32>
    %cst_113 = arith.constant 3.200000e+01 : f32
    %238 = vector.broadcast %cst_113 : f32 to vector<16x1xf32>
    %239 = arith.divf %237, %238 : vector<16x1xf32>
    %cst_114 = arith.constant 9.99999974E-6 : f32
    %240 = vector.broadcast %cst_114 : f32 to vector<16x1xf32>
    %241 = arith.addf %239, %240 : vector<16x1xf32>
    %242 = math.rsqrt %241 : vector<16x1xf32>
    %243 = vector.broadcast %242 : vector<16x1xf32> to vector<16x32xf32>
    %244 = arith.mulf %234, %243 : vector<16x32xf32>
    %245 = vector.broadcast %226 : vector<1x32xf32> to vector<16x32xf32>
    %246 = arith.mulf %244, %245 : vector<16x32xf32>
    %247 = vector.broadcast %228 : vector<1x32xf32> to vector<16x32xf32>
    %248 = arith.addf %246, %247 : vector<16x32xf32>
    %249 = vector.broadcast %5 : vector<16x1xf32> to vector<16x32xf32>
    %250 = arith.mulf %248, %249 : vector<16x32xf32>
    %251 = arith.truncf %250 : vector<16x32xf32> to vector<16x32xbf16>
    %c1 = arith.constant 1 : index
    %c0_115 = arith.constant 0 : index
    %c0_116 = arith.constant 0 : index
    %252 = vector.load %arg5[%c1, %c0_115, %c0_116] : memref<2x32x96xbf16, #tpu.memory_space<vmem>>, vector<1x32x96xbf16>
    %253 = vector.shape_cast %252 : vector<1x32x96xbf16> to vector<32x96xbf16>
    %cst_117 = arith.constant dense<0.000000e+00> : vector<16x96xf32>
    %254 = tpu.matmul %251, %253, %cst_117 {dimension_numbers = #tpu.dot_dimension_numbers<[1], [0], [0], [1], [0, 0, 1, 1], [], []>} : vector<16x32xbf16>, vector<32x96xbf16>, vector<16x96xf32> -> vector<16x96xf32>
    %c1_118 = arith.constant 1 : index
    %c0_119 = arith.constant 0 : index
    %c0_120 = arith.constant 0 : index
    %255 = vector.load %arg6[%c1_118, %c0_119, %c0_120] : memref<2x1x96xf32, #tpu.memory_space<vmem>>, vector<1x1x96xf32>
    %256 = vector.shape_cast %255 : vector<1x1x96xf32> to vector<1x96xf32>
    %257 = vector.broadcast %256 : vector<1x96xf32> to vector<16x96xf32>
    %258 = arith.addf %254, %257 : vector<16x96xf32>
    %259 = vector.extract_strided_slice %258 {offsets = [0, 0], sizes = [16, 32], strides = [1, 1]} : vector<16x96xf32> to vector<16x32xf32>
    %260 = vector.extract_strided_slice %258 {offsets = [0, 32], sizes = [16, 32], strides = [1, 1]} : vector<16x96xf32> to vector<16x32xf32>
    %261 = vector.extract_strided_slice %258 {offsets = [0, 64], sizes = [16, 32], strides = [1, 1]} : vector<16x96xf32> to vector<16x32xf32>
    %c1_121 = arith.constant 1 : index
    %c0_122 = arith.constant 0 : index
    %c0_123 = arith.constant 0 : index
    %c0_124 = arith.constant 0 : index
    %262 = vector.load %arg7[%c1_121, %c0_122, %c0_123, %c0_124] : memref<2x2x16x32xbf16, #tpu.memory_space<vmem>>, vector<1x2x16x32xbf16>
    %263 = vector.shape_cast %262 : vector<1x2x16x32xbf16> to vector<2x16x32xbf16>
    %c1_125 = arith.constant 1 : index
    %c0_126 = arith.constant 0 : index
    %c0_127 = arith.constant 0 : index
    %264 = vector.load %arg8[%c1_125, %c0_126, %c0_127] : memref<2x1x32xf32, #tpu.memory_space<vmem>>, vector<1x1x32xf32>
    %265 = vector.shape_cast %264 : vector<1x1x32xf32> to vector<1x32xf32>
    %c1_128 = arith.constant 1 : index
    %c0_129 = arith.constant 0 : index
    %c0_130 = arith.constant 0 : index
    %266 = vector.load %arg9[%c1_128, %c0_129, %c0_130] : memref<2x1x32xf32, #tpu.memory_space<vmem>>, vector<1x1x32xf32>
    %267 = vector.shape_cast %266 : vector<1x1x32xf32> to vector<1x32xf32>
    %c1_131 = arith.constant 1 : index
    %c0_132 = arith.constant 0 : index
    %c0_133 = arith.constant 0 : index
    %268 = vector.load %arg10[%c1_131, %c0_132, %c0_133] : memref<2x1x32xf32, #tpu.memory_space<vmem>>, vector<1x1x32xf32>
    %269 = vector.shape_cast %268 : vector<1x1x32xf32> to vector<1x32xf32>
    %270 = vector.extract_strided_slice %259 {offsets = [0, 0], sizes = [16, 16], strides = [1, 1]} : vector<16x32xf32> to vector<16x16xf32>
    %271 = arith.truncf %270 : vector<16x16xf32> to vector<16x16xbf16>
    %272 = vector.extract_strided_slice %260 {offsets = [0, 0], sizes = [16, 16], strides = [1, 1]} : vector<16x32xf32> to vector<16x16xf32>
    %273 = arith.truncf %272 : vector<16x16xf32> to vector<16x16xbf16>
    %274 = vector.extract_strided_slice %261 {offsets = [0, 0], sizes = [16, 16], strides = [1, 1]} : vector<16x32xf32> to vector<16x16xf32>
    %275 = arith.truncf %274 : vector<16x16xf32> to vector<16x16xbf16>
    %cst_134 = arith.constant dense<0.000000e+00> : vector<16x16xf32>
    %276 = tpu.matmul %271, %273, %cst_134 {dimension_numbers = #tpu.dot_dimension_numbers<[1], [1], [0], [0], [0, 0, 1, 0], [], []>} : vector<16x16xbf16>, vector<16x16xbf16>, vector<16x16xf32> -> vector<16x16xf32>
    %cst_135 = arith.constant 2.500000e-01 : f32
    %277 = vector.broadcast %cst_135 : f32 to vector<16x16xf32>
    %278 = arith.mulf %276, %277 : vector<16x16xf32>
    %279 = arith.addf %278, %3 : vector<16x16xf32>
    %cst_136 = arith.constant dense<0xFF800000> : vector<16xf32>
    %280 = vector.multi_reduction <maximumf>, %279, %cst_136 [1] : vector<16x16xf32> to vector<16xf32>
    %281 = vector.shape_cast %280 : vector<16xf32> to vector<16x1xf32>
    %282 = vector.broadcast %281 : vector<16x1xf32> to vector<16x16xf32>
    %283 = arith.subf %279, %282 : vector<16x16xf32>
    %284 = math.exp %283 : vector<16x16xf32>
    %cst_137 = arith.constant dense<0.000000e+00> : vector<16xf32>
    %285 = vector.multi_reduction <add>, %284, %cst_137 [1] : vector<16x16xf32> to vector<16xf32>
    %286 = vector.shape_cast %285 : vector<16xf32> to vector<16x1xf32>
    %287 = tpu.reciprocal %286 {approx = true} : vector<16x1xf32> -> vector<16x1xf32>
    %288 = vector.broadcast %287 : vector<16x1xf32> to vector<16x16xf32>
    %289 = arith.mulf %284, %288 : vector<16x16xf32>
    %290 = arith.truncf %289 : vector<16x16xf32> to vector<16x16xbf16>
    %cst_138 = arith.constant dense<0.000000e+00> : vector<16x16xf32>
    %291 = tpu.matmul %290, %275, %cst_138 {dimension_numbers = #tpu.dot_dimension_numbers<[1], [0], [0], [1], [0, 0, 1, 1], [], []>} : vector<16x16xbf16>, vector<16x16xbf16>, vector<16x16xf32> -> vector<16x16xf32>
    %292 = arith.truncf %291 : vector<16x16xf32> to vector<16x16xbf16>
    %293 = vector.extract_strided_slice %263 {offsets = [0, 0, 0], sizes = [1, 16, 32], strides = [1, 1, 1]} : vector<2x16x32xbf16> to vector<1x16x32xbf16>
    %294 = vector.shape_cast %293 : vector<1x16x32xbf16> to vector<16x32xbf16>
    %cst_139 = arith.constant dense<0.000000e+00> : vector<16x32xf32>
    %295 = tpu.matmul %292, %294, %cst_139 {dimension_numbers = #tpu.dot_dimension_numbers<[1], [0], [0], [1], [0, 0, 1, 1], [], []>} : vector<16x16xbf16>, vector<16x32xbf16>, vector<16x32xf32> -> vector<16x32xf32>
    %296 = vector.extract_strided_slice %259 {offsets = [0, 16], sizes = [16, 16], strides = [1, 1]} : vector<16x32xf32> to vector<16x16xf32>
    %297 = arith.truncf %296 : vector<16x16xf32> to vector<16x16xbf16>
    %298 = vector.extract_strided_slice %260 {offsets = [0, 16], sizes = [16, 16], strides = [1, 1]} : vector<16x32xf32> to vector<16x16xf32>
    %299 = arith.truncf %298 : vector<16x16xf32> to vector<16x16xbf16>
    %300 = vector.extract_strided_slice %261 {offsets = [0, 16], sizes = [16, 16], strides = [1, 1]} : vector<16x32xf32> to vector<16x16xf32>
    %301 = arith.truncf %300 : vector<16x16xf32> to vector<16x16xbf16>
    %cst_140 = arith.constant dense<0.000000e+00> : vector<16x16xf32>
    %302 = tpu.matmul %297, %299, %cst_140 {dimension_numbers = #tpu.dot_dimension_numbers<[1], [1], [0], [0], [0, 0, 1, 0], [], []>} : vector<16x16xbf16>, vector<16x16xbf16>, vector<16x16xf32> -> vector<16x16xf32>
    %cst_141 = arith.constant 2.500000e-01 : f32
    %303 = vector.broadcast %cst_141 : f32 to vector<16x16xf32>
    %304 = arith.mulf %302, %303 : vector<16x16xf32>
    %305 = arith.addf %304, %3 : vector<16x16xf32>
    %cst_142 = arith.constant dense<0xFF800000> : vector<16xf32>
    %306 = vector.multi_reduction <maximumf>, %305, %cst_142 [1] : vector<16x16xf32> to vector<16xf32>
    %307 = vector.shape_cast %306 : vector<16xf32> to vector<16x1xf32>
    %308 = vector.broadcast %307 : vector<16x1xf32> to vector<16x16xf32>
    %309 = arith.subf %305, %308 : vector<16x16xf32>
    %310 = math.exp %309 : vector<16x16xf32>
    %cst_143 = arith.constant dense<0.000000e+00> : vector<16xf32>
    %311 = vector.multi_reduction <add>, %310, %cst_143 [1] : vector<16x16xf32> to vector<16xf32>
    %312 = vector.shape_cast %311 : vector<16xf32> to vector<16x1xf32>
    %313 = tpu.reciprocal %312 {approx = true} : vector<16x1xf32> -> vector<16x1xf32>
    %314 = vector.broadcast %313 : vector<16x1xf32> to vector<16x16xf32>
    %315 = arith.mulf %310, %314 : vector<16x16xf32>
    %316 = arith.truncf %315 : vector<16x16xf32> to vector<16x16xbf16>
    %cst_144 = arith.constant dense<0.000000e+00> : vector<16x16xf32>
    %317 = tpu.matmul %316, %301, %cst_144 {dimension_numbers = #tpu.dot_dimension_numbers<[1], [0], [0], [1], [0, 0, 1, 1], [], []>} : vector<16x16xbf16>, vector<16x16xbf16>, vector<16x16xf32> -> vector<16x16xf32>
    %318 = arith.truncf %317 : vector<16x16xf32> to vector<16x16xbf16>
    %319 = vector.extract_strided_slice %263 {offsets = [1, 0, 0], sizes = [1, 16, 32], strides = [1, 1, 1]} : vector<2x16x32xbf16> to vector<1x16x32xbf16>
    %320 = vector.shape_cast %319 : vector<1x16x32xbf16> to vector<16x32xbf16>
    %cst_145 = arith.constant dense<0.000000e+00> : vector<16x32xf32>
    %321 = tpu.matmul %318, %320, %cst_145 {dimension_numbers = #tpu.dot_dimension_numbers<[1], [0], [0], [1], [0, 0, 1, 1], [], []>} : vector<16x16xbf16>, vector<16x32xbf16>, vector<16x32xf32> -> vector<16x32xf32>
    %322 = arith.addf %295, %321 : vector<16x32xf32>
    %323 = vector.broadcast %265 : vector<1x32xf32> to vector<16x32xf32>
    %324 = arith.addf %322, %323 : vector<16x32xf32>
    %325 = arith.addf %324, %250 : vector<16x32xf32>
    %cst_146 = arith.constant dense<0.000000e+00> : vector<16xf32>
    %326 = vector.multi_reduction <add>, %325, %cst_146 [1] : vector<16x32xf32> to vector<16xf32>
    %327 = vector.shape_cast %326 : vector<16xf32> to vector<16x1xf32>
    %cst_147 = arith.constant 3.200000e+01 : f32
    %328 = vector.broadcast %cst_147 : f32 to vector<16x1xf32>
    %329 = arith.divf %327, %328 : vector<16x1xf32>
    %330 = vector.broadcast %329 : vector<16x1xf32> to vector<16x32xf32>
    %331 = arith.subf %325, %330 : vector<16x32xf32>
    %332 = arith.mulf %331, %331 : vector<16x32xf32>
    %cst_148 = arith.constant dense<0.000000e+00> : vector<16xf32>
    %333 = vector.multi_reduction <add>, %332, %cst_148 [1] : vector<16x32xf32> to vector<16xf32>
    %334 = vector.shape_cast %333 : vector<16xf32> to vector<16x1xf32>
    %cst_149 = arith.constant 3.200000e+01 : f32
    %335 = vector.broadcast %cst_149 : f32 to vector<16x1xf32>
    %336 = arith.divf %334, %335 : vector<16x1xf32>
    %cst_150 = arith.constant 9.99999974E-6 : f32
    %337 = vector.broadcast %cst_150 : f32 to vector<16x1xf32>
    %338 = arith.addf %336, %337 : vector<16x1xf32>
    %339 = math.rsqrt %338 : vector<16x1xf32>
    %340 = vector.broadcast %339 : vector<16x1xf32> to vector<16x32xf32>
    %341 = arith.mulf %331, %340 : vector<16x32xf32>
    %342 = vector.broadcast %267 : vector<1x32xf32> to vector<16x32xf32>
    %343 = arith.mulf %341, %342 : vector<16x32xf32>
    %344 = vector.broadcast %269 : vector<1x32xf32> to vector<16x32xf32>
    %345 = arith.addf %343, %344 : vector<16x32xf32>
    %346 = vector.broadcast %5 : vector<16x1xf32> to vector<16x32xf32>
    %347 = arith.mulf %345, %346 : vector<16x32xf32>
    %348 = arith.truncf %347 : vector<16x32xf32> to vector<16x32xbf16>
    %c1_151 = arith.constant 1 : index
    %c0_152 = arith.constant 0 : index
    %c0_153 = arith.constant 0 : index
    %349 = vector.load %arg11[%c1_151, %c0_152, %c0_153] : memref<2x32x32xbf16, #tpu.memory_space<vmem>>, vector<1x32x32xbf16>
    %350 = vector.shape_cast %349 : vector<1x32x32xbf16> to vector<32x32xbf16>
    %cst_154 = arith.constant dense<0.000000e+00> : vector<16x32xf32>
    %351 = tpu.matmul %348, %350, %cst_154 {dimension_numbers = #tpu.dot_dimension_numbers<[1], [0], [0], [1], [0, 0, 1, 1], [], []>} : vector<16x32xbf16>, vector<32x32xbf16>, vector<16x32xf32> -> vector<16x32xf32>
    %c1_155 = arith.constant 1 : index
    %c0_156 = arith.constant 0 : index
    %c0_157 = arith.constant 0 : index
    %352 = vector.load %arg12[%c1_155, %c0_156, %c0_157] : memref<2x1x32xf32, #tpu.memory_space<vmem>>, vector<1x1x32xf32>
    %353 = vector.shape_cast %352 : vector<1x1x32xf32> to vector<1x32xf32>
    %354 = vector.broadcast %353 : vector<1x32xf32> to vector<16x32xf32>
    %355 = arith.addf %351, %354 : vector<16x32xf32>
    %c1_158 = arith.constant 1 : index
    %c0_159 = arith.constant 0 : index
    %c0_160 = arith.constant 0 : index
    %356 = vector.load %arg13[%c1_158, %c0_159, %c0_160] : memref<2x32x64xbf16, #tpu.memory_space<vmem>>, vector<1x32x64xbf16>
    %357 = vector.shape_cast %356 : vector<1x32x64xbf16> to vector<32x64xbf16>
    %cst_161 = arith.constant dense<0.000000e+00> : vector<16x64xf32>
    %358 = tpu.matmul %2, %357, %cst_161 {dimension_numbers = #tpu.dot_dimension_numbers<[1], [0], [0], [1], [0, 0, 1, 1], [], []>} : vector<16x32xbf16>, vector<32x64xbf16>, vector<16x64xf32> -> vector<16x64xf32>
    %c1_162 = arith.constant 1 : index
    %c0_163 = arith.constant 0 : index
    %c0_164 = arith.constant 0 : index
    %359 = vector.load %arg14[%c1_162, %c0_163, %c0_164] : memref<2x1x64xf32, #tpu.memory_space<vmem>>, vector<1x1x64xf32>
    %360 = vector.shape_cast %359 : vector<1x1x64xf32> to vector<1x64xf32>
    %361 = vector.broadcast %360 : vector<1x64xf32> to vector<16x64xf32>
    %362 = arith.addf %358, %361 : vector<16x64xf32>
    %363 = vector.extract_strided_slice %362 {offsets = [0, 0], sizes = [16, 32], strides = [1, 1]} : vector<16x64xf32> to vector<16x32xf32>
    %364 = vector.extract_strided_slice %362 {offsets = [0, 32], sizes = [16, 32], strides = [1, 1]} : vector<16x64xf32> to vector<16x32xf32>
    %c1_165 = arith.constant 1 : index
    %c0_166 = arith.constant 0 : index
    %c0_167 = arith.constant 0 : index
    %c0_168 = arith.constant 0 : index
    %365 = vector.load %arg15[%c1_165, %c0_166, %c0_167, %c0_168] : memref<2x2x16x32xbf16, #tpu.memory_space<vmem>>, vector<1x2x16x32xbf16>
    %366 = vector.shape_cast %365 : vector<1x2x16x32xbf16> to vector<2x16x32xbf16>
    %c1_169 = arith.constant 1 : index
    %c0_170 = arith.constant 0 : index
    %c0_171 = arith.constant 0 : index
    %367 = vector.load %arg16[%c1_169, %c0_170, %c0_171] : memref<2x1x32xf32, #tpu.memory_space<vmem>>, vector<1x1x32xf32>
    %368 = vector.shape_cast %367 : vector<1x1x32xf32> to vector<1x32xf32>
    %c1_172 = arith.constant 1 : index
    %c0_173 = arith.constant 0 : index
    %c0_174 = arith.constant 0 : index
    %369 = vector.load %arg17[%c1_172, %c0_173, %c0_174] : memref<2x1x32xf32, #tpu.memory_space<vmem>>, vector<1x1x32xf32>
    %370 = vector.shape_cast %369 : vector<1x1x32xf32> to vector<1x32xf32>
    %c1_175 = arith.constant 1 : index
    %c0_176 = arith.constant 0 : index
    %c0_177 = arith.constant 0 : index
    %371 = vector.load %arg18[%c1_175, %c0_176, %c0_177] : memref<2x1x32xf32, #tpu.memory_space<vmem>>, vector<1x1x32xf32>
    %372 = vector.shape_cast %371 : vector<1x1x32xf32> to vector<1x32xf32>
    %373 = vector.extract_strided_slice %355 {offsets = [0, 0], sizes = [16, 16], strides = [1, 1]} : vector<16x32xf32> to vector<16x16xf32>
    %374 = arith.truncf %373 : vector<16x16xf32> to vector<16x16xbf16>
    %375 = vector.extract_strided_slice %363 {offsets = [0, 0], sizes = [16, 16], strides = [1, 1]} : vector<16x32xf32> to vector<16x16xf32>
    %376 = arith.truncf %375 : vector<16x16xf32> to vector<16x16xbf16>
    %377 = vector.extract_strided_slice %364 {offsets = [0, 0], sizes = [16, 16], strides = [1, 1]} : vector<16x32xf32> to vector<16x16xf32>
    %378 = arith.truncf %377 : vector<16x16xf32> to vector<16x16xbf16>
    %cst_178 = arith.constant dense<0.000000e+00> : vector<16x16xf32>
    %379 = tpu.matmul %374, %376, %cst_178 {dimension_numbers = #tpu.dot_dimension_numbers<[1], [1], [0], [0], [0, 0, 1, 0], [], []>} : vector<16x16xbf16>, vector<16x16xbf16>, vector<16x16xf32> -> vector<16x16xf32>
    %cst_179 = arith.constant 2.500000e-01 : f32
    %380 = vector.broadcast %cst_179 : f32 to vector<16x16xf32>
    %381 = arith.mulf %379, %380 : vector<16x16xf32>
    %382 = arith.addf %381, %4 : vector<16x16xf32>
    %cst_180 = arith.constant dense<0xFF800000> : vector<16xf32>
    %383 = vector.multi_reduction <maximumf>, %382, %cst_180 [1] : vector<16x16xf32> to vector<16xf32>
    %384 = vector.shape_cast %383 : vector<16xf32> to vector<16x1xf32>
    %385 = vector.broadcast %384 : vector<16x1xf32> to vector<16x16xf32>
    %386 = arith.subf %382, %385 : vector<16x16xf32>
    %387 = math.exp %386 : vector<16x16xf32>
    %cst_181 = arith.constant dense<0.000000e+00> : vector<16xf32>
    %388 = vector.multi_reduction <add>, %387, %cst_181 [1] : vector<16x16xf32> to vector<16xf32>
    %389 = vector.shape_cast %388 : vector<16xf32> to vector<16x1xf32>
    %390 = tpu.reciprocal %389 {approx = true} : vector<16x1xf32> -> vector<16x1xf32>
    %391 = vector.broadcast %390 : vector<16x1xf32> to vector<16x16xf32>
    %392 = arith.mulf %387, %391 : vector<16x16xf32>
    %393 = arith.truncf %392 : vector<16x16xf32> to vector<16x16xbf16>
    %cst_182 = arith.constant dense<0.000000e+00> : vector<16x16xf32>
    %394 = tpu.matmul %393, %378, %cst_182 {dimension_numbers = #tpu.dot_dimension_numbers<[1], [0], [0], [1], [0, 0, 1, 1], [], []>} : vector<16x16xbf16>, vector<16x16xbf16>, vector<16x16xf32> -> vector<16x16xf32>
    %395 = arith.truncf %394 : vector<16x16xf32> to vector<16x16xbf16>
    %396 = vector.extract_strided_slice %366 {offsets = [0, 0, 0], sizes = [1, 16, 32], strides = [1, 1, 1]} : vector<2x16x32xbf16> to vector<1x16x32xbf16>
    %397 = vector.shape_cast %396 : vector<1x16x32xbf16> to vector<16x32xbf16>
    %cst_183 = arith.constant dense<0.000000e+00> : vector<16x32xf32>
    %398 = tpu.matmul %395, %397, %cst_183 {dimension_numbers = #tpu.dot_dimension_numbers<[1], [0], [0], [1], [0, 0, 1, 1], [], []>} : vector<16x16xbf16>, vector<16x32xbf16>, vector<16x32xf32> -> vector<16x32xf32>
    %399 = vector.extract_strided_slice %355 {offsets = [0, 16], sizes = [16, 16], strides = [1, 1]} : vector<16x32xf32> to vector<16x16xf32>
    %400 = arith.truncf %399 : vector<16x16xf32> to vector<16x16xbf16>
    %401 = vector.extract_strided_slice %363 {offsets = [0, 16], sizes = [16, 16], strides = [1, 1]} : vector<16x32xf32> to vector<16x16xf32>
    %402 = arith.truncf %401 : vector<16x16xf32> to vector<16x16xbf16>
    %403 = vector.extract_strided_slice %364 {offsets = [0, 16], sizes = [16, 16], strides = [1, 1]} : vector<16x32xf32> to vector<16x16xf32>
    %404 = arith.truncf %403 : vector<16x16xf32> to vector<16x16xbf16>
    %cst_184 = arith.constant dense<0.000000e+00> : vector<16x16xf32>
    %405 = tpu.matmul %400, %402, %cst_184 {dimension_numbers = #tpu.dot_dimension_numbers<[1], [1], [0], [0], [0, 0, 1, 0], [], []>} : vector<16x16xbf16>, vector<16x16xbf16>, vector<16x16xf32> -> vector<16x16xf32>
    %cst_185 = arith.constant 2.500000e-01 : f32
    %406 = vector.broadcast %cst_185 : f32 to vector<16x16xf32>
    %407 = arith.mulf %405, %406 : vector<16x16xf32>
    %408 = arith.addf %407, %4 : vector<16x16xf32>
    %cst_186 = arith.constant dense<0xFF800000> : vector<16xf32>
    %409 = vector.multi_reduction <maximumf>, %408, %cst_186 [1] : vector<16x16xf32> to vector<16xf32>
    %410 = vector.shape_cast %409 : vector<16xf32> to vector<16x1xf32>
    %411 = vector.broadcast %410 : vector<16x1xf32> to vector<16x16xf32>
    %412 = arith.subf %408, %411 : vector<16x16xf32>
    %413 = math.exp %412 : vector<16x16xf32>
    %cst_187 = arith.constant dense<0.000000e+00> : vector<16xf32>
    %414 = vector.multi_reduction <add>, %413, %cst_187 [1] : vector<16x16xf32> to vector<16xf32>
    %415 = vector.shape_cast %414 : vector<16xf32> to vector<16x1xf32>
    %416 = tpu.reciprocal %415 {approx = true} : vector<16x1xf32> -> vector<16x1xf32>
    %417 = vector.broadcast %416 : vector<16x1xf32> to vector<16x16xf32>
    %418 = arith.mulf %413, %417 : vector<16x16xf32>
    %419 = arith.truncf %418 : vector<16x16xf32> to vector<16x16xbf16>
    %cst_188 = arith.constant dense<0.000000e+00> : vector<16x16xf32>
    %420 = tpu.matmul %419, %404, %cst_188 {dimension_numbers = #tpu.dot_dimension_numbers<[1], [0], [0], [1], [0, 0, 1, 1], [], []>} : vector<16x16xbf16>, vector<16x16xbf16>, vector<16x16xf32> -> vector<16x16xf32>
    %421 = arith.truncf %420 : vector<16x16xf32> to vector<16x16xbf16>
    %422 = vector.extract_strided_slice %366 {offsets = [1, 0, 0], sizes = [1, 16, 32], strides = [1, 1, 1]} : vector<2x16x32xbf16> to vector<1x16x32xbf16>
    %423 = vector.shape_cast %422 : vector<1x16x32xbf16> to vector<16x32xbf16>
    %cst_189 = arith.constant dense<0.000000e+00> : vector<16x32xf32>
    %424 = tpu.matmul %421, %423, %cst_189 {dimension_numbers = #tpu.dot_dimension_numbers<[1], [0], [0], [1], [0, 0, 1, 1], [], []>} : vector<16x16xbf16>, vector<16x32xbf16>, vector<16x32xf32> -> vector<16x32xf32>
    %425 = arith.addf %398, %424 : vector<16x32xf32>
    %426 = vector.broadcast %368 : vector<1x32xf32> to vector<16x32xf32>
    %427 = arith.addf %425, %426 : vector<16x32xf32>
    %428 = arith.addf %427, %347 : vector<16x32xf32>
    %cst_190 = arith.constant dense<0.000000e+00> : vector<16xf32>
    %429 = vector.multi_reduction <add>, %428, %cst_190 [1] : vector<16x32xf32> to vector<16xf32>
    %430 = vector.shape_cast %429 : vector<16xf32> to vector<16x1xf32>
    %cst_191 = arith.constant 3.200000e+01 : f32
    %431 = vector.broadcast %cst_191 : f32 to vector<16x1xf32>
    %432 = arith.divf %430, %431 : vector<16x1xf32>
    %433 = vector.broadcast %432 : vector<16x1xf32> to vector<16x32xf32>
    %434 = arith.subf %428, %433 : vector<16x32xf32>
    %435 = arith.mulf %434, %434 : vector<16x32xf32>
    %cst_192 = arith.constant dense<0.000000e+00> : vector<16xf32>
    %436 = vector.multi_reduction <add>, %435, %cst_192 [1] : vector<16x32xf32> to vector<16xf32>
    %437 = vector.shape_cast %436 : vector<16xf32> to vector<16x1xf32>
    %cst_193 = arith.constant 3.200000e+01 : f32
    %438 = vector.broadcast %cst_193 : f32 to vector<16x1xf32>
    %439 = arith.divf %437, %438 : vector<16x1xf32>
    %cst_194 = arith.constant 9.99999974E-6 : f32
    %440 = vector.broadcast %cst_194 : f32 to vector<16x1xf32>
    %441 = arith.addf %439, %440 : vector<16x1xf32>
    %442 = math.rsqrt %441 : vector<16x1xf32>
    %443 = vector.broadcast %442 : vector<16x1xf32> to vector<16x32xf32>
    %444 = arith.mulf %434, %443 : vector<16x32xf32>
    %445 = vector.broadcast %370 : vector<1x32xf32> to vector<16x32xf32>
    %446 = arith.mulf %444, %445 : vector<16x32xf32>
    %447 = vector.broadcast %372 : vector<1x32xf32> to vector<16x32xf32>
    %448 = arith.addf %446, %447 : vector<16x32xf32>
    %449 = vector.broadcast %5 : vector<16x1xf32> to vector<16x32xf32>
    %450 = arith.mulf %448, %449 : vector<16x32xf32>
    %451 = arith.truncf %450 : vector<16x32xf32> to vector<16x32xbf16>
    %c1_195 = arith.constant 1 : index
    %c0_196 = arith.constant 0 : index
    %c0_197 = arith.constant 0 : index
    %452 = vector.load %arg19[%c1_195, %c0_196, %c0_197] : memref<2x32x64xbf16, #tpu.memory_space<vmem>>, vector<1x32x64xbf16>
    %453 = vector.shape_cast %452 : vector<1x32x64xbf16> to vector<32x64xbf16>
    %cst_198 = arith.constant dense<0.000000e+00> : vector<16x64xf32>
    %454 = tpu.matmul %451, %453, %cst_198 {dimension_numbers = #tpu.dot_dimension_numbers<[1], [0], [0], [1], [0, 0, 1, 1], [], []>} : vector<16x32xbf16>, vector<32x64xbf16>, vector<16x64xf32> -> vector<16x64xf32>
    %c1_199 = arith.constant 1 : index
    %c0_200 = arith.constant 0 : index
    %c0_201 = arith.constant 0 : index
    %455 = vector.load %arg20[%c1_199, %c0_200, %c0_201] : memref<2x1x64xf32, #tpu.memory_space<vmem>>, vector<1x1x64xf32>
    %456 = vector.shape_cast %455 : vector<1x1x64xf32> to vector<1x64xf32>
    %457 = vector.broadcast %456 : vector<1x64xf32> to vector<16x64xf32>
    %458 = arith.addf %454, %457 : vector<16x64xf32>
    %cst_202 = arith.constant 0.000000e+00 : f32
    %459 = vector.broadcast %cst_202 : f32 to vector<16x64xf32>
    %460 = arith.maximumf %458, %459 : vector<16x64xf32>
    %461 = arith.truncf %460 : vector<16x64xf32> to vector<16x64xbf16>
    %c1_203 = arith.constant 1 : index
    %c0_204 = arith.constant 0 : index
    %c0_205 = arith.constant 0 : index
    %462 = vector.load %arg21[%c1_203, %c0_204, %c0_205] : memref<2x64x32xbf16, #tpu.memory_space<vmem>>, vector<1x64x32xbf16>
    %463 = vector.shape_cast %462 : vector<1x64x32xbf16> to vector<64x32xbf16>
    %cst_206 = arith.constant dense<0.000000e+00> : vector<16x32xf32>
    %464 = tpu.matmul %461, %463, %cst_206 {dimension_numbers = #tpu.dot_dimension_numbers<[1], [0], [0], [1], [0, 0, 1, 1], [], []>} : vector<16x64xbf16>, vector<64x32xbf16>, vector<16x32xf32> -> vector<16x32xf32>
    %c1_207 = arith.constant 1 : index
    %c0_208 = arith.constant 0 : index
    %c0_209 = arith.constant 0 : index
    %465 = vector.load %arg22[%c1_207, %c0_208, %c0_209] : memref<2x1x32xf32, #tpu.memory_space<vmem>>, vector<1x1x32xf32>
    %466 = vector.shape_cast %465 : vector<1x1x32xf32> to vector<1x32xf32>
    %467 = vector.broadcast %466 : vector<1x32xf32> to vector<16x32xf32>
    %468 = arith.addf %464, %467 : vector<16x32xf32>
    %469 = arith.addf %468, %450 : vector<16x32xf32>
    %c1_210 = arith.constant 1 : index
    %c0_211 = arith.constant 0 : index
    %c0_212 = arith.constant 0 : index
    %470 = vector.load %arg23[%c1_210, %c0_211, %c0_212] : memref<2x1x32xf32, #tpu.memory_space<vmem>>, vector<1x1x32xf32>
    %471 = vector.shape_cast %470 : vector<1x1x32xf32> to vector<1x32xf32>
    %c1_213 = arith.constant 1 : index
    %c0_214 = arith.constant 0 : index
    %c0_215 = arith.constant 0 : index
    %472 = vector.load %arg24[%c1_213, %c0_214, %c0_215] : memref<2x1x32xf32, #tpu.memory_space<vmem>>, vector<1x1x32xf32>
    %473 = vector.shape_cast %472 : vector<1x1x32xf32> to vector<1x32xf32>
    %cst_216 = arith.constant dense<0.000000e+00> : vector<16xf32>
    %474 = vector.multi_reduction <add>, %469, %cst_216 [1] : vector<16x32xf32> to vector<16xf32>
    %475 = vector.shape_cast %474 : vector<16xf32> to vector<16x1xf32>
    %cst_217 = arith.constant 3.200000e+01 : f32
    %476 = vector.broadcast %cst_217 : f32 to vector<16x1xf32>
    %477 = arith.divf %475, %476 : vector<16x1xf32>
    %478 = vector.broadcast %477 : vector<16x1xf32> to vector<16x32xf32>
    %479 = arith.subf %469, %478 : vector<16x32xf32>
    %480 = arith.mulf %479, %479 : vector<16x32xf32>
    %cst_218 = arith.constant dense<0.000000e+00> : vector<16xf32>
    %481 = vector.multi_reduction <add>, %480, %cst_218 [1] : vector<16x32xf32> to vector<16xf32>
    %482 = vector.shape_cast %481 : vector<16xf32> to vector<16x1xf32>
    %cst_219 = arith.constant 3.200000e+01 : f32
    %483 = vector.broadcast %cst_219 : f32 to vector<16x1xf32>
    %484 = arith.divf %482, %483 : vector<16x1xf32>
    %cst_220 = arith.constant 9.99999974E-6 : f32
    %485 = vector.broadcast %cst_220 : f32 to vector<16x1xf32>
    %486 = arith.addf %484, %485 : vector<16x1xf32>
    %487 = math.rsqrt %486 : vector<16x1xf32>
    %488 = vector.broadcast %487 : vector<16x1xf32> to vector<16x32xf32>
    %489 = arith.mulf %479, %488 : vector<16x32xf32>
    %490 = vector.broadcast %471 : vector<1x32xf32> to vector<16x32xf32>
    %491 = arith.mulf %489, %490 : vector<16x32xf32>
    %492 = vector.broadcast %473 : vector<1x32xf32> to vector<16x32xf32>
    %493 = arith.addf %491, %492 : vector<16x32xf32>
    %494 = vector.broadcast %5 : vector<16x1xf32> to vector<16x32xf32>
    %495 = arith.mulf %493, %494 : vector<16x32xf32>
    %496 = arith.truncf %495 : vector<16x32xf32> to vector<16x32xbf16>
    %c0_221 = arith.constant 0 : index
    %c0_222 = arith.constant 0 : index
    %497 = vector.load %arg25[%c0_221, %c0_222] : memref<32x128xbf16, #tpu.memory_space<vmem>>, vector<32x128xbf16>
    %cst_223 = arith.constant dense<0.000000e+00> : vector<16x128xf32>
    %498 = tpu.matmul %496, %497, %cst_223 {dimension_numbers = #tpu.dot_dimension_numbers<[1], [0], [0], [1], [0, 0, 1, 1], [], []>} : vector<16x32xbf16>, vector<32x128xbf16>, vector<16x128xf32> -> vector<16x128xf32>
    %c0_224 = arith.constant 0 : index
    %c0_225 = arith.constant 0 : index
    %499 = vector.load %arg26[%c0_224, %c0_225] : memref<16x128xf32, #tpu.memory_space<vmem>>, vector<16x128xf32>
    tpu.vector_store %arg26[%c0_224, %c0_225], %498 {strides = array<i32>} : memref<16x128xf32, #tpu.memory_space<vmem>>, vector<16x128xf32>,
    return
  }
}

</mosaic_0001>

<bundles_post_ra>
// kernel: tpu_custom_call.1
= control target key start
LH: loop header
LB: loop body
LE: loop exit
PB: predicated region body
PF: predicated region fallthrough
CT: control target
= control target key end

     0   :  { %s4707_s0 = inlined_call_operand.hbm [shape: f32[16,32], index: 0, kind: input, shape index: {}]   ;;  %s4708_s1 = inlined_call_operand.hbm [shape: f32[16,32], index: 1, kind: input, shape index: {}]   ;;  %s4709_s2 = inlined_call_operand.hbm [shape: f32[16,16], index: 2, kind: input, shape index: {}]   ;;  %s4710_s3 = inlined_call_operand.hbm [shape: f32[16,16], index: 3, kind: input, shape index: {}]   ;;  %s4711_s4 = inlined_call_operand.vmem [shape: f32[16,1], index: 4, kind: input, shape index: {}]   ;;  %s4712_s5 = inlined_call_operand.vmem [shape: bf16[2,32,96], index: 5, kind: input, shape index: {}]   ;;  %s4713_s6 = inlined_call_operand.hbm [shape: f32[2,1,96], index: 6, kind: input, shape index: {}]   ;;  %s4714_s7 = inlined_call_operand.vmem [shape: bf16[2,2,16,32], index: 7, kind: input, shape index: {}]   ;;  %s4715_s8 = inlined_call_operand.hbm [shape: f32[2,1,32], index: 8, kind: input, shape index: {}]   ;;  %s4716_s9 = inlined_call_operand.hbm [shape: f32[2,1,32], index: 9, kind: input, shape index: {}]   ;;  %s4717_s10 = inlined_call_operand.hbm [shape: f32[2,1,32], index: 10, kind: input, shape index: {}]   ;;  %s4718_s11 = inlined_call_operand.vmem [shape: bf16[2,32,32], index: 11, kind: input, shape index: {}]   ;;  %s4719_s12 = inlined_call_operand.hbm [shape: f32[2,1,32], index: 12, kind: input, shape index: {}]   ;;  %s4720_s13 = inlined_call_operand.vmem [shape: bf16[2,32,64], index: 13, kind: input, shape index: {}]   ;;  %s4721_s14 = inlined_call_operand.hbm [shape: f32[2,1,64], index: 14, kind: input, shape index: {}]   ;;  %s4722_s15 = inlined_call_operand.hbm [shape: bf16[2,2,16,32], index: 15, kind: input, shape index: {}]   ;;  %s4723_s16 = inlined_call_operand.hbm [shape: f32[2,1,32], index: 16, kind: input, shape index: {}]   ;;  %s4724_s17 = inlined_call_operand.hbm [shape: f32[2,1,32], index: 17, kind: input, shape index: {}]   ;;  %s4725_s18 = inlined_call_operand.vmem [shape: f32[2,1,32], index: 18, kind: input, shape index: {}]   ;;  %s4726_s19 = inlined_call_operand.hbm [shape: bf16[2,32,64], index: 19, kind: input, shape index: {}]   ;;  %s4727_s20 = inlined_call_operand.vmem [shape: f32[2,1,64], index: 20, kind: input, shape index: {}]   ;;  %s4728_s21 = inlined_call_operand.vmem [shape: bf16[2,64,32], index: 21, kind: input, shape index: {}]   ;;  %s4729_s22 = inlined_call_operand.vmem [shape: f32[2,1,32], index: 22, kind: input, shape index: {}]   ;;  %s4730_s23 = inlined_call_operand.vmem [shape: f32[2,1,32], index: 23, kind: input, shape index: {}]   ;;  %s4731_s24 = inlined_call_operand.vmem [shape: f32[2,1,32], index: 24, kind: input, shape index: {}]   ;;  %s4732_s25 = inlined_call_operand.vmem [shape: bf16[32,128], index: 25, kind: input, shape index: {}]   ;;  %s4733_s26 = inlined_call_operand.hbm [shape: f32[16,128], index: 26, kind: output, shape index: {}]  }
   0x1   :  { %4750 = sst [smem:[#allocation35_spill]] %s4707_s0 }
   0x2   :  { %4751 = sst [smem:[#allocation36_spill]] %s4708_s1 }
   0x3   :  { %4752 = sst [smem:[#allocation37_spill]] %s4709_s2 }
   0x4   :  { %4753 = sst [smem:[#allocation38_spill]] %s4710_s3 }
   0x5   :  { %4754 = sst [smem:[#allocation39_spill]] %s4711_s4 }
   0x6   :  { %4755 = sst [smem:[#allocation40_spill]] %s4712_s5 }
   0x7   :  { %4756 = sst [smem:[#allocation41_spill]] %s4713_s6 }
   0x8   :  { %4757 = sst [smem:[#allocation42_spill]] %s4714_s7 }
   0x9   :  { %4758 = sst [smem:[#allocation43_spill]] %s4715_s8 }
   0xa   :  { %4759 = sst [smem:[#allocation44_spill]] %s4716_s9 }
   0xb   :  { %4760 = sst [smem:[#allocation45_spill]] %s4717_s10 }
   0xc   :  { %4761 = sst [smem:[#allocation46_spill]] %s4731_s24 }
   0xd   :  { %4762 = sst [smem:[#allocation47_spill]] %s4732_s25 }
   0xe   :  { %4763 = sst [smem:[#allocation48_spill]] %s4733_s26 }
   0xf   :  { %31 = vsyncpa [#allocation3], 0 }
  0x10   :  { %32 = vsyncpa [#allocation6], 0 }
  0x11   :  { %33 = vsyncpa [#allocation9], 0 }
  0x12   :  { %34 = vsyncpa [#allocation12], 0 }
  0x13   :  { %35 = vsyncpa [#allocation15], 0 }
  0x14   :  { %36 = vsyncpa [#allocation18], 0 }
  0x15   :  { %37 = vsyncpa [#allocation21], 0 }
  0x16   :  { %38 = vsyncpa [#allocation24], 0 }
  0x17   :  { %39 = vsyncpa [#allocation4], 0  ;;  %s3815_s27 = smov [#allocation5]   ;;  %s3816_s7 = smov [#allocation8]  }
  0x18   :  { %s57_s3 = sshll.u32 %s3815_s27, 4  ;;  %s81_s28 = sshll.u32 %s3816_s7, 4  ;;  %s58_s3 = int_to_ptr.vmem [resolvable:$true] %s57_s3  ;;  %s3978_s28 = int_to_ptr.vmem [resolvable:$true] %s81_s28 }
  0x19   :  { %s4764_s29 = sld [smem:[#allocation36_spill]] }
  0x1f   :  { %s3467_s0 = scalar_lea.hbm %s4764_s29, 256 }
  0x20   :  { %p3468_p0 = scmp.ne.s32.totalorder %s4764_s29, %s3467_s0  ;;  %p3471_p1 = scmp.lt.u32.totalorder %s3467_s0, %s4764_s29 }
  0x22   :  { %p3473_p2 = pnand %p3471_p1, %p3468_p0 }
  0x24   :  { %3476 = shalt.err (!%p3473_p2)
}
  0x25   :  { %s3477_s10 = scalar_lea.vmem %s58_s3, 256  ;;  %p3482_p4 = scmp.lt.s32.totalorder %s58_s3, %s58_s3 }
  0x26   :  { %p3478_p3 = scmp.ne.s32.totalorder %s58_s3, %s3477_s10  ;;  %p3483_p5 = scmp.lt.s32.totalorder %s3477_s10, %s3477_s10 }
  0x28   :  { %p3484_p6 = por %p3483_p5, %p3482_p4 }
  0x2a   :  { %p3485_p7 = pnand %p3484_p6, %p3478_p3 }
  0x2c   :  { %3488 = shalt.err (!%p3485_p7)
}
  0x2d   :  { %s4748_s6 = smov 128   ;;  %s3818_s1 = smov 8  }
  0x2e   :  { %63 = dma.hbm_to_vmem [thread:$0]  %s4764_s29, 256, %s58_s3, [#allocation6], %s4748_s6, %s4748_s6, %s3818_s1  }
  0x2f   :  { %s4765_s0 = sld [smem:[#allocation38_spill]] }
  0x35   :  { %s3489_s9 = scalar_lea.hbm %s4765_s0, 256 }
  0x36   :  { %p3490_p8 = scmp.ne.s32.totalorder %s4765_s0, %s3489_s9  ;;  %p3493_p9 = scmp.lt.u32.totalorder %s3489_s9, %s4765_s0 }
  0x38   :  { %p3495_p10 = pnand %p3493_p9, %p3490_p8 }
  0x3a   :  { %3498 = shalt.err (!%p3495_p10)
}
  0x3b   :  { %s3499_s26 = scalar_lea.vmem %s3978_s28, 256  ;;  %p3504_p12 = scmp.lt.s32.totalorder %s3978_s28, %s3978_s28 }
  0x3c   :  { %p3500_p11 = scmp.ne.s32.totalorder %s3978_s28, %s3499_s26  ;;  %p3505_p13 = scmp.lt.s32.totalorder %s3499_s26, %s3499_s26 }
  0x3e   :  { %p3506_p0 = por %p3505_p13, %p3504_p12 }
  0x40   :  { %p3507_p1 = pnand %p3506_p0, %p3500_p11 }
  0x42   :  { %3510 = shalt.err (!%p3507_p1)
}
  0x43   :  { %87 = dma.hbm_to_vmem [thread:$0]  %s4765_s0, 256, %s3978_s28, [#allocation9], %s4748_s6, %s4748_s6, %s3818_s1  }
  0x44   :  { %s3819_s27 = smov [#allocation11]   ;;  %s3820_s8 = smov [#allocation14]  }
  0x45   :  { %s111_s7 = sshll.u32 %s3819_s27, 4  ;;  %s135_s4 = sshll.u32 %s3820_s8, 4  ;;  %s112_s7 = int_to_ptr.vmem [resolvable:$true] %s111_s7  ;;  %s4015_s4 = int_to_ptr.vmem [resolvable:$true] %s135_s4 }
  0x46   :  { %s4766_s30 = sld [smem:[#allocation43_spill]] }
  0x4c   :  { %s3511_s2 = scalar_lea.hbm %s4766_s30, 32 }
  0x4d   :  { %p3512_p2 = scmp.ne.s32.totalorder %s4766_s30, %s3511_s2  ;;  %p3515_p3 = scmp.lt.u32.totalorder %s3511_s2, %s4766_s30 }
  0x4f   :  { %p3517_p4 = pnand %p3515_p3, %p3512_p2 }
  0x51   :  { %3520 = shalt.err (!%p3517_p4)
}
  0x52   :  { %s3521_s28 = scalar_lea.vmem %s112_s7, 32  ;;  %p3526_p6 = scmp.lt.s32.totalorder %s112_s7, %s112_s7 }
  0x53   :  { %p3522_p5 = scmp.ne.s32.totalorder %s112_s7, %s3521_s28  ;;  %p3527_p7 = scmp.lt.s32.totalorder %s3521_s28, %s3521_s28 }
  0x55   :  { %p3528_p8 = por %p3527_p7, %p3526_p6 }
  0x57   :  { %p3529_p9 = pnand %p3528_p8, %p3522_p5 }
  0x59   :  { %3532 = shalt.err (!%p3529_p9)
}
  0x5a   :  { %s3821_s0 = smov 16   ;;  %s3822_s3 = smov 1  }
  0x5b   :  { %117 = dma.hbm_to_vmem [thread:$0]  %s4766_s30, 32, %s112_s7, [#allocation12], %s3821_s0, %s3821_s0, %s3822_s3  }
  0x5c   :  { %s4767_s8 = sld [smem:[#allocation45_spill]] }
  0x62   :  { %s3533_s9 = scalar_lea.hbm %s4767_s8, 32 }
  0x63   :  { %p3534_p10 = scmp.ne.s32.totalorder %s4767_s8, %s3533_s9  ;;  %p3537_p11 = scmp.lt.u32.totalorder %s3533_s9, %s4767_s8 }
  0x65   :  { %p3539_p12 = pnand %p3537_p11, %p3534_p10 }
  0x67   :  { %3542 = shalt.err (!%p3539_p12)
}
  0x68   :  { %s3543_s28 = scalar_lea.vmem %s4015_s4, 32  ;;  %p3548_p0 = scmp.lt.s32.totalorder %s4015_s4, %s4015_s4 }
  0x69   :  { %p3544_p13 = scmp.ne.s32.totalorder %s4015_s4, %s3543_s28  ;;  %p3549_p1 = scmp.lt.s32.totalorder %s3543_s28, %s3543_s28 }
  0x6b   :  { %p3550_p2 = por %p3549_p1, %p3548_p0 }
  0x6d   :  { %p3551_p3 = pnand %p3550_p2, %p3544_p13 }
  0x6f   :  { %3554 = shalt.err (!%p3551_p3)
}
  0x70   :  { %141 = dma.hbm_to_vmem [thread:$0]  %s4767_s8, 32, %s4015_s4, [#allocation15], %s3821_s0, %s3821_s0, %s3822_s3  }
  0x71   :  { %s3823_s29 = smov [#allocation17]   ;;  %s3824_s24 = smov [#allocation20]  }
  0x72   :  { %s163_s27 = sshll.u32 %s3823_s29, 4  ;;  %s187_s25 = sshll.u32 %s3824_s24, 4  ;;  %s164_s27 = int_to_ptr.vmem [resolvable:$true] %s163_s27  ;;  %s4052_s25 = int_to_ptr.vmem [resolvable:$true] %s187_s25 }
  0x73   :  { %s3555_s2 = scalar_lea.hbm %s4721_s14, 32 }
  0x74   :  { %p3556_p4 = scmp.ne.s32.totalorder %s4721_s14, %s3555_s2  ;;  %p3559_p5 = scmp.lt.u32.totalorder %s3555_s2, %s4721_s14 }
  0x76   :  { %p3561_p6 = pnand %p3559_p5, %p3556_p4 }
  0x78   :  { %3564 = shalt.err (!%p3561_p6)
}
  0x79   :  { %s3565_s4 = scalar_lea.vmem %s164_s27, 32  ;;  %p3570_p8 = scmp.lt.s32.totalorder %s164_s27, %s164_s27 }
  0x7a   :  { %p3566_p7 = scmp.ne.s32.totalorder %s164_s27, %s3565_s4  ;;  %p3571_p9 = scmp.lt.s32.totalorder %s3565_s4, %s3565_s4 }
  0x7c   :  { %p3572_p10 = por %p3571_p9, %p3570_p8 }
  0x7e   :  { %p3573_p11 = pnand %p3572_p10, %p3566_p7 }
  0x80   :  { %3576 = shalt.err (!%p3573_p11)
}
  0x81   :  { %169 = dma.hbm_to_vmem [thread:$0]  %s4721_s14, 32, %s164_s27, [#allocation18], %s3821_s0, %s3821_s0, %s3822_s3  }
  0x82   :  { %s3577_s6 = scalar_lea.hbm %s4723_s16, 32 }
  0x83   :  { %p3578_p12 = scmp.ne.s32.totalorder %s4723_s16, %s3577_s6  ;;  %p3581_p13 = scmp.lt.u32.totalorder %s3577_s6, %s4723_s16 }
  0x85   :  { %p3583_p0 = pnand %p3581_p13, %p3578_p12 }
  0x87   :  { %3586 = shalt.err (!%p3583_p0)
}
  0x88   :  { %s3587_s5 = scalar_lea.vmem %s4052_s25, 32  ;;  %p3592_p2 = scmp.lt.s32.totalorder %s4052_s25, %s4052_s25 }
  0x89   :  { %p3588_p1 = scmp.ne.s32.totalorder %s4052_s25, %s3587_s5  ;;  %p3593_p3 = scmp.lt.s32.totalorder %s3587_s5, %s3587_s5 }
  0x8b   :  { %p3594_p4 = por %p3593_p3, %p3592_p2 }
  0x8d   :  { %p3595_p5 = pnand %p3594_p4, %p3588_p1 }
  0x8f   :  { %3598 = shalt.err (!%p3595_p5)
}
  0x90   :  { %193 = dma.hbm_to_vmem [thread:$0]  %s4723_s16, 32, %s4052_s25, [#allocation21], %s3821_s0, %s3821_s0, %s3822_s3  }
  0x91   :  { %s3825_s10 = smov [#allocation2]   ;;  %s3826_s4 = smov [#allocation7]  }
  0x92   :  { %s45_s28 = sshll.u32 %s3825_s10, 4  ;;  %s69_s8 = sshll.u32 %s3826_s4, 4  ;;  %s46_s28 = int_to_ptr.vmem [resolvable:$true] %s45_s28  ;;  %s4089_s8 = int_to_ptr.vmem [resolvable:$true] %s69_s8 }
  0x93   :  { %s4768_s29 = sld [smem:[#allocation35_spill]] }
  0x99   :  { %s3599_s6 = scalar_lea.hbm %s4768_s29, 256 }
  0x9a   :  { %p3600_p6 = scmp.ne.s32.totalorder %s4768_s29, %s3599_s6  ;;  %p3603_p7 = scmp.lt.u32.totalorder %s3599_s6, %s4768_s29 }
  0x9c   :  { %p3605_p8 = pnand %p3603_p7, %p3600_p6 }
  0x9e   :  { %3608 = shalt.err (!%p3605_p8)
}
  0x9f   :  { %s3609_s16 = scalar_lea.vmem %s46_s28, 256  ;;  %p3614_p10 = scmp.lt.s32.totalorder %s46_s28, %s46_s28 }
  0xa0   :  { %p3610_p9 = scmp.ne.s32.totalorder %s46_s28, %s3609_s16  ;;  %p3615_p11 = scmp.lt.s32.totalorder %s3609_s16, %s3609_s16 }
  0xa2   :  { %p3616_p12 = por %p3615_p11, %p3614_p10 }
  0xa4   :  { %p3617_p13 = pnand %p3616_p12, %p3610_p9 }
  0xa6   :  { %3620 = shalt.err (!%p3617_p13)
}
  0xa7   :  { %s4769_s25 = smov 128   ;;  %s4770_s4 = sld [smem:[#allocation37_spill]] }
  0xa8   :  { %51 = dma.hbm_to_vmem [thread:$0]  %s4768_s29, 256, %s46_s28, [#allocation3], %s4769_s25, %s4769_s25, %s3818_s1  }
  0xad   :  { %s3621_s7 = scalar_lea.hbm %s4770_s4, 256 }
  0xae   :  { %p3622_p0 = scmp.ne.s32.totalorder %s4770_s4, %s3621_s7  ;;  %p3625_p1 = scmp.lt.u32.totalorder %s3621_s7, %s4770_s4 }
  0xb0   :  { %p3627_p2 = pnand %p3625_p1, %p3622_p0 }
  0xb2   :  { %3630 = shalt.err (!%p3627_p2)
}
  0xb3   :  { %s3631_s26 = scalar_lea.vmem %s4089_s8, 256  ;;  %p3636_p4 = scmp.lt.s32.totalorder %s4089_s8, %s4089_s8 }
  0xb4   :  { %p3632_p3 = scmp.ne.s32.totalorder %s4089_s8, %s3631_s26  ;;  %p3637_p5 = scmp.lt.s32.totalorder %s3631_s26, %s3631_s26 }
  0xb6   :  { %p3638_p6 = por %p3637_p5, %p3636_p4 }
  0xb8   :  { %p3639_p7 = pnand %p3638_p6, %p3632_p3 }
  0xba   :  { %3642 = shalt.err (!%p3639_p7)
}
  0xbb   :  { %75 = dma.hbm_to_vmem [thread:$0]  %s4770_s4, 256, %s4089_s8, [#allocation6], %s4769_s25, %s4769_s25, %s3818_s1  }
  0xbc   :  { %s3827_s2 = smov [#allocation10]   ;;  %s3828_s5 = smov [#allocation13]  }
  0xbd   :  { %s97_s16 = sshll.u32 %s3827_s2, 4  ;;  %s123_s14 = sshll.u32 %s3828_s5, 4  ;;  %s98_s16 = int_to_ptr.vmem [resolvable:$true] %s97_s16  ;;  %s4126_s14 = int_to_ptr.vmem [resolvable:$true] %s123_s14 }
  0xbe   :  { %s4771_s7 = sld [smem:[#allocation41_spill]] }
  0xc4   :  { %s3643_s30 = scalar_lea.hbm %s4771_s7, 32 }
  0xc5   :  { %p3644_p8 = scmp.ne.s32.totalorder %s4771_s7, %s3643_s30  ;;  %p3647_p9 = scmp.lt.u32.totalorder %s3643_s30, %s4771_s7 }
  0xc7   :  { %p3649_p10 = pnand %p3647_p9, %p3644_p8 }
  0xc9   :  { %3652 = shalt.err (!%p3649_p10)
}
  0xca   :  { %s3653_s8 = scalar_lea.vmem %s98_s16, 32  ;;  %p3658_p12 = scmp.lt.s32.totalorder %s98_s16, %s98_s16 }
  0xcb   :  { %p3654_p11 = scmp.ne.s32.totalorder %s98_s16, %s3653_s8  ;;  %p3659_p13 = scmp.lt.s32.totalorder %s3653_s8, %s3653_s8 }
  0xcd   :  { %p3660_p0 = por %p3659_p13, %p3658_p12 }
  0xcf   :  { %p3661_p1 = pnand %p3660_p0, %p3654_p11 }
  0xd1   :  { %3664 = shalt.err (!%p3661_p1)
}
  0xd2   :  { %103 = dma.hbm_to_vmem [thread:$0]  %s4771_s7, 32, %s98_s16, [#allocation9], %s3821_s0, %s3821_s0, %s3822_s3  }
  0xd3   :  { %s4772_s5 = sld [smem:[#allocation44_spill]] }
  0xd9   :  { %s3665_s27 = scalar_lea.hbm %s4772_s5, 32 }
  0xda   :  { %p3666_p2 = scmp.ne.s32.totalorder %s4772_s5, %s3665_s27  ;;  %p3669_p3 = scmp.lt.u32.totalorder %s3665_s27, %s4772_s5 }
  0xdc   :  { %p3671_p4 = pnand %p3669_p3, %p3666_p2 }
  0xde   :  { %3674 = shalt.err (!%p3671_p4)
}
  0xdf   :  { %s3675_s9 = scalar_lea.vmem %s4126_s14, 32  ;;  %p3680_p6 = scmp.lt.s32.totalorder %s4126_s14, %s4126_s14 }
  0xe0   :  { %p3676_p5 = scmp.ne.s32.totalorder %s4126_s14, %s3675_s9  ;;  %p3681_p7 = scmp.lt.s32.totalorder %s3675_s9, %s3675_s9 }
  0xe2   :  { %p3682_p8 = por %p3681_p7, %p3680_p6 }
  0xe4   :  { %p3683_p9 = pnand %p3682_p8, %p3676_p5 }
  0xe6   :  { %3686 = shalt.err (!%p3683_p9)
}
  0xe7   :  { %129 = dma.hbm_to_vmem [thread:$0]  %s4772_s5, 32, %s4126_s14, [#allocation12], %s3821_s0, %s3821_s0, %s3822_s3  }
  0xe8   :  { %s3829_s26 = smov [#allocation16]   ;;  %s3830_s4 = smov [#allocation19]  }
  0xe9   :  { %s149_s8 = sshll.u32 %s3829_s26, 4  ;;  %s175_s28 = sshll.u32 %s3830_s4, 4  ;;  %s150_s8 = int_to_ptr.vmem [resolvable:$true] %s149_s8  ;;  %s4163_s28 = int_to_ptr.vmem [resolvable:$true] %s175_s28 }
  0xea   :  { %s3687_s27 = scalar_lea.hbm %s4719_s12, 32 }
  0xeb   :  { %p3688_p10 = scmp.ne.s32.totalorder %s4719_s12, %s3687_s27  ;;  %p3691_p11 = scmp.lt.u32.totalorder %s3687_s27, %s4719_s12 }
  0xed   :  { %p3693_p12 = pnand %p3691_p11, %p3688_p10 }
  0xef   :  { %3696 = shalt.err (!%p3693_p12)
}
  0xf0   :  { %s3697_s14 = scalar_lea.vmem %s150_s8, 32  ;;  %p3702_p0 = scmp.lt.s32.totalorder %s150_s8, %s150_s8 }
  0xf1   :  { %p3698_p13 = scmp.ne.s32.totalorder %s150_s8, %s3697_s14  ;;  %p3703_p1 = scmp.lt.s32.totalorder %s3697_s14, %s3697_s14 }
  0xf3   :  { %p3704_p2 = por %p3703_p1, %p3702_p0 }
  0xf5   :  { %p3705_p3 = pnand %p3704_p2, %p3698_p13 }
  0xf7   :  { %3708 = shalt.err (!%p3705_p3)
}
  0xf8   :  { %155 = dma.hbm_to_vmem [thread:$0]  %s4719_s12, 32, %s150_s8, [#allocation15], %s3821_s0, %s3821_s0, %s3822_s3  }
  0xf9   :  { %s3709_s26 = scalar_lea.hbm %s4722_s15, 512 }
  0xfa   :  { %p3710_p4 = scmp.ne.s32.totalorder %s4722_s15, %s3709_s26  ;;  %p3713_p5 = scmp.lt.u32.totalorder %s3709_s26, %s4722_s15 }
  0xfc   :  { %p3715_p6 = pnand %p3713_p5, %p3710_p4 }
  0xfe   :  { %3718 = shalt.err (!%p3715_p6)
}
  0xff   :  { %s3719_s10 = scalar_lea.vmem %s4163_s28, 512  ;;  %p3724_p8 = scmp.lt.s32.totalorder %s4163_s28, %s4163_s28 }
 0x100   :  { %p3720_p7 = scmp.ne.s32.totalorder %s4163_s28, %s3719_s10  ;;  %p3725_p9 = scmp.lt.s32.totalorder %s3719_s10, %s3719_s10 }
 0x102   :  { %p3726_p10 = por %p3725_p9, %p3724_p8 }
 0x104   :  { %p3727_p11 = pnand %p3726_p10, %p3720_p7 }
 0x106   :  { %3730 = shalt.err (!%p3727_p11)
}
 0x107   :  { %s3831_s12 = smov 64   ;;  %s3832_s8 = smov 4  }
 0x108   :  { %181 = dma.hbm_to_vmem [thread:$0]  %s4722_s15, 512, %s4163_s28, [#allocation18], %s3831_s12, %s3831_s12, %s3832_s8  }
 0x109   :  { %s3833_s24 = smov [#allocation22]   ;;  %s3834_s5 = smov [#allocation23]  }
 0x10a   :  { %s199_s14 = sshll.u32 %s3833_s24, 4  ;;  %s213_s9 = sshll.u32 %s3834_s5, 4  ;;  %s200_s14 = int_to_ptr.vmem [resolvable:$true] %s199_s14  ;;  %s4200_s9 = int_to_ptr.vmem [resolvable:$true] %s213_s9 }
 0x10b   :  { %s3731_s26 = scalar_lea.hbm %s4724_s17, 32 }
 0x10c   :  { %p3732_p12 = scmp.ne.s32.totalorder %s4724_s17, %s3731_s26  ;;  %p3735_p13 = scmp.lt.u32.totalorder %s3731_s26, %s4724_s17 }
 0x10e   :  { %p3737_p0 = pnand %p3735_p13, %p3732_p12 }
 0x110   :  { %3740 = shalt.err (!%p3737_p0)
}
 0x111   :  { %s3741_s15 = scalar_lea.vmem %s200_s14, 32  ;;  %p3746_p2 = scmp.lt.s32.totalorder %s200_s14, %s200_s14 }
 0x112   :  { %p3742_p1 = scmp.ne.s32.totalorder %s200_s14, %s3741_s15  ;;  %p3747_p3 = scmp.lt.s32.totalorder %s3741_s15, %s3741_s15 }
 0x114   :  { %p3748_p4 = por %p3747_p3, %p3746_p2 }
 0x116   :  { %p3749_p5 = pnand %p3748_p4, %p3742_p1 }
 0x118   :  { %3752 = shalt.err (!%p3749_p5)
}
 0x119   :  { %205 = dma.hbm_to_vmem [thread:$0]  %s4724_s17, 32, %s200_s14, [#allocation21], %s3821_s0, %s3821_s0, %s3822_s3  }
 0x11a   :  { %s3753_s24 = scalar_lea.hbm %s4726_s19, 512 }
 0x11b   :  { %p3754_p6 = scmp.ne.s32.totalorder %s4726_s19, %s3753_s24  ;;  %p3757_p7 = scmp.lt.u32.totalorder %s3753_s24, %s4726_s19 }
 0x11d   :  { %p3759_p8 = pnand %p3757_p7, %p3754_p6 }
 0x11f   :  { %3762 = shalt.err (!%p3759_p8)
}
 0x120   :  { %s3763_s4 = scalar_lea.vmem %s4200_s9, 512  ;;  %p3768_p10 = scmp.lt.s32.totalorder %s4200_s9, %s4200_s9 }
 0x121   :  { %p3764_p9 = scmp.ne.s32.totalorder %s4200_s9, %s3763_s4  ;;  %p3769_p11 = scmp.lt.s32.totalorder %s3763_s4, %s3763_s4 }
 0x123   :  { %p3770_p12 = por %p3769_p11, %p3768_p10 }
 0x125   :  { %p3771_p13 = pnand %p3770_p12, %p3764_p9 }
 0x127   :  { %3774 = shalt.err (!%p3771_p13)
}
 0x128   :  { %219 = dma.hbm_to_vmem [thread:$0]  %s4726_s19, 512, %s4200_s9, [#allocation24], %s3831_s12, %s3831_s12, %s3832_s8  }
 0x129   :  { %3797 = dma.done.wait [#allocation3], 256  }
 0x12a   :  { %3798 = vsyncadd [#allocation3], 4294967040 }
 0x12b   :  { %3799 = dma.done.wait [#allocation6], 512  }
 0x12c   :  { %3800 = vsyncadd [#allocation6], 4294966784 }
 0x12d   :  { %3801 = dma.done.wait [#allocation9], 288  }
 0x12e   :  { %3802 = vsyncadd [#allocation9], 4294967008 }
 0x12f   :  { %3803 = dma.done.wait [#allocation12], 64  }
 0x130   :  { %3804 = vsyncadd [#allocation12], 4294967232 }
 0x131   :  { %3805 = dma.done.wait [#allocation15], 64  }
 0x132   :  { %3806 = vsyncadd [#allocation15], 4294967232 }
 0x133   :  { %3807 = dma.done.wait [#allocation18], 544  }
 0x134   :  { %3808 = vsyncadd [#allocation18], 4294966752 }
 0x135   :  { %3809 = dma.done.wait [#allocation21], 64  }
 0x136   :  { %3810 = vsyncadd [#allocation21], 4294967232 }
 0x137   :  { %3811 = dma.done.wait [#allocation24], 512  }
 0x138   :  { %3812 = vsyncadd [#allocation24], 4294966784  ;;  %v3835_v0 = vmov 0.0   ;;  %vm3836_vm0 = vmmov 0   ;;  %s4773_s8 = sld [smem:[#allocation40_spill]]  ;;  %v4249_v3 = vld [vmem:[#allocation2] sm:$0xff] }
 0x139   :  { %3075 = vmatprep.subr.bf16.mxu0 %v3835_v0  ;;  %3079 = vmatprep.mubr.msk.bf16.mxu0 %vm3836_vm0, %v3835_v0  ;;  %v4251_v4 = vld [vmem:[#allocation2 + $0x8] sm:$0xff]  ;;  %vm310_vm1 = vcmask 261120   ;;  %v2866_v6 = vld [vmem:[#allocation10] ss:$0 sm:$0xff]  ;;  %s3837_s29 = smov 112   ;;  %s3838_s2 = smov 96  }
 0x13a   :  { %3083 = vmatprep.subr.bf16.mxu1 %v3835_v0  ;;  %3085 = vmatprep.mubr.msk.bf16.mxu1 %vm3836_vm0, %v3835_v0  ;;  %v286_v5 = vpack.c.bf16 %v4251_v4, %v4249_v3  ;;  %s3839_s27 = smov 80   ;;  %vm366_vm2 = vcmask 130048   ;;  %v4279_v20 = vld [vmem:[#allocation7] sm:$0xff]  ;;  %v4281_v24 = vld [vmem:[#allocation7 + $0x8] sm:$0xff]  ;;  %s3840_s15 = smov 48   ;;  %vm1438_vm3 = vcmask 523264  }
 0x13b   :  { %s4774_s30 = sld [smem:[#allocation42_spill]]  ;;  %s4775_s7 = sld [smem:[#allocation39_spill]] }
 0x13c   :  { %s4776_s4 = sld [smem:[#allocation46_spill]]  ;;  %s3842_s9 = smov [#allocation25]  }
 0x13e   :  { %v3345_v1 = vld [vmem:[%s4773_s8] sm:$0xff]   ;;  %v3346_v2 = vld [vmem:[%s4773_s8 + $0x8] sm:$0xff]  }
 0x13f   :  { %3076 = vmatpush3.bf16.msra.mxu0 %v3345_v1 }
 0x140   :  { %3077 = vmatprep.subr.bf16.mxu0 %v3835_v0 }
 0x143   :  { %3078 = vmatpush3.bf16.msra.mxu0 %v3346_v2 }
 0x144   :  { %3089 = vmatprep.subr.bf16.mxu0 %v3835_v0 }
 0x146   :  { %3080 = vmatmul.mubr.msk.bf16.vlgmr.msra.gmra.mrb[0].mxu0 %vm310_vm1, %v286_v5 }
 0x147   :  { %3091 = vmatprep.mubr.msk.bf16.mxu0 %vm3836_vm0, %v3835_v0 }
 0x219   :  { %v348_v7 = vpop.f32.mrb[0].mxu0 }
 0x21a   :  { %v3081_v8 = vpop.f32.mrb[1].mxu0  ;;  %v349_v10 = vadd.f32 %v2866_v6, %v348_v7 }
 0x21b   :  { %v351_v9 = vpop.f32.mrb[2].mxu0 }
 0x21c   :  { %v352_v11 = vadd.f32 %v2866_v6, %v351_v9  ;;  %v3082_v12 = vpop.f32.mrb[3].mxu0 }
 0x21e   :  { %v4260_v13 = vpack.c.bf16 %v352_v11, %v349_v10 }
 0x220   :  { %489 = vrot.lane.b32.xlu1 %v4260_v13, %s3837_s29  ;;  %364 = vrot.lane.b32.xlu0 %v4260_v13, %s3838_s2 }
 0x224   :  { %491 = vrot.lane.b32.xlu0 %v4260_v13, %s3839_s27 }
 0x292   :  { %v365_v14 = vpop.permute.xlu0 %364  ;;  %v490_v18 = vpop.permute.xlu1 %489 }
 0x293   :  { %v371_v15 = vsel %vm366_vm2, %v365_v14, 0 }
 0x294   :  { %3084 = vmatpush3.bf16.xpose.msra.mxu1 %v371_v15 }
 0x295   :  { %3095 = vmatprep.subr.bf16.mxu1 %v3835_v0 }
 0x296   :  { %v492_v16 = vpop.permute.xlu0 %491 }
 0x297   :  { %v497_v17 = vsel %vm366_vm2, %v492_v16, 0  ;;  %v3347_v16 = vld [vmem:[%s4774_s30] sm:$0xff]  }
 0x29b   :  { %3086 = vmatmul.mubr.msk.bf16.vlgmr.msra.gmra.mrb[0].mxu1 %vm366_vm2, %v4260_v13 }
 0x29c   :  { %3096 = vmatpush3.bf16.xpose.msra.mxu1 %v497_v17  ;;  %3097 = vmatprep.mubr.msk.bf16.mxu1 %vm3836_vm0, %v3835_v0  ;;  %v3348_v17 = vld [vmem:[%s4774_s30 + $0x8] sm:$0xff]  }
 0x29d   :  { %3107 = vmatprep.subr.bf16.mxu1 %v3835_v0 }
 0x2a3   :  { %3098 = vmatmul.mubr.msk.bf16.vlgmr.msra.gmra.mrb[4].mxu1 %vm366_vm2, %v490_v18 }
 0x2a4   :  { %3109 = vmatprep.mubr.msk.bf16.mxu1 %vm3836_vm0, %v3835_v0  ;;  %3108 = vmatpush3.bf16.msra.mxu1 %v3348_v17 }
 0x2a5   :  { %3119 = vmatprep.subr.bf16.mxu1 %v3835_v0 }
 0x36e   :  { %v407_v19 = vpop.f32.mrb[0].mxu1 }
 0x36f   :  { %v414_v21 = vmul.f32 0.25, %v407_v19  ;;  %v3087_v22 = vpop.f32.mrb[1].mxu1 }
 0x370   :  { %v410_v23 = vpop.f32.mrb[2].mxu1 }
 0x371   :  { %v415_v25 = vmul.f32 0.25, %v410_v23  ;;  %v3088_v26 = vpop.f32.mrb[3].mxu1  ;;  %v416_v27 = vadd.f32 %v414_v21, %v4279_v20 }
 0x373   :  { %v418_v28 = vsel %vm366_vm2, %v416_v27, -inf  ;;  %v417_v29 = vadd.f32 %v415_v25, %v4281_v24 }
 0x374   :  { %419 = vmax.xlane.f32.xlu1 %v418_v28 }
 0x375   :  { %v421_v30 = vsel %vm366_vm2, %v417_v29, -inf }
 0x376   :  { %422 = vmax.xlane.f32.xlu0 %v421_v30  ;;  %v533_v31 = vpop.f32.mrb[4].mxu1 }
 0x377   :  { %v540_v32 = vmul.f32 0.25, %v533_v31  ;;  %v3099_v33 = vpop.f32.mrb[5].mxu1 }
 0x378   :  { %v536_v34 = vpop.f32.mrb[6].mxu1 }
 0x379   :  { %v541_v35 = vmul.f32 0.25, %v536_v34  ;;  %v3100_v36 = vpop.f32.mrb[7].mxu1  ;;  %v542_v37 = vadd.f32 %v540_v32, %v4279_v20  ;;  %v2878_v34 = vld [vmem:[#allocation11] ss:$0 sm:$0xff] }
 0x37b   :  { %v544_v38 = vsel %vm366_vm2, %v542_v37, -inf  ;;  %v543_v39 = vadd.f32 %v541_v35, %v4281_v24 }
 0x37c   :  { %545 = vmax.xlane.f32.xlu0 %v544_v38 }
 0x37d   :  { %v547_v40 = vsel %vm366_vm2, %v543_v39, -inf }
 0x37e   :  { %548 = vmax.xlane.f32.xlu1 %v547_v40 }
 0x401   :  { %v420_v41 = vpop.xlane.xlu1 %419 }
 0x402   :  { %v424_v42 = vsub.f32 %v416_v27, %v420_v41 }
 0x403   :  { %v423_v43 = vpop.xlane.xlu0 %422 }
 0x404   :  { %v426_v44 = vmul.f32 1.442695, %v424_v42  ;;  %v425_v45 = vsub.f32 %v417_v29, %v423_v43 }
 0x406   :  { %3379 = vpow2.f32 %v426_v44  ;;  %v428_v46 = vmul.f32 1.442695, %v425_v45 }
 0x408   :  { %3381 = vpow2.f32 %v428_v46 }
 0x409   :  { %v546_v47 = vpop.xlane.xlu0 %545 }
 0x40a   :  { %v550_v48 = vsub.f32 %v542_v37, %v546_v47  ;;  %v3841_v47 = vmov 0  }
 0x40b   :  { %v549_v49 = vpop.xlane.xlu1 %548  ;;  %3343 = vset.pattern.permute.xlu0 %v3841_v47  ;;  %3344 = vset.pattern.permute.xlu1 %v3841_v47 }
 0x40c   :  { %v552_v50 = vmul.f32 1.442695, %v550_v48  ;;  %v551_v51 = vsub.f32 %v543_v39, %v549_v49 }
 0x40e   :  { %3383 = vpow2.f32 %v552_v50  ;;  %v554_v52 = vmul.f32 1.442695, %v551_v51 }
 0x410   :  { %v3380_v53 = vpop.eup %3379  ;;  %3385 = vpow2.f32 %v554_v52 }
 0x411   :  { %v430_v54 = vsel %vm366_vm2, %v3380_v53, 0.0 }
 0x412   :  { %v3382_v55 = vpop.eup %3381  ;;  %431 = vadd.xlane.f32.xlu0 %v430_v54 }
 0x413   :  { %v433_v56 = vsel %vm366_vm2, %v3382_v55, 0.0 }
 0x414   :  { %434 = vadd.xlane.f32.xlu1 %v433_v56  ;;  %v285_v56 = vld [vmem:[%s4775_s7 + $0x8] sm:$0xff] }
 0x418   :  { %v3384_v57 = vpop.eup %3383 }
 0x419   :  { %v556_v58 = vsel %vm366_vm2, %v3384_v57, 0.0 }
 0x41a   :  { %v3386_v59 = vpop.eup %3385  ;;  %557 = vadd.xlane.f32.xlu0 %v556_v58  ;;  %v3349_v58 = vld [vmem:[%s4720_s13] sm:$0xff]  }
 0x41b   :  { %v559_v60 = vsel %vm366_vm2, %v3386_v59, 0.0 }
 0x41c   :  { %560 = vadd.xlane.f32.xlu1 %v559_v60  ;;  %v277_v60 = vld [vmem:[#allocation5] sm:$0xff] }
 0x42d   :  { %567 = vrot.lane.b32.xlu1 %v4260_v13, %s3840_s15 }
 0x430   :  { %441 = vrot.lane.b32.xlu0 %v4260_v13, %s3831_s12 }
 0x49f   :  { %v432_v61 = vpop.xlane.xlu0 %431 }
 0x4a0   :  { %3387 = vrcp.f32 %v432_v61  ;;  %v278_v61 = vld [vmem:[#allocation5 + $0x8] sm:$0xff] }
 0x4a1   :  { %v435_v62 = vpop.xlane.xlu1 %434 }
 0x4a2   :  { %3389 = vrcp.f32 %v435_v62  ;;  %v4340_v62 = vpack.c.bf16 %v278_v61, %v277_v60 }
 0x4a7   :  { %v558_v63 = vpop.xlane.xlu0 %557 }
 0x4a8   :  { %3391 = vrcp.f32 %v558_v63  ;;  %v3351_v63 = vld [vmem:[%s4718_s11] sm:$0xff]  }
 0x4a9   :  { %v561_v1 = vpop.xlane.xlu1 %560 }
 0x4aa   :  { %v3388_v2 = vpop.eup %3387  ;;  %3393 = vrcp.f32 %v561_v1  ;;  %v3352_v1 = vld [vmem:[%s4718_s11 + $0x8] sm:$0xff]  }
 0x4ab   :  { %v442_v5 = vpop.permute.xlu0 %441  ;;  %v438_v7 = vmul.f32 %v3388_v2, %v3380_v53 }
 0x4ac   :  { %v3390_v6 = vpop.eup %3389  ;;  %3090 = vmatpush3.bf16.msra.mxu0 %v442_v5 }
 0x4ad   :  { %v439_v8 = vmul.f32 %v3390_v6, %v3382_v55  ;;  %3101 = vmatprep.subr.bf16.mxu0 %v3835_v0  ;;  %v568_v10 = vpop.permute.xlu1 %567 }
 0x4af   :  { %v440_v9 = vpack.c.bf16 %v439_v8, %v438_v7 }
 0x4b1   :  { %3092 = vmatmul.mubr.msk.bf16.vlgmr.msra.gmra.mrb[4].mxu0 %vm366_vm2, %v440_v9 }
 0x4b2   :  { %v3392_v11 = vpop.eup %3391  ;;  %3102 = vmatpush3.bf16.msra.mxu0 %v568_v10  ;;  %3103 = vmatprep.mubr.msk.bf16.mxu0 %vm3836_vm0, %v3835_v0 }
 0x4b3   :  { %3113 = vmatprep.subr.bf16.mxu0 %v3835_v0  ;;  %v564_v13 = vmul.f32 %v3392_v11, %v3384_v57  ;;  %v284_v57 = vld [vmem:[%s4775_s7] sm:$0xff] }
 0x4b4   :  { %v3394_v12 = vpop.eup %3393  ;;  %v2879_v11 = vld [vmem:[#allocation13] ss:$0 sm:$0xff] }
 0x4b5   :  { %v565_v14 = vmul.f32 %v3394_v12, %v3386_v59  ;;  %v3350_v59 = vld [vmem:[%s4720_s13 + $0x8] sm:$0xff]  }
 0x4b7   :  { %v566_v15 = vpack.c.bf16 %v565_v14, %v564_v13  ;;  %v2880_v14 = vld [vmem:[#allocation14] ss:$0 sm:$0xff] }
 0x4b9   :  { %3104 = vmatmul.mubr.msk.bf16.vlgmr.msra.gmra.mrb[8].mxu0 %vm366_vm2, %v566_v15 }
 0x4ba   :  { %3115 = vmatprep.mubr.msk.bf16.mxu0 %vm3836_vm0, %v3835_v0  ;;  %3114 = vmatpush3.bf16.msra.mxu0 %v3347_v16 }
 0x4bb   :  { %3127 = vmatprep.subr.bf16.mxu0 %v3835_v0 }
 0x584   :  { %v481_v18 = vpop.f32.mrb[4].mxu0 }
 0x585   :  { %v3093_v19 = vpop.f32.mrb[5].mxu0 }
 0x586   :  { %v484_v21 = vpop.f32.mrb[6].mxu0 }
 0x587   :  { %v488_v22 = vpack.c.bf16 %v484_v21, %v481_v18  ;;  %v3094_v23 = vpop.f32.mrb[7].mxu0 }
 0x589   :  { %3116 = vmatmul.mubr.msk.bf16.vlgmr.msra.gmra.mrb[12].mxu0 %vm366_vm2, %v488_v22 }
 0x58a   :  { %3131 = vmatprep.mubr.msk.bf16.mxu0 %vm3836_vm0, %v3835_v0  ;;  %3128 = vmatpush3.bf16.msra.mxu0 %v3349_v58 }
 0x58b   :  { %3129 = vmatprep.subr.bf16.mxu0 %v3835_v0 }
 0x58c   :  { %v607_v25 = vpop.f32.mrb[8].mxu0 }
 0x58d   :  { %v3105_v26 = vpop.f32.mrb[9].mxu0 }
 0x58e   :  { %v610_v27 = vpop.f32.mrb[10].mxu0  ;;  %3130 = vmatpush3.bf16.msra.mxu0 %v3350_v59 }
 0x58f   :  { %v614_v28 = vpack.c.bf16 %v610_v27, %v607_v25  ;;  %v3106_v29 = vpop.f32.mrb[11].mxu0  ;;  %3141 = vmatprep.subr.bf16.mxu0 %v3835_v0  ;;  %v2885_v27 = vld [vmem:[#allocation17] ss:$0 sm:$0xff] }
 0x591   :  { %3110 = vmatmul.mubr.msk.bf16.vlgmr.msra.gmra.mrb[8].mxu1 %vm366_vm2, %v614_v28  ;;  %3132 = vmatmul.mubr.msk.bf16.vlgmr.msra.gmra.mrb[16].mxu0 %vm310_vm1, %v4340_v62 }
 0x592   :  { %3123 = vmatprep.mubr.msk.bf16.mxu1 %vm3836_vm0, %v3835_v0  ;;  %3143 = vmatprep.mubr.msk.bf16.mxu0 %vm3836_vm0, %v3835_v0 }
 0x593   :  { %3120 = vmatpush3.bf16.msra.mxu1 %v3351_v63 }
 0x594   :  { %3121 = vmatprep.subr.bf16.mxu1 %v3835_v0 }
 0x597   :  { %3122 = vmatpush3.bf16.msra.mxu1 %v3352_v1 }
 0x598   :  { %3135 = vmatprep.subr.bf16.mxu1 %v3835_v0 }
 0x65c   :  { %v708_v30 = vpop.f32.mrb[12].mxu0 }
 0x65d   :  { %v3117_v31 = vpop.f32.mrb[13].mxu0 }
 0x65e   :  { %v711_v32 = vpop.f32.mrb[14].mxu0 }
 0x65f   :  { %v3118_v33 = vpop.f32.mrb[15].mxu0 }
 0x664   :  { %v658_v35 = vpop.f32.mrb[8].mxu1  ;;  %v908_v28 = vpop.f32.mrb[16].mxu0 }
 0x665   :  { %v709_v36 = vadd.f32 %v708_v30, %v658_v35  ;;  %v3111_v37 = vpop.f32.mrb[9].mxu1  ;;  %v909_v29 = vadd.f32 %v2885_v27, %v908_v28  ;;  %v3133_v30 = vpop.f32.mrb[17].mxu0 }
 0x666   :  { %v661_v38 = vpop.f32.mrb[10].mxu1  ;;  %v911_v31 = vpop.f32.mrb[18].mxu0 }
 0x667   :  { %v721_v39 = vadd.f32 %v2878_v34, %v709_v36  ;;  %v712_v40 = vadd.f32 %v711_v32, %v661_v38  ;;  %v3112_v41 = vpop.f32.mrb[11].mxu1  ;;  %v912_v32 = vadd.f32 %v2885_v27, %v911_v31  ;;  %v3134_v33 = vpop.f32.mrb[19].mxu0  ;;  %v2881_v36 = vld [vmem:[#allocation16] ss:$0 sm:$0xff] }
 0x669   :  { %v722_v42 = vadd.f32 %v2878_v34, %v712_v40  ;;  %v723_v43 = vadd.f32 %v721_v39, %v4249_v3  ;;  %v4370_v34 = vpack.c.bf16 %v912_v32, %v909_v29 }
 0x66b   :  { %v725_v44 = vsel %vm310_vm1, %v723_v43, 0.0  ;;  %v724_v45 = vadd.f32 %v722_v42, %v4251_v4  ;;  %v928_v35 = vsel %vm366_vm2, %v4370_v34, 0 }
 0x66c   :  { %726 = vadd.xlane.f32.xlu1 %v725_v44 }
 0x66d   :  { %v728_v46 = vsel %vm310_vm1, %v724_v45, 0.0 }
 0x66e   :  { %729 = vadd.xlane.f32.xlu0 %v728_v46 }
 0x6f9   :  { %v727_v48 = vpop.xlane.xlu1 %726 }
 0x6fa   :  { %v732_v49 = vmul.f32 0.03125, %v727_v48  ;;  %v4386_v48 = vld [vmem:[#allocation8] sm:$0xff] }
 0x6fb   :  { %v730_v50 = vpop.xlane.xlu0 %729 }
 0x6fc   :  { %v734_v51 = vsub.f32 %v723_v43, %v732_v49  ;;  %v733_v52 = vmul.f32 0.03125, %v730_v50 }
 0x6fe   :  { %v735_v53 = vsub.f32 %v724_v45, %v733_v52  ;;  %v736_v54 = vmul.f32 %v734_v51, %v734_v51  ;;  %v4388_v52 = vld [vmem:[#allocation8 + $0x8] sm:$0xff] }
 0x700   :  { %v738_v3 = vsel %vm310_vm1, %v736_v54, 0.0  ;;  %v737_v55 = vmul.f32 %v735_v53, %v735_v53 }
 0x701   :  { %739 = vadd.xlane.f32.xlu0 %v738_v3 }
 0x702   :  { %v741_v4 = vsel %vm310_vm1, %v737_v55, 0.0 }
 0x703   :  { %742 = vadd.xlane.f32.xlu1 %v741_v4 }
 0x714   :  { %775 = vperm.xlu1 %3344, %v285_v56  }
 0x717   :  { %770 = vperm.xlu0 %3343, %v284_v57  }
 0x718   :  { %1050 = vrot.lane.b32.xlu1 %v4370_v34, %s3837_s29 }
 0x78e   :  { %v740_v2 = vpop.xlane.xlu0 %739 }
 0x78f   :  { %v744_v5 = vmul.f32 0.03125, %v740_v2 }
 0x790   :  { %v743_v6 = vpop.xlane.xlu1 %742 }
 0x791   :  { %v746_v7 = vadd.f32 1e-05, %v744_v5  ;;  %v745_v8 = vmul.f32 0.03125, %v743_v6 }
 0x793   :  { %3395 = vrsqrt.f32 %v746_v7  ;;  %v747_v9 = vadd.f32 1e-05, %v745_v8 }
 0x794   :  { %v4357_v21 = vpop.permute.xlu1 %775 }
 0x795   :  { %3397 = vrsqrt.f32 %v747_v9 }
 0x796   :  { %v4355_v19 = vpop.permute.xlu0 %770 }
 0x798   :  { %v1051_v40 = vpop.permute.xlu1 %1050 }
 0x799   :  { %v1056_v45 = vsel %vm366_vm2, %v1051_v40, 0 }
 0x79d   :  { %v3396_v10 = vpop.eup %3395 }
 0x79e   :  { %v750_v12 = vmul.f32 %v3396_v10, %v734_v51 }
 0x79f   :  { %v3398_v13 = vpop.eup %3397 }
 0x7a0   :  { %v758_v15 = vmul.f32 %v2879_v11, %v750_v12  ;;  %v751_v16 = vmul.f32 %v3398_v13, %v735_v53 }
 0x7a2   :  { %v759_v17 = vmul.f32 %v2879_v11, %v751_v16  ;;  %v766_v18 = vadd.f32 %v2880_v14, %v758_v15 }
 0x7a4   :  { %v767_v22 = vadd.f32 %v2880_v14, %v759_v17  ;;  %v4360_v23 = vmul.f32 %v4355_v19, %v766_v18 }
 0x7a6   :  { %v4363_v25 = vmul.f32 %v4357_v21, %v767_v22 }
 0x7a8   :  { %v780_v26 = vpack.c.bf16 %v4363_v25, %v4360_v23 }
 0x7aa   :  { %3124 = vmatmul.mubr.msk.bf16.vlgmr.msra.gmra.mrb[12].mxu1 %vm310_vm1, %v780_v26 }
 0x7ab   :  { %3137 = vmatprep.mubr.msk.bf16.mxu1 %vm3836_vm0, %v3835_v0  ;;  %3136 = vmatpush3.bf16.xpose.msra.mxu1 %v928_v35 }
 0x7ac   :  { %3147 = vmatprep.subr.bf16.mxu1 %v3835_v0 }
 0x87d   :  { %v841_v37 = vpop.f32.mrb[12].mxu1 }
 0x87e   :  { %v3125_v38 = vpop.f32.mrb[13].mxu1  ;;  %v842_v41 = vadd.f32 %v2881_v36, %v841_v37 }
 0x87f   :  { %v844_v39 = vpop.f32.mrb[14].mxu1 }
 0x880   :  { %v845_v42 = vadd.f32 %v2881_v36, %v844_v39  ;;  %v3126_v43 = vpop.f32.mrb[15].mxu1 }
 0x882   :  { %v922_v44 = vpack.c.bf16 %v845_v42, %v842_v41 }
 0x884   :  { %1048 = vrot.lane.b32.xlu1 %v922_v44, %s3837_s29  ;;  %3138 = vmatmul.mubr.msk.bf16.vlgmr.msra.gmra.mrb[16].mxu1 %vm366_vm2, %v922_v44 }
 0x885   :  { %3148 = vmatpush3.bf16.xpose.msra.mxu1 %v1056_v45  ;;  %3149 = vmatprep.mubr.msk.bf16.mxu1 %vm3836_vm0, %v3835_v0 }
 0x886   :  { %3159 = vmatprep.subr.bf16.mxu1 %v3835_v0 }
 0x8f6   :  { %v1049_v46 = vpop.permute.xlu1 %1048 }
 0x8f7   :  { %3150 = vmatmul.mubr.msk.bf16.vlgmr.msra.gmra.mrb[20].mxu1 %vm366_vm2, %v1049_v46 }
 0x8f8   :  { %3161 = vmatprep.mubr.msk.bf16.mxu1 %vm3836_vm0, %v3835_v0 }
 0x957   :  { %v964_v47 = vpop.f32.mrb[16].mxu1 }
 0x958   :  { %v971_v49 = vmul.f32 0.25, %v964_v47  ;;  %v3139_v50 = vpop.f32.mrb[17].mxu1 }
 0x959   :  { %v967_v51 = vpop.f32.mrb[18].mxu1  ;;  %v3353_v50 = vld [vmem:[#allocation19] sm:$0xff]  }
 0x95a   :  { %v972_v53 = vmul.f32 0.25, %v967_v51  ;;  %v3140_v54 = vpop.f32.mrb[19].mxu1  ;;  %v973_v3 = vadd.f32 %v971_v49, %v4386_v48  ;;  %v3354_v51 = vld [vmem:[#allocation19 + $0x8] sm:$0xff]  }
 0x95b   :  { %3160 = vmatpush3.bf16.msra.mxu1 %v3354_v51 }
 0x95c   :  { %v975_v55 = vsel %vm366_vm2, %v973_v3, -inf  ;;  %v974_v4 = vadd.f32 %v972_v53, %v4388_v52  ;;  %3171 = vmatprep.subr.bf16.mxu1 %v3835_v0 }
 0x95d   :  { %976 = vmax.xlane.f32.xlu1 %v975_v55 }
 0x95e   :  { %v978_v56 = vsel %vm366_vm2, %v974_v4, -inf }
 0x95f   :  { %979 = vmax.xlane.f32.xlu0 %v978_v56 }
 0x9ca   :  { %v1092_v57 = vpop.f32.mrb[20].mxu1 }
 0x9cb   :  { %v1099_v58 = vmul.f32 0.25, %v1092_v57  ;;  %v3151_v59 = vpop.f32.mrb[21].mxu1 }
 0x9cc   :  { %v1095_v60 = vpop.f32.mrb[22].mxu1 }
 0x9cd   :  { %v1100_v61 = vmul.f32 0.25, %v1095_v60  ;;  %v3152_v63 = vpop.f32.mrb[23].mxu1  ;;  %v1101_v1 = vadd.f32 %v1099_v58, %v4386_v48 }
 0x9cf   :  { %v1103_v2 = vsel %vm366_vm2, %v1101_v1, -inf  ;;  %v1102_v5 = vadd.f32 %v1100_v61, %v4388_v52 }
 0x9d0   :  { %1104 = vmax.xlane.f32.xlu1 %v1103_v2 }
 0x9d1   :  { %v1106_v6 = vsel %vm366_vm2, %v1102_v5, -inf }
 0x9d4   :  { %1107 = vmax.xlane.f32.xlu1 %v1106_v6 }
 0x9ea   :  { %v977_v7 = vpop.xlane.xlu1 %976 }
 0x9eb   :  { %v981_v8 = vsub.f32 %v973_v3, %v977_v7 }
 0x9ec   :  { %v980_v9 = vpop.xlane.xlu0 %979 }
 0x9ed   :  { %v983_v10 = vmul.f32 1.442695, %v981_v8  ;;  %v982_v11 = vsub.f32 %v974_v4, %v980_v9 }
 0x9ef   :  { %3399 = vpow2.f32 %v983_v10  ;;  %v985_v12 = vmul.f32 1.442695, %v982_v11 }
 0x9f1   :  { %3401 = vpow2.f32 %v985_v12 }
 0x9f9   :  { %v3400_v13 = vpop.eup %3399 }
 0x9fa   :  { %v987_v14 = vsel %vm366_vm2, %v3400_v13, 0.0 }
 0x9fb   :  { %v3402_v15 = vpop.eup %3401  ;;  %988 = vadd.xlane.f32.xlu1 %v987_v14 }
 0x9fc   :  { %v990_v16 = vsel %vm366_vm2, %v3402_v15, 0.0 }
 0x9ff   :  { %991 = vadd.xlane.f32.xlu1 %v990_v16 }
 0xa5d   :  { %v1105_v17 = vpop.xlane.xlu1 %1104 }
 0xa5e   :  { %v1109_v18 = vsub.f32 %v1101_v1, %v1105_v17 }
 0xa60   :  { %v1111_v22 = vmul.f32 1.442695, %v1109_v18 }
 0xa61   :  { %v1108_v26 = vpop.xlane.xlu1 %1107 }
 0xa62   :  { %3403 = vpow2.f32 %v1111_v22  ;;  %v1110_v27 = vsub.f32 %v1102_v5, %v1108_v26  ;;  %v2897_v5 = vld [vmem:[#allocation20] ss:$0 sm:$0xff] }
 0xa64   :  { %v1113_v28 = vmul.f32 1.442695, %v1110_v27 }
 0xa66   :  { %3405 = vpow2.f32 %v1113_v28 }
 0xa6c   :  { %v3404_v29 = vpop.eup %3403 }
 0xa6d   :  { %v1115_v30 = vsel %vm366_vm2, %v3404_v29, 0.0 }
 0xa6e   :  { %1116 = vadd.xlane.f32.xlu0 %v1115_v30 }
 0xa70   :  { %v3406_v31 = vpop.eup %3405 }
 0xa71   :  { %v1118_v32 = vsel %vm366_vm2, %v3406_v31, 0.0 }
 0xa72   :  { %1119 = vadd.xlane.f32.xlu1 %v1118_v32 }
 0xa83   :  { %1126 = vrot.lane.b32.xlu1 %v4370_v34, %s3839_s27 }
 0xa84   :  { %999 = vrot.lane.b32.xlu0 %v4370_v34, %s3838_s2 }
 0xa88   :  { %v989_v33 = vpop.xlane.xlu1 %988 }
 0xa8c   :  { %v992_v35 = vpop.xlane.xlu1 %991 }
 0xa8d   :  { %3407 = vrcp.f32 %v992_v35  ;;  %v3357_v35 = vld [vmem:[%s4728_s21] sm:$0xff]  }
 0xa8e   :  { %3409 = vrcp.f32 %v989_v33  ;;  %v3355_v33 = vld [vmem:[#allocation23] sm:$0xff]  }
 0xa97   :  { %v3408_v36 = vpop.eup %3407 }
 0xa98   :  { %v3410_v38 = vpop.eup %3409  ;;  %v996_v39 = vmul.f32 %v3408_v36, %v3402_v15  ;;  %v3358_v36 = vld [vmem:[%s4728_s21 + $0x8] sm:$0xff]  }
 0xa99   :  { %v995_v40 = vmul.f32 %v3410_v38, %v3400_v13 }
 0xa9b   :  { %v997_v43 = vpack.c.bf16 %v996_v39, %v995_v40 }
 0xafb   :  { %v1117_v37 = vpop.xlane.xlu0 %1116 }
 0xafc   :  { %3411 = vrcp.f32 %v1117_v37 }
 0xaff   :  { %v1000_v41 = vpop.permute.xlu0 %999  ;;  %v1120_v42 = vpop.xlane.xlu1 %1119 }
 0xb00   :  { %3413 = vrcp.f32 %v1120_v42  ;;  %3142 = vmatpush3.bf16.msra.mxu0 %v1000_v41 }
 0xb01   :  { %3153 = vmatprep.subr.bf16.mxu0 %v3835_v0 }
 0xb03   :  { %3144 = vmatmul.mubr.msk.bf16.vlgmr.msra.gmra.mrb[20].mxu0 %vm366_vm2, %v997_v43  ;;  %v1127_v34 = vpop.permute.xlu1 %1126 }
 0xb04   :  { %3154 = vmatpush3.bf16.msra.mxu0 %v1127_v34  ;;  %3155 = vmatprep.mubr.msk.bf16.mxu0 %vm3836_vm0, %v3835_v0  ;;  %v2898_v34 = vld [vmem:[#allocation22] ss:$0 sm:$0xff] }
 0xb05   :  { %3165 = vmatprep.subr.bf16.mxu0 %v3835_v0 }
 0xb06   :  { %v3412_v44 = vpop.eup %3411 }
 0xb07   :  { %v1123_v46 = vmul.f32 %v3412_v44, %v3404_v29 }
 0xb0a   :  { %v3414_v45 = vpop.eup %3413 }
 0xb0b   :  { %v1124_v47 = vmul.f32 %v3414_v45, %v3406_v31 }
 0xb0d   :  { %v1125_v49 = vpack.c.bf16 %v1124_v47, %v1123_v46  ;;  %v2899_v46 = vld [vmem:[%s4725_s18] ss:$0 sm:$0xff] }
 0xb0f   :  { %3156 = vmatmul.mubr.msk.bf16.vlgmr.msra.gmra.mrb[24].mxu0 %vm366_vm2, %v1125_v49 }
 0xb10   :  { %3167 = vmatprep.mubr.msk.bf16.mxu0 %vm3836_vm0, %v3835_v0  ;;  %3166 = vmatpush3.bf16.msra.mxu0 %v3353_v50 }
 0xb11   :  { %3179 = vmatprep.subr.bf16.mxu0 %v3835_v0 }
 0xbd6   :  { %v1039_v53 = vpop.f32.mrb[20].mxu0 }
 0xbd7   :  { %v3145_v54 = vpop.f32.mrb[21].mxu0 }
 0xbd8   :  { %v1042_v3 = vpop.f32.mrb[22].mxu0 }
 0xbd9   :  { %v1046_v55 = vpack.c.bf16 %v1042_v3, %v1039_v53  ;;  %v3146_v4 = vpop.f32.mrb[23].mxu0 }
 0xbda   :  { %v3359_v4 = vld [vmem:[%s4728_s21 + $0x10] sm:$0xff]  }
 0xbdb   :  { %3168 = vmatmul.mubr.msk.bf16.vlgmr.msra.gmra.mrb[28].mxu0 %vm366_vm2, %v1046_v55 }
 0xbdc   :  { %3187 = vmatprep.mubr.msk.bf16.mxu0 %vm3836_vm0, %v3835_v0  ;;  %3180 = vmatpush3.bf16.msra.mxu0 %v3357_v35 }
 0xbdd   :  { %3181 = vmatprep.subr.bf16.mxu0 %v3835_v0 }
 0xbe0   :  { %3182 = vmatpush3.bf16.msra.mxu0 %v3358_v36 }
 0xbe1   :  { %3183 = vmatprep.subr.bf16.mxu0 %v3835_v0 }
 0xbe2   :  { %v1166_v56 = vpop.f32.mrb[24].mxu0 }
 0xbe3   :  { %v3157_v57 = vpop.f32.mrb[25].mxu0 }
 0xbe4   :  { %v1169_v58 = vpop.f32.mrb[26].mxu0  ;;  %3184 = vmatpush3.bf16.msra.mxu0 %v3359_v4  ;;  %v2900_v57 = vld [vmem:[%s4727_s20] ss:$0 sm:$0xff] }
 0xbe5   :  { %v1173_v59 = vpack.c.bf16 %v1169_v58, %v1166_v56  ;;  %v3158_v60 = vpop.f32.mrb[27].mxu0  ;;  %3185 = vmatprep.subr.bf16.mxu0 %v3835_v0  ;;  %v3360_v56 = vld [vmem:[%s4728_s21 + $0x18] sm:$0xff]  }
 0xbe7   :  { %3162 = vmatmul.mubr.msk.bf16.vlgmr.msra.gmra.mrb[24].mxu1 %vm366_vm2, %v1173_v59 }
 0xbe8   :  { %3175 = vmatprep.mubr.msk.bf16.mxu1 %vm3836_vm0, %v3835_v0  ;;  %3172 = vmatpush3.bf16.msra.mxu1 %v3355_v33  ;;  %v3361_v33 = vld [vmem:[%s4773_s8 + $0x10] sm:$0xff]  }
 0xbe9   :  { %3173 = vmatprep.subr.bf16.mxu1 %v3835_v0  ;;  %3186 = vmatpush3.bf16.msra.mxu0 %v3360_v56 }
 0xbea   :  { %3205 = vmatprep.subr.bf16.mxu0 %v3835_v0 }
 0xcae   :  { %v1267_v61 = vpop.f32.mrb[28].mxu0 }
 0xcaf   :  { %v3169_v63 = vpop.f32.mrb[29].mxu0 }
 0xcb0   :  { %v1270_v1 = vpop.f32.mrb[30].mxu0 }
 0xcb1   :  { %v3170_v2 = vpop.f32.mrb[31].mxu0 }
 0xcba   :  { %v1217_v6 = vpop.f32.mrb[24].mxu1 }
 0xcbb   :  { %v1268_v7 = vadd.f32 %v1267_v61, %v1217_v6  ;;  %v3163_v8 = vpop.f32.mrb[25].mxu1 }
 0xcbc   :  { %v1220_v9 = vpop.f32.mrb[26].mxu1 }
 0xcbd   :  { %v1280_v10 = vadd.f32 %v2897_v5, %v1268_v7  ;;  %v1271_v11 = vadd.f32 %v1270_v1, %v1220_v9  ;;  %v3164_v12 = vpop.f32.mrb[27].mxu1  ;;  %v2904_v7 = vld [vmem:[%s4729_s22] ss:$0 sm:$0xff] }
 0xcbf   :  { %v1281_v13 = vadd.f32 %v2897_v5, %v1271_v11  ;;  %v1282_v14 = vadd.f32 %v1280_v10, %v4360_v23 }
 0xcc1   :  { %v1284_v15 = vsel %vm310_vm1, %v1282_v14, 0.0  ;;  %v1283_v16 = vadd.f32 %v1281_v13, %v4363_v25  ;;  %v3356_v25 = vld [vmem:[#allocation23 + $0x8] sm:$0xff]  }
 0xcc2   :  { %1285 = vadd.xlane.f32.xlu1 %v1284_v15  ;;  %3174 = vmatpush3.bf16.msra.mxu1 %v3356_v25  ;;  %v3362_v25 = vld [vmem:[%s4773_s8 + $0x18] sm:$0xff]  }
 0xcc3   :  { %v1287_v17 = vsel %vm310_vm1, %v1283_v16, 0.0  ;;  %3191 = vmatprep.subr.bf16.mxu1 %v3835_v0 }
 0xcc4   :  { %1288 = vadd.xlane.f32.xlu0 %v1287_v17 }
 0xd4f   :  { %v1286_v18 = vpop.xlane.xlu1 %1285 }
 0xd50   :  { %v1290_v22 = vmul.f32 0.03125, %v1286_v18 }
 0xd51   :  { %v1289_v26 = vpop.xlane.xlu0 %1288 }
 0xd52   :  { %v1292_v27 = vsub.f32 %v1282_v14, %v1290_v22  ;;  %v1291_v28 = vmul.f32 0.03125, %v1289_v26 }
 0xd54   :  { %v1293_v29 = vsub.f32 %v1283_v16, %v1291_v28  ;;  %v1294_v30 = vmul.f32 %v1292_v27, %v1292_v27 }
 0xd56   :  { %v1296_v31 = vsel %vm310_vm1, %v1294_v30, 0.0  ;;  %v1295_v32 = vmul.f32 %v1293_v29, %v1293_v29 }
 0xd57   :  { %1297 = vadd.xlane.f32.xlu0 %v1296_v31 }
 0xd58   :  { %v1299_v23 = vsel %vm310_vm1, %v1295_v32, 0.0 }
 0xd59   :  { %1300 = vadd.xlane.f32.xlu1 %v1299_v23 }
 0xde4   :  { %v1298_v37 = vpop.xlane.xlu0 %1297 }
 0xde5   :  { %v1302_v38 = vmul.f32 0.03125, %v1298_v37 }
 0xde6   :  { %v1301_v39 = vpop.xlane.xlu1 %1300 }
 0xde7   :  { %v1304_v40 = vadd.f32 1e-05, %v1302_v38  ;;  %v1303_v41 = vmul.f32 0.03125, %v1301_v39 }
 0xde9   :  { %3415 = vrsqrt.f32 %v1304_v40  ;;  %v1305_v42 = vadd.f32 1e-05, %v1303_v41 }
 0xdeb   :  { %3417 = vrsqrt.f32 %v1305_v42  ;;  %v2910_v42 = vld [vmem:[%s4730_s23] ss:$0 sm:$0xff] }
 0xdf3   :  { %v3416_v43 = vpop.eup %3415 }
 0xdf4   :  { %v1308_v44 = vmul.f32 %v3416_v43, %v1292_v27 }
 0xdf5   :  { %v3418_v45 = vpop.eup %3417 }
 0xdf6   :  { %v1316_v47 = vmul.f32 %v2898_v34, %v1308_v44  ;;  %v1309_v49 = vmul.f32 %v3418_v45, %v1293_v29  ;;  %v2911_v44 = vld [vmem:[%s4776_s4] ss:$0 sm:$0xff] }
 0xdf8   :  { %v1317_v50 = vmul.f32 %v2898_v34, %v1309_v49  ;;  %v1324_v51 = vadd.f32 %v2899_v46, %v1316_v47 }
 0xdfa   :  { %v1325_v53 = vadd.f32 %v2899_v46, %v1317_v50  ;;  %v1326_v54 = vmul.f32 %v1324_v51, %v4355_v19 }
 0xdfc   :  { %v1327_v3 = vmul.f32 %v1325_v53, %v4357_v21 }
 0xdfe   :  { %v1328_v55 = vpack.c.bf16 %v1327_v3, %v1326_v54 }
 0xe00   :  { %3176 = vmatmul.mubr.msk.bf16.vlgmr.msra.gmra.mrb[28].mxu1 %vm310_vm1, %v1328_v55 }
 0xe01   :  { %3195 = vmatprep.mubr.msk.bf16.mxu1 %vm3836_vm0, %v3835_v0  ;;  %3192 = vmatpush3.bf16.msra.mxu1 %v3361_v33 }
 0xe02   :  { %3193 = vmatprep.subr.bf16.mxu1 %v3835_v0 }
 0xe05   :  { %3194 = vmatpush3.bf16.msra.mxu1 %v3362_v25 }
 0xe06   :  { %3199 = vmatprep.subr.bf16.mxu1 %v3835_v0 }
 0xed3   :  { %v1389_v58 = vpop.f32.mrb[28].mxu1 }
 0xed4   :  { %v1390_v59 = vadd.f32 %v2900_v57, %v1389_v58  ;;  %v3177_v60 = vpop.f32.mrb[29].mxu1 }
 0xed5   :  { %v1392_v61 = vpop.f32.mrb[30].mxu1 }
 0xed6   :  { %v1393_v63 = vadd.f32 %v2900_v57, %v1392_v61  ;;  %v3178_v1 = vpop.f32.mrb[31].mxu1  ;;  %v1396_v2 = vmax.f32 %v1390_v59, 0.0 }
 0xed8   :  { %v1397_v5 = vmax.f32 %v1393_v63, 0.0 }
 0xeda   :  { %v1398_v6 = vpack.c.bf16 %v1397_v5, %v1396_v2 }
 0xedc   :  { %3188 = vmatmul.mubr.msk.bf16.vlgmr.msra.gmra.mrb[32].mxu0 %vm1438_vm3, %v1398_v6 }
 0xedd   :  { %3207 = vmatprep.mubr.msk.bf16.mxu0 %vm3836_vm0, %v3835_v0 }
 0xfaf   :  { %v1476_v8 = vpop.f32.mrb[32].mxu0 }
 0xfb0   :  { %v1477_v9 = vadd.f32 %v2904_v7, %v1476_v8  ;;  %v3189_v10 = vpop.f32.mrb[33].mxu0 }
 0xfb1   :  { %v1479_v11 = vpop.f32.mrb[34].mxu0 }
 0xfb2   :  { %v1480_v12 = vadd.f32 %v2904_v7, %v1479_v11  ;;  %v3190_v13 = vpop.f32.mrb[35].mxu0  ;;  %v1483_v14 = vadd.f32 %v1477_v9, %v1326_v54 }
 0xfb4   :  { %v1487_v15 = vsel %vm310_vm1, %v1483_v14, 0.0  ;;  %v1484_v16 = vadd.f32 %v1480_v12, %v1327_v3  ;;  %v2916_v3 = vld [vmem:[#allocation10 + $0x1] ss:$0 sm:$0xff] }
 0xfb5   :  { %1488 = vadd.xlane.f32.xlu0 %v1487_v15 }
 0xfb6   :  { %v1490_v17 = vsel %vm310_vm1, %v1484_v16, 0.0 }
 0xfb7   :  { %1491 = vadd.xlane.f32.xlu1 %v1490_v17 }
0x1042   :  { %v1489_v18 = vpop.xlane.xlu0 %1488 }
0x1043   :  { %v1493_v22 = vmul.f32 0.03125, %v1489_v18 }
0x1044   :  { %v1492_v26 = vpop.xlane.xlu1 %1491 }
0x1045   :  { %v1495_v27 = vsub.f32 %v1483_v14, %v1493_v22  ;;  %v1494_v28 = vmul.f32 0.03125, %v1492_v26 }
0x1047   :  { %v1496_v29 = vsub.f32 %v1484_v16, %v1494_v28  ;;  %v1497_v30 = vmul.f32 %v1495_v27, %v1495_v27 }
0x1049   :  { %v1499_v31 = vsel %vm310_vm1, %v1497_v30, 0.0  ;;  %v1498_v32 = vmul.f32 %v1496_v29, %v1496_v29 }
0x104a   :  { %1500 = vadd.xlane.f32.xlu0 %v1499_v31 }
0x104b   :  { %v1502_v23 = vsel %vm310_vm1, %v1498_v32, 0.0 }
0x104c   :  { %1503 = vadd.xlane.f32.xlu1 %v1502_v23 }
0x10d7   :  { %v1501_v35 = vpop.xlane.xlu0 %1500 }
0x10d8   :  { %v1505_v36 = vmul.f32 0.03125, %v1501_v35 }
0x10d9   :  { %v1504_v37 = vpop.xlane.xlu1 %1503 }
0x10da   :  { %v1507_v38 = vadd.f32 1e-05, %v1505_v36  ;;  %v1506_v39 = vmul.f32 0.03125, %v1504_v37 }
0x10dc   :  { %3419 = vrsqrt.f32 %v1507_v38  ;;  %v1508_v40 = vadd.f32 1e-05, %v1506_v39 }
0x10de   :  { %3421 = vrsqrt.f32 %v1508_v40 }
0x10e6   :  { %v3420_v41 = vpop.eup %3419 }
0x10e7   :  { %v1511_v43 = vmul.f32 %v3420_v41, %v1495_v27 }
0x10e8   :  { %v3422_v34 = vpop.eup %3421 }
0x10e9   :  { %v1519_v45 = vmul.f32 %v2910_v42, %v1511_v43  ;;  %v1512_v46 = vmul.f32 %v3422_v34, %v1496_v29 }
0x10eb   :  { %v1520_v47 = vmul.f32 %v2910_v42, %v1512_v46  ;;  %v1527_v49 = vadd.f32 %v2911_v44, %v1519_v45 }
0x10ed   :  { %v1528_v50 = vadd.f32 %v2911_v44, %v1520_v47  ;;  %v4482_v51 = vmul.f32 %v1527_v49, %v4355_v19 }
0x10ef   :  { %v4485_v53 = vmul.f32 %v1528_v50, %v4357_v21 }
0x10f1   :  { %v1531_v54 = vpack.c.bf16 %v4485_v53, %v4482_v51 }
0x10f3   :  { %3196 = vmatmul.mubr.msk.bf16.vlgmr.msra.gmra.mrb[32].mxu1 %vm310_vm1, %v1531_v54 }
0x10f4   :  { %3201 = vmatprep.mubr.msk.bf16.mxu1 %vm3836_vm0, %v3835_v0 }
0x11c6   :  { %v1594_v55 = vpop.f32.mrb[32].mxu1 }
0x11c7   :  { %v3197_v4 = vpop.f32.mrb[33].mxu1  ;;  %v1595_v57 = vadd.f32 %v2916_v3, %v1594_v55 }
0x11c8   :  { %v1597_v56 = vpop.f32.mrb[34].mxu1 }
0x11c9   :  { %v1598_v58 = vadd.f32 %v2916_v3, %v1597_v56  ;;  %v3198_v59 = vpop.f32.mrb[35].mxu1 }
0x11cb   :  { %v4492_v60 = vpack.c.bf16 %v1598_v58, %v1595_v57 }
0x11cd   :  { %1740 = vrot.lane.b32.xlu1 %v4492_v60, %s3839_s27  ;;  %1614 = vrot.lane.b32.xlu0 %v4492_v60, %s3838_s2 }
0x11d1   :  { %1738 = vrot.lane.b32.xlu1 %v4492_v60, %s3837_s29 }
0x123f   :  { %v1615_v61 = vpop.permute.xlu0 %1614  ;;  %v1741_v1 = vpop.permute.xlu1 %1740 }
0x1240   :  { %v1620_v63 = vsel %vm366_vm2, %v1615_v61, 0  ;;  %v1746_v2 = vsel %vm366_vm2, %v1741_v1, 0 }
0x1241   :  { %3200 = vmatpush3.bf16.xpose.msra.mxu1 %v1620_v63 }
0x1242   :  { %3211 = vmatprep.subr.bf16.mxu1 %v3835_v0 }
0x1243   :  { %v1739_v5 = vpop.permute.xlu1 %1738 }
0x1248   :  { %3202 = vmatmul.mubr.msk.bf16.vlgmr.msra.gmra.mrb[36].mxu1 %vm366_vm2, %v4492_v60 }
0x1249   :  { %3212 = vmatpush3.bf16.xpose.msra.mxu1 %v1746_v2  ;;  %3213 = vmatprep.mubr.msk.bf16.mxu1 %vm3836_vm0, %v3835_v0 }
0x124a   :  { %3223 = vmatprep.subr.bf16.mxu1 %v3835_v0 }
0x1250   :  { %3214 = vmatmul.mubr.msk.bf16.vlgmr.msra.gmra.mrb[40].mxu1 %vm366_vm2, %v1739_v5 }
0x1251   :  { %3225 = vmatprep.mubr.msk.bf16.mxu1 %vm3836_vm0, %v3835_v0 }
0x131b   :  { %v1656_v6 = vpop.f32.mrb[36].mxu1 }
0x131c   :  { %v1663_v7 = vmul.f32 0.25, %v1656_v6  ;;  %v3203_v8 = vpop.f32.mrb[37].mxu1  ;;  %v3363_v6 = vld [vmem:[%s4774_s30 + $0x10] sm:$0xff]  }
0x131d   :  { %v1659_v9 = vpop.f32.mrb[38].mxu1 }
0x131e   :  { %v1664_v10 = vmul.f32 0.25, %v1659_v9  ;;  %v3204_v11 = vpop.f32.mrb[39].mxu1  ;;  %v1665_v12 = vadd.f32 %v1663_v7, %v4279_v20  ;;  %v3364_v7 = vld [vmem:[%s4774_s30 + $0x18] sm:$0xff]  }
0x131f   :  { %3224 = vmatpush3.bf16.msra.mxu1 %v3364_v7 }
0x1320   :  { %v1667_v13 = vsel %vm366_vm2, %v1665_v12, -inf  ;;  %v1666_v14 = vadd.f32 %v1664_v10, %v4281_v24  ;;  %3235 = vmatprep.subr.bf16.mxu1 %v3835_v0 }
0x1321   :  { %1668 = vmax.xlane.f32.xlu0 %v1667_v13 }
0x1322   :  { %v1670_v15 = vsel %vm366_vm2, %v1666_v14, -inf }
0x1323   :  { %1671 = vmax.xlane.f32.xlu1 %v1670_v15  ;;  %v1782_v16 = vpop.f32.mrb[40].mxu1 }
0x1324   :  { %v1789_v17 = vmul.f32 0.25, %v1782_v16  ;;  %v3215_v18 = vpop.f32.mrb[41].mxu1 }
0x1325   :  { %v1785_v22 = vpop.f32.mrb[42].mxu1 }
0x1326   :  { %v1790_v26 = vmul.f32 0.25, %v1785_v22  ;;  %v3216_v27 = vpop.f32.mrb[43].mxu1  ;;  %v1791_v28 = vadd.f32 %v1789_v17, %v4279_v20 }
0x1328   :  { %v1793_v29 = vsel %vm366_vm2, %v1791_v28, -inf  ;;  %v1792_v30 = vadd.f32 %v1790_v26, %v4281_v24 }
0x1329   :  { %1794 = vmax.xlane.f32.xlu0 %v1793_v29 }
0x132a   :  { %v1796_v31 = vsel %vm366_vm2, %v1792_v30, -inf }
0x132d   :  { %1797 = vmax.xlane.f32.xlu0 %v1796_v31 }
0x13ae   :  { %v1669_v32 = vpop.xlane.xlu0 %1668 }
0x13af   :  { %v1673_v23 = vsub.f32 %v1665_v12, %v1669_v32 }
0x13b0   :  { %v1672_v33 = vpop.xlane.xlu1 %1671 }
0x13b1   :  { %v1675_v25 = vmul.f32 1.442695, %v1673_v23  ;;  %v1674_v35 = vsub.f32 %v1666_v14, %v1672_v33 }
0x13b3   :  { %3423 = vpow2.f32 %v1675_v25  ;;  %v1677_v36 = vmul.f32 1.442695, %v1674_v35 }
0x13b5   :  { %3425 = vpow2.f32 %v1677_v36 }
0x13b6   :  { %v1795_v37 = vpop.xlane.xlu0 %1794 }
0x13b7   :  { %v1799_v38 = vsub.f32 %v1791_v28, %v1795_v37  ;;  %v2932_v28 = vld [vmem:[#allocation11 + $0x1] ss:$0 sm:$0xff] }
0x13b9   :  { %v1801_v39 = vmul.f32 1.442695, %v1799_v38 }
0x13ba   :  { %v1798_v20 = vpop.xlane.xlu0 %1797 }
0x13bb   :  { %3427 = vpow2.f32 %v1801_v39  ;;  %v1800_v40 = vsub.f32 %v1792_v30, %v1798_v20 }
0x13bd   :  { %v3424_v41 = vpop.eup %3423  ;;  %v1803_v24 = vmul.f32 1.442695, %v1800_v40 }
0x13be   :  { %v1679_v42 = vsel %vm366_vm2, %v3424_v41, 0.0 }
0x13bf   :  { %v3426_v43 = vpop.eup %3425  ;;  %3429 = vpow2.f32 %v1803_v24  ;;  %1680 = vadd.xlane.f32.xlu1 %v1679_v42 }
0x13c0   :  { %v1682_v34 = vsel %vm366_vm2, %v3426_v43, 0.0 }
0x13c1   :  { %1683 = vadd.xlane.f32.xlu0 %v1682_v34 }
0x13c5   :  { %v3428_v44 = vpop.eup %3427 }
0x13c6   :  { %v1805_v45 = vsel %vm366_vm2, %v3428_v44, 0.0 }
0x13c7   :  { %1806 = vadd.xlane.f32.xlu1 %v1805_v45 }
0x13c9   :  { %v3430_v46 = vpop.eup %3429 }
0x13ca   :  { %v1808_v47 = vsel %vm366_vm2, %v3430_v46, 0.0 }
0x13cb   :  { %1809 = vadd.xlane.f32.xlu0 %v1808_v47  ;;  %v3367_v47 = vld [vmem:[%s4718_s11 + $0x10] sm:$0xff]  }
0x13d8   :  { %1690 = vrot.lane.b32.xlu1 %v4492_v60, %s3831_s12 }
0x13e1   :  { %1816 = vrot.lane.b32.xlu0 %v4492_v60, %s3840_s15 }
0x144c   :  { %v1681_v49 = vpop.xlane.xlu1 %1680 }
0x144d   :  { %3431 = vrcp.f32 %v1681_v49  ;;  %v3368_v49 = vld [vmem:[%s4718_s11 + $0x18] sm:$0xff]  }
0x144e   :  { %v1684_v50 = vpop.xlane.xlu0 %1683 }
0x144f   :  { %3433 = vrcp.f32 %v1684_v50 }
0x1454   :  { %v1807_v54 = vpop.xlane.xlu1 %1806 }
0x1455   :  { %3435 = vrcp.f32 %v1807_v54 }
0x1457   :  { %v3432_v3 = vpop.eup %3431 }
0x1458   :  { %v1691_v55 = vpop.permute.xlu1 %1690  ;;  %v1810_v4 = vpop.xlane.xlu0 %1809  ;;  %v1687_v57 = vmul.f32 %v3432_v3, %v3424_v41 }
0x1459   :  { %v3434_v56 = vpop.eup %3433  ;;  %3437 = vrcp.f32 %v1810_v4  ;;  %3206 = vmatpush3.bf16.msra.mxu0 %v1691_v55 }
0x145a   :  { %v1688_v58 = vmul.f32 %v3434_v56, %v3426_v43  ;;  %3217 = vmatprep.subr.bf16.mxu0 %v3835_v0 }
0x145c   :  { %v1817_v59 = vpop.permute.xlu0 %1816  ;;  %v1689_v61 = vpack.c.bf16 %v1688_v58, %v1687_v57  ;;  %v2933_v57 = vld [vmem:[#allocation13 + $0x1] ss:$0 sm:$0xff] }
0x145e   :  { %3208 = vmatmul.mubr.msk.bf16.vlgmr.msra.gmra.mrb[36].mxu0 %vm366_vm2, %v1689_v61  ;;  %v2934_v61 = vld [vmem:[#allocation14 + $0x1] ss:$0 sm:$0xff] }
0x145f   :  { %3218 = vmatpush3.bf16.msra.mxu0 %v1817_v59  ;;  %3219 = vmatprep.mubr.msk.bf16.mxu0 %vm3836_vm0, %v3835_v0  ;;  %v3436_v60 = vpop.eup %3435 }
0x1460   :  { %3229 = vmatprep.subr.bf16.mxu0 %v3835_v0  ;;  %v1813_v1 = vmul.f32 %v3436_v60, %v3428_v44 }
0x1463   :  { %v3438_v63 = vpop.eup %3437 }
0x1464   :  { %v1814_v2 = vmul.f32 %v3438_v63, %v3430_v46  ;;  %v3366_v46 = vld [vmem:[%s4720_s13 + $0x18] sm:$0xff]  }
0x1466   :  { %v1815_v5 = vpack.c.bf16 %v1814_v2, %v1813_v1 }
0x1468   :  { %3220 = vmatmul.mubr.msk.bf16.vlgmr.msra.gmra.mrb[40].mxu0 %vm366_vm2, %v1815_v5 }
0x1469   :  { %3231 = vmatprep.mubr.msk.bf16.mxu0 %vm3836_vm0, %v3835_v0  ;;  %3230 = vmatpush3.bf16.msra.mxu0 %v3363_v6 }
0x146a   :  { %3243 = vmatprep.subr.bf16.mxu0 %v3835_v0 }
0x1531   :  { %v1730_v8 = vpop.f32.mrb[36].mxu0 }
0x1532   :  { %v3209_v9 = vpop.f32.mrb[37].mxu0 }
0x1533   :  { %v1733_v10 = vpop.f32.mrb[38].mxu0  ;;  %v2947_v9 = vld [vmem:[#allocation17 + $0x1] ss:$0 sm:$0xff] }
0x1534   :  { %v1737_v11 = vpack.c.bf16 %v1733_v10, %v1730_v8  ;;  %v3210_v12 = vpop.f32.mrb[39].mxu0 }
0x1536   :  { %3232 = vmatmul.mubr.msk.bf16.vlgmr.msra.gmra.mrb[44].mxu0 %vm366_vm2, %v1737_v11 }
0x1537   :  { %3247 = vmatprep.mubr.msk.bf16.mxu0 %vm3836_vm0, %v3835_v0 }
0x153b   :  { %v1856_v13 = vpop.f32.mrb[40].mxu0 }
0x153c   :  { %v3221_v14 = vpop.f32.mrb[41].mxu0 }
0x153d   :  { %v1859_v15 = vpop.f32.mrb[42].mxu0 }
0x153e   :  { %v1863_v16 = vpack.c.bf16 %v1859_v15, %v1856_v13  ;;  %v3222_v17 = vpop.f32.mrb[43].mxu0 }
0x1540   :  { %3226 = vmatmul.mubr.msk.bf16.vlgmr.msra.gmra.mrb[44].mxu1 %vm366_vm2, %v1863_v16 }
0x1541   :  { %3239 = vmatprep.mubr.msk.bf16.mxu1 %vm3836_vm0, %v3835_v0  ;;  %3236 = vmatpush3.bf16.msra.mxu1 %v3367_v47 }
0x1542   :  { %3237 = vmatprep.subr.bf16.mxu1 %v3835_v0 }
0x1545   :  { %3238 = vmatpush3.bf16.msra.mxu1 %v3368_v49 }
0x1546   :  { %3251 = vmatprep.subr.bf16.mxu1 %v3835_v0 }
0x1609   :  { %v1957_v18 = vpop.f32.mrb[44].mxu0 }
0x160a   :  { %v3233_v22 = vpop.f32.mrb[45].mxu0 }
0x160b   :  { %v1960_v26 = vpop.f32.mrb[46].mxu0 }
0x160c   :  { %v3234_v27 = vpop.f32.mrb[47].mxu0 }
0x1613   :  { %v1907_v29 = vpop.f32.mrb[44].mxu1 }
0x1614   :  { %v1958_v30 = vadd.f32 %v1957_v18, %v1907_v29  ;;  %v3227_v31 = vpop.f32.mrb[45].mxu1  ;;  %v2939_v18 = vld [vmem:[#allocation16 + $0x1] ss:$0 sm:$0xff] }
0x1615   :  { %v1910_v32 = vpop.f32.mrb[46].mxu1 }
0x1616   :  { %v1970_v23 = vadd.f32 %v2932_v28, %v1958_v30  ;;  %v1961_v33 = vadd.f32 %v1960_v26, %v1910_v32  ;;  %v3228_v25 = vpop.f32.mrb[47].mxu1 }
0x1618   :  { %v1971_v35 = vadd.f32 %v2932_v28, %v1961_v33  ;;  %v1972_v36 = vadd.f32 %v1970_v23, %v4482_v51 }
0x161a   :  { %v1974_v37 = vsel %vm310_vm1, %v1972_v36, 0.0  ;;  %v1973_v38 = vadd.f32 %v1971_v35, %v4485_v53  ;;  %v3365_v53 = vld [vmem:[%s4720_s13 + $0x10] sm:$0xff]  }
0x161b   :  { %1975 = vadd.xlane.f32.xlu1 %v1974_v37  ;;  %3244 = vmatpush3.bf16.msra.mxu0 %v3365_v53 }
0x161c   :  { %v1977_v39 = vsel %vm310_vm1, %v1973_v38, 0.0  ;;  %3245 = vmatprep.subr.bf16.mxu0 %v3835_v0 }
0x161d   :  { %1978 = vadd.xlane.f32.xlu0 %v1977_v39 }
0x161f   :  { %3246 = vmatpush3.bf16.msra.mxu0 %v3366_v46 }
0x1620   :  { %3257 = vmatprep.subr.bf16.mxu0 %v3835_v0 }
0x1622   :  { %3248 = vmatmul.mubr.msk.bf16.vlgmr.msra.gmra.mrb[48].mxu0 %vm310_vm1, %v4340_v62 }
0x1623   :  { %3259 = vmatprep.mubr.msk.bf16.mxu0 %vm3836_vm0, %v3835_v0 }
0x16a8   :  { %v1976_v20 = vpop.xlane.xlu1 %1975 }
0x16a9   :  { %v1980_v40 = vmul.f32 0.03125, %v1976_v20 }
0x16aa   :  { %v1979_v41 = vpop.xlane.xlu0 %1978 }
0x16ab   :  { %v1982_v24 = vsub.f32 %v1972_v36, %v1980_v40  ;;  %v1981_v42 = vmul.f32 0.03125, %v1979_v41 }
0x16ad   :  { %v1983_v43 = vsub.f32 %v1973_v38, %v1981_v42  ;;  %v1984_v34 = vmul.f32 %v1982_v24, %v1982_v24 }
0x16af   :  { %v1986_v44 = vsel %vm310_vm1, %v1984_v34, 0.0  ;;  %v1985_v45 = vmul.f32 %v1983_v43, %v1983_v43 }
0x16b0   :  { %1987 = vadd.xlane.f32.xlu1 %v1986_v44 }
0x16b1   :  { %v1989_v51 = vsel %vm310_vm1, %v1985_v45, 0.0 }
0x16b2   :  { %1990 = vadd.xlane.f32.xlu0 %v1989_v51 }
0x16f5   :  { %v2147_v10 = vpop.f32.mrb[48].mxu0 }
0x16f6   :  { %v2148_v11 = vadd.f32 %v2947_v9, %v2147_v10  ;;  %v3249_v12 = vpop.f32.mrb[49].mxu0 }
0x16f7   :  { %v2150_v13 = vpop.f32.mrb[50].mxu0 }
0x16f8   :  { %v2151_v14 = vadd.f32 %v2947_v9, %v2150_v13  ;;  %v3250_v15 = vpop.f32.mrb[51].mxu0 }
0x16fa   :  { %v4586_v16 = vpack.c.bf16 %v2151_v14, %v2148_v11 }
0x16fc   :  { %2293 = vrot.lane.b32.xlu1 %v4586_v16, %s3837_s29  ;;  %v2171_v17 = vsel %vm366_vm2, %v4586_v16, 0 }
0x173d   :  { %v1988_v50 = vpop.xlane.xlu1 %1987 }
0x173e   :  { %v1992_v54 = vmul.f32 0.03125, %v1988_v50 }
0x173f   :  { %v1991_v62 = vpop.xlane.xlu0 %1990 }
0x1740   :  { %v1994_v3 = vadd.f32 1e-05, %v1992_v54  ;;  %v1993_v55 = vmul.f32 0.03125, %v1991_v62 }
0x1742   :  { %3439 = vrsqrt.f32 %v1994_v3  ;;  %v1995_v4 = vadd.f32 1e-05, %v1993_v55 }
0x1744   :  { %3441 = vrsqrt.f32 %v1995_v4 }
0x174c   :  { %v3440_v56 = vpop.eup %3439 }
0x174d   :  { %v1998_v58 = vmul.f32 %v3440_v56, %v1982_v24 }
0x174e   :  { %v3442_v59 = vpop.eup %3441 }
0x174f   :  { %v2006_v60 = vmul.f32 %v2933_v57, %v1998_v58  ;;  %v1999_v63 = vmul.f32 %v3442_v59, %v1983_v43 }
0x1751   :  { %v2007_v1 = vmul.f32 %v2933_v57, %v1999_v63  ;;  %v2014_v2 = vadd.f32 %v2934_v61, %v2006_v60 }
0x1753   :  { %v2015_v5 = vadd.f32 %v2934_v61, %v2007_v1  ;;  %v4576_v6 = vmul.f32 %v2014_v2, %v4355_v19 }
0x1755   :  { %v4579_v7 = vmul.f32 %v2015_v5, %v4357_v21 }
0x1757   :  { %v2018_v8 = vpack.c.bf16 %v4579_v7, %v4576_v6 }
0x1759   :  { %3240 = vmatmul.mubr.msk.bf16.vlgmr.msra.gmra.mrb[48].mxu1 %vm310_vm1, %v2018_v8 }
0x175a   :  { %3253 = vmatprep.mubr.msk.bf16.mxu1 %vm3836_vm0, %v3835_v0  ;;  %3252 = vmatpush3.bf16.xpose.msra.mxu1 %v2171_v17 }
0x175b   :  { %3263 = vmatprep.subr.bf16.mxu1 %v3835_v0 }
0x176e   :  { %v2294_v28 = vpop.permute.xlu1 %2293 }
0x176f   :  { %v2299_v23 = vsel %vm366_vm2, %v2294_v28, 0 }
0x182c   :  { %v2081_v22 = vpop.f32.mrb[48].mxu1 }
0x182d   :  { %v3241_v26 = vpop.f32.mrb[49].mxu1  ;;  %v2082_v29 = vadd.f32 %v2939_v18, %v2081_v22 }
0x182e   :  { %v2084_v27 = vpop.f32.mrb[50].mxu1 }
0x182f   :  { %v2085_v30 = vadd.f32 %v2939_v18, %v2084_v27  ;;  %v3242_v31 = vpop.f32.mrb[51].mxu1 }
0x1831   :  { %v2165_v32 = vpack.c.bf16 %v2085_v30, %v2082_v29 }
0x1833   :  { %2291 = vrot.lane.b32.xlu0 %v2165_v32, %s3837_s29  ;;  %3254 = vmatmul.mubr.msk.bf16.vlgmr.msra.gmra.mrb[52].mxu1 %vm366_vm2, %v2165_v32  ;;  %v3369_v32 = vld [vmem:[#allocation19 + $0x10] sm:$0xff]  }
0x1834   :  { %3264 = vmatpush3.bf16.xpose.msra.mxu1 %v2299_v23  ;;  %3265 = vmatprep.mubr.msk.bf16.mxu1 %vm3836_vm0, %v3835_v0  ;;  %v3370_v23 = vld [vmem:[#allocation19 + $0x18] sm:$0xff]  }
0x1835   :  { %3275 = vmatprep.subr.bf16.mxu1 %v3835_v0 }
0x18a5   :  { %v2292_v33 = vpop.permute.xlu0 %2291 }
0x18a6   :  { %3266 = vmatmul.mubr.msk.bf16.vlgmr.msra.gmra.mrb[56].mxu1 %vm366_vm2, %v2292_v33 }
0x18a7   :  { %3277 = vmatprep.mubr.msk.bf16.mxu1 %vm3836_vm0, %v3835_v0  ;;  %3276 = vmatpush3.bf16.msra.mxu1 %v3370_v23  ;;  %v3375_v23 = vld [vmem:[%s4728_s21 + $0x30] sm:$0xff]  }
0x18a8   :  { %3287 = vmatprep.subr.bf16.mxu1 %v3835_v0 }
0x1906   :  { %v2207_v25 = vpop.f32.mrb[52].mxu1 }
0x1907   :  { %v2214_v35 = vmul.f32 0.25, %v2207_v25  ;;  %v3255_v36 = vpop.f32.mrb[53].mxu1 }
0x1908   :  { %v2210_v37 = vpop.f32.mrb[54].mxu1 }
0x1909   :  { %v2215_v38 = vmul.f32 0.25, %v2210_v37  ;;  %v3256_v39 = vpop.f32.mrb[55].mxu1  ;;  %v2216_v20 = vadd.f32 %v2214_v35, %v4386_v48 }
0x190b   :  { %v2218_v40 = vsel %vm366_vm2, %v2216_v20, -inf  ;;  %v2217_v41 = vadd.f32 %v2215_v38, %v4388_v52 }
0x190c   :  { %2219 = vmax.xlane.f32.xlu1 %v2218_v40 }
0x190d   :  { %v2221_v24 = vsel %vm366_vm2, %v2217_v41, -inf }
0x190e   :  { %2222 = vmax.xlane.f32.xlu0 %v2221_v24 }
0x1979   :  { %v2335_v42 = vpop.f32.mrb[56].mxu1 }
0x197a   :  { %v2342_v43 = vmul.f32 0.25, %v2335_v42  ;;  %v3267_v34 = vpop.f32.mrb[57].mxu1 }
0x197b   :  { %v2338_v44 = vpop.f32.mrb[58].mxu1 }
0x197c   :  { %v2343_v45 = vmul.f32 0.25, %v2338_v44  ;;  %v3268_v51 = vpop.f32.mrb[59].mxu1  ;;  %v2344_v53 = vadd.f32 %v2342_v43, %v4386_v48  ;;  %v2960_v44 = vld [vmem:[#allocation20 + $0x1] ss:$0 sm:$0xff] }
0x197e   :  { %v2346_v46 = vsel %vm366_vm2, %v2344_v53, -inf  ;;  %v2345_v47 = vadd.f32 %v2343_v45, %v4388_v52 }
0x197f   :  { %2347 = vmax.xlane.f32.xlu1 %v2346_v46 }
0x1980   :  { %v2349_v49 = vsel %vm366_vm2, %v2345_v47, -inf }
0x1981   :  { %2350 = vmax.xlane.f32.xlu0 %v2349_v49 }
0x1999   :  { %v2220_v50 = vpop.xlane.xlu1 %2219 }
0x199a   :  { %v2224_v54 = vsub.f32 %v2216_v20, %v2220_v50 }
0x199b   :  { %v2223_v62 = vpop.xlane.xlu0 %2222 }
0x199c   :  { %v2226_v3 = vmul.f32 1.442695, %v2224_v54  ;;  %v2225_v55 = vsub.f32 %v2217_v41, %v2223_v62 }
0x199e   :  { %3443 = vpow2.f32 %v2226_v3  ;;  %v2228_v4 = vmul.f32 1.442695, %v2225_v55 }
0x19a0   :  { %3445 = vpow2.f32 %v2228_v4 }
0x19a8   :  { %v3444_v56 = vpop.eup %3443 }
0x19a9   :  { %v2230_v57 = vsel %vm366_vm2, %v3444_v56, 0.0 }
0x19aa   :  { %v3446_v48 = vpop.eup %3445  ;;  %2231 = vadd.xlane.f32.xlu1 %v2230_v57 }
0x19ab   :  { %v2233_v58 = vsel %vm366_vm2, %v3446_v48, 0.0 }
0x19ac   :  { %2234 = vadd.xlane.f32.xlu0 %v2233_v58 }
0x1a0c   :  { %v2348_v52 = vpop.xlane.xlu1 %2347 }
0x1a0d   :  { %v2352_v59 = vsub.f32 %v2344_v53, %v2348_v52 }
0x1a0e   :  { %v2351_v61 = vpop.xlane.xlu0 %2350 }
0x1a0f   :  { %v2354_v60 = vmul.f32 1.442695, %v2352_v59  ;;  %v2353_v63 = vsub.f32 %v2345_v47, %v2351_v61 }
0x1a11   :  { %3447 = vpow2.f32 %v2354_v60  ;;  %v2356_v1 = vmul.f32 1.442695, %v2353_v63 }
0x1a13   :  { %3449 = vpow2.f32 %v2356_v1  ;;  %v3371_v1 = vld [vmem:[#allocation23 + $0x10] sm:$0xff]  }
0x1a1b   :  { %v3448_v2 = vpop.eup %3447 }
0x1a1c   :  { %v2358_v5 = vsel %vm366_vm2, %v3448_v2, 0.0 }
0x1a1d   :  { %v3450_v8 = vpop.eup %3449  ;;  %2359 = vadd.xlane.f32.xlu1 %v2358_v5  ;;  %v3374_v5 = vld [vmem:[%s4728_s21 + $0x28] sm:$0xff]  }
0x1a1e   :  { %v2361_v9 = vsel %vm366_vm2, %v3450_v8, 0.0 }
0x1a1f   :  { %2362 = vadd.xlane.f32.xlu0 %v2361_v9 }
0x1a2e   :  { %2242 = vrot.lane.b32.xlu1 %v4586_v16, %s3838_s2 }
0x1a35   :  { %2369 = vrot.lane.b32.xlu0 %v4586_v16, %s3839_s27 }
0x1a37   :  { %v2232_v11 = vpop.xlane.xlu1 %2231 }
0x1a39   :  { %v2235_v10 = vpop.xlane.xlu0 %2234 }
0x1a3a   :  { %3451 = vrcp.f32 %v2235_v10 }
0x1a3b   :  { %3453 = vrcp.f32 %v2232_v11 }
0x1a44   :  { %v3452_v12 = vpop.eup %3451 }
0x1a45   :  { %v3454_v14 = vpop.eup %3453  ;;  %v2239_v15 = vmul.f32 %v3452_v12, %v3446_v48 }
0x1a46   :  { %v2238_v18 = vmul.f32 %v3454_v14, %v3444_v56 }
0x1a48   :  { %v2240_v26 = vpack.c.bf16 %v2239_v15, %v2238_v18  ;;  %v2961_v15 = vld [vmem:[#allocation22 + $0x1] ss:$0 sm:$0xff] }
0x1aaa   :  { %v2360_v13 = vpop.xlane.xlu1 %2359 }
0x1aab   :  { %3455 = vrcp.f32 %v2360_v13 }
0x1aac   :  { %v2363_v17 = vpop.xlane.xlu0 %2362 }
0x1aad   :  { %3457 = vrcp.f32 %v2363_v17 }
0x1aae   :  { %v2243_v22 = vpop.permute.xlu1 %2242 }
0x1aaf   :  { %3258 = vmatpush3.bf16.msra.mxu0 %v2243_v22  ;;  %v2962_v22 = vld [vmem:[%s4725_s18 + $0x1] ss:$0 sm:$0xff] }
0x1ab0   :  { %3269 = vmatprep.subr.bf16.mxu0 %v3835_v0  ;;  %v2370_v27 = vpop.permute.xlu0 %2369 }
0x1ab2   :  { %3260 = vmatmul.mubr.msk.bf16.vlgmr.msra.gmra.mrb[52].mxu0 %vm366_vm2, %v2240_v26 }
0x1ab3   :  { %3270 = vmatpush3.bf16.msra.mxu0 %v2370_v27  ;;  %3271 = vmatprep.mubr.msk.bf16.mxu0 %vm3836_vm0, %v3835_v0 }
0x1ab4   :  { %3281 = vmatprep.subr.bf16.mxu0 %v3835_v0 }
0x1ab5   :  { %v3456_v16 = vpop.eup %3455 }
0x1ab6   :  { %v2366_v29 = vmul.f32 %v3456_v16, %v3448_v2  ;;  %v3373_v2 = vld [vmem:[%s4728_s21 + $0x20] sm:$0xff]  }
0x1ab7   :  { %v3458_v28 = vpop.eup %3457 }
0x1ab8   :  { %v2367_v30 = vmul.f32 %v3458_v28, %v3450_v8 }
0x1aba   :  { %v2368_v31 = vpack.c.bf16 %v2367_v30, %v2366_v29 }
0x1abc   :  { %3272 = vmatmul.mubr.msk.bf16.vlgmr.msra.gmra.mrb[56].mxu0 %vm366_vm2, %v2368_v31 }
0x1abd   :  { %3283 = vmatprep.mubr.msk.bf16.mxu0 %vm3836_vm0, %v3835_v0  ;;  %3282 = vmatpush3.bf16.msra.mxu0 %v3369_v32 }
0x1abe   :  { %3295 = vmatprep.subr.bf16.mxu0 %v3835_v0 }
0x1b85   :  { %v2282_v33 = vpop.f32.mrb[52].mxu0 }
0x1b86   :  { %v3261_v25 = vpop.f32.mrb[53].mxu0 }
0x1b87   :  { %v2285_v35 = vpop.f32.mrb[54].mxu0  ;;  %v2964_v25 = vld [vmem:[%s4727_s20 + $0x1] ss:$0 sm:$0xff] }
0x1b88   :  { %v2289_v36 = vpack.c.bf16 %v2285_v35, %v2282_v33  ;;  %v3262_v37 = vpop.f32.mrb[55].mxu0  ;;  %v3376_v33 = vld [vmem:[%s4728_s21 + $0x38] sm:$0xff]  }
0x1b8a   :  { %3284 = vmatmul.mubr.msk.bf16.vlgmr.msra.gmra.mrb[60].mxu0 %vm366_vm2, %v2289_v36 }
0x1b8b   :  { %3303 = vmatprep.mubr.msk.bf16.mxu0 %vm3836_vm0, %v3835_v0  ;;  %3296 = vmatpush3.bf16.msra.mxu0 %v3373_v2 }
0x1b8c   :  { %3297 = vmatprep.subr.bf16.mxu0 %v3835_v0 }
0x1b8f   :  { %v2409_v38 = vpop.f32.mrb[56].mxu0  ;;  %3298 = vmatpush3.bf16.msra.mxu0 %v3374_v5 }
0x1b90   :  { %v3273_v39 = vpop.f32.mrb[57].mxu0  ;;  %3299 = vmatprep.subr.bf16.mxu0 %v3835_v0 }
0x1b91   :  { %v2412_v20 = vpop.f32.mrb[58].mxu0 }
0x1b92   :  { %v2416_v40 = vpack.c.bf16 %v2412_v20, %v2409_v38  ;;  %v3274_v41 = vpop.f32.mrb[59].mxu0 }
0x1b93   :  { %3300 = vmatpush3.bf16.msra.mxu0 %v3375_v23 }
0x1b94   :  { %3278 = vmatmul.mubr.msk.bf16.vlgmr.msra.gmra.mrb[60].mxu1 %vm366_vm2, %v2416_v40  ;;  %3301 = vmatprep.subr.bf16.mxu0 %v3835_v0 }
0x1b95   :  { %3291 = vmatprep.mubr.msk.bf16.mxu1 %vm3836_vm0, %v3835_v0  ;;  %3288 = vmatpush3.bf16.msra.mxu1 %v3371_v1 }
0x1b96   :  { %3289 = vmatprep.subr.bf16.mxu1 %v3835_v0 }
0x1b97   :  { %3302 = vmatpush3.bf16.msra.mxu0 %v3376_v33 }
0x1c5d   :  { %v2510_v24 = vpop.f32.mrb[60].mxu0 }
0x1c5e   :  { %v3285_v42 = vpop.f32.mrb[61].mxu0 }
0x1c5f   :  { %v2513_v43 = vpop.f32.mrb[62].mxu0  ;;  %v2977_v42 = vld [vmem:[%s4729_s22 + $0x1] ss:$0 sm:$0xff]  ;;  %s4777_s22 = sld [smem:[#allocation47_spill]] }
0x1c60   :  { %v3286_v34 = vpop.f32.mrb[63].mxu0 }
0x1c67   :  { %v2460_v45 = vpop.f32.mrb[60].mxu1 }
0x1c68   :  { %v2511_v51 = vadd.f32 %v2510_v24, %v2460_v45  ;;  %v3279_v53 = vpop.f32.mrb[61].mxu1 }
0x1c69   :  { %v2463_v46 = vpop.f32.mrb[62].mxu1 }
0x1c6a   :  { %v2523_v47 = vadd.f32 %v2960_v44, %v2511_v51  ;;  %v2514_v49 = vadd.f32 %v2513_v43, %v2463_v46  ;;  %v3280_v50 = vpop.f32.mrb[63].mxu1 }
0x1c6c   :  { %v2524_v54 = vadd.f32 %v2960_v44, %v2514_v49  ;;  %v2525_v62 = vadd.f32 %v2523_v47, %v4576_v6 }
0x1c6e   :  { %v2527_v3 = vsel %vm310_vm1, %v2525_v62, 0.0  ;;  %v2526_v55 = vadd.f32 %v2524_v54, %v4579_v7  ;;  %v3372_v7 = vld [vmem:[#allocation23 + $0x18] sm:$0xff]  }
0x1c6f   :  { %2528 = vadd.xlane.f32.xlu1 %v2527_v3  ;;  %3290 = vmatpush3.bf16.msra.mxu1 %v3372_v7 }
0x1c70   :  { %v2530_v4 = vsel %vm310_vm1, %v2526_v55, 0.0  ;;  %3307 = vmatprep.subr.bf16.mxu1 %v3835_v0 }
0x1c71   :  { %2531 = vadd.xlane.f32.xlu0 %v2530_v4 }
0x1cfc   :  { %v2529_v56 = vpop.xlane.xlu1 %2528 }
0x1cfd   :  { %v2533_v57 = vmul.f32 0.03125, %v2529_v56 }
0x1cfe   :  { %v2532_v48 = vpop.xlane.xlu0 %2531 }
0x1cff   :  { %v2535_v58 = vsub.f32 %v2525_v62, %v2533_v57  ;;  %v2534_v52 = vmul.f32 0.03125, %v2532_v48 }
0x1d01   :  { %v2536_v59 = vsub.f32 %v2526_v55, %v2534_v52  ;;  %v2537_v61 = vmul.f32 %v2535_v58, %v2535_v58 }
0x1d03   :  { %v2539_v60 = vsel %vm310_vm1, %v2537_v61, 0.0  ;;  %v2538_v63 = vmul.f32 %v2536_v59, %v2536_v59  ;;  %v3378_v61 = vld [vmem:[%s4777_s22 + $0x8] sm:$0xff]  }
0x1d04   :  { %2540 = vadd.xlane.f32.xlu1 %v2539_v60 }
0x1d05   :  { %v2542_v6 = vsel %vm310_vm1, %v2538_v63, 0.0 }
0x1d06   :  { %2543 = vadd.xlane.f32.xlu0 %v2542_v6 }
0x1d91   :  { %v2541_v8 = vpop.xlane.xlu1 %2540 }
0x1d92   :  { %v2545_v9 = vmul.f32 0.03125, %v2541_v8  ;;  %v2985_v8 = vld [vmem:[%s4730_s23 + $0x1] ss:$0 sm:$0xff]  ;;  %s2847_s23 = sshll.u32 %s3842_s9, 4  ;;  %s2848_s23 = int_to_ptr.vmem [resolvable:$true] %s2847_s23 }
0x1d93   :  { %v2544_v10 = vpop.xlane.xlu0 %2543  ;;  %p3780_p1 = scmp.lt.s32.totalorder %s2848_s23, %s2848_s23 }
0x1d94   :  { %v2547_v11 = vadd.f32 1e-05, %v2545_v9  ;;  %v2546_v12 = vmul.f32 0.03125, %v2544_v10 }
0x1d96   :  { %3459 = vrsqrt.f32 %v2547_v11  ;;  %v2548_v13 = vadd.f32 1e-05, %v2546_v12 }
0x1d98   :  { %3461 = vrsqrt.f32 %v2548_v13 }
0x1da0   :  { %v3460_v14 = vpop.eup %3459 }
0x1da1   :  { %v2551_v17 = vmul.f32 %v3460_v14, %v2535_v58 }
0x1da2   :  { %v3462_v18 = vpop.eup %3461 }
0x1da3   :  { %v2559_v26 = vmul.f32 %v2961_v15, %v2551_v17  ;;  %v2552_v27 = vmul.f32 %v3462_v18, %v2536_v59  ;;  %v3377_v59 = vld [vmem:[%s4777_s22] sm:$0xff]  }
0x1da5   :  { %v2560_v16 = vmul.f32 %v2961_v15, %v2552_v27  ;;  %v2567_v28 = vadd.f32 %v2962_v22, %v2559_v26 }
0x1da7   :  { %v2568_v29 = vadd.f32 %v2962_v22, %v2560_v16  ;;  %v2569_v30 = vmul.f32 %v2567_v28, %v4355_v19 }
0x1da9   :  { %v2570_v31 = vmul.f32 %v2568_v29, %v4357_v21 }
0x1dab   :  { %v2571_v32 = vpack.c.bf16 %v2570_v31, %v2569_v30 }
0x1dad   :  { %3292 = vmatmul.mubr.msk.bf16.vlgmr.msra.gmra.mrb[64].mxu1 %vm310_vm1, %v2571_v32 }
0x1dae   :  { %3311 = vmatprep.mubr.msk.bf16.mxu1 %vm3836_vm0, %v3835_v0  ;;  %3308 = vmatpush3.bf16.msra.mxu1 %v3377_v59 }
0x1daf   :  { %3309 = vmatprep.subr.bf16.mxu1 %v3835_v0  ;;  %v2986_v0 = vld [vmem:[%s4776_s4 + $0x1] ss:$0 sm:$0xff]  ;;  %s3775_s4 = scalar_lea.vmem %s2848_s23, 256 }
0x1db0   :  { %p3776_p0 = scmp.ne.s32.totalorder %s2848_s23, %s3775_s4  ;;  %p3781_p2 = scmp.lt.s32.totalorder %s3775_s4, %s3775_s4 }
0x1db2   :  { %3310 = vmatpush3.bf16.msra.mxu1 %v3378_v61  ;;  %p3782_p3 = por %p3781_p2, %p3780_p1 }
0x1db4   :  { %p3783_p4 = pnand %p3782_p3, %p3776_p0 }
0x1e80   :  { %v2634_v35 = vpop.f32.mrb[64].mxu1 }
0x1e81   :  { %v2635_v36 = vadd.f32 %v2964_v25, %v2634_v35  ;;  %v3293_v37 = vpop.f32.mrb[65].mxu1 }
0x1e82   :  { %v2637_v38 = vpop.f32.mrb[66].mxu1 }
0x1e83   :  { %v2638_v39 = vadd.f32 %v2964_v25, %v2637_v38  ;;  %v3294_v20 = vpop.f32.mrb[67].mxu1  ;;  %v2641_v40 = vmax.f32 %v2635_v36, 0.0 }
0x1e85   :  { %v2642_v41 = vmax.f32 %v2638_v39, 0.0 }
0x1e87   :  { %v2643_v24 = vpack.c.bf16 %v2642_v41, %v2641_v40 }
0x1e89   :  { %3304 = vmatmul.mubr.msk.bf16.vlgmr.msra.gmra.mrb[64].mxu0 %vm1438_vm3, %v2643_v24 }
0x1f5c   :  { %v2722_v43 = vpop.f32.mrb[64].mxu0 }
0x1f5d   :  { %v2723_v34 = vadd.f32 %v2977_v42, %v2722_v43  ;;  %v3305_v44 = vpop.f32.mrb[65].mxu0 }
0x1f5e   :  { %v2725_v45 = vpop.f32.mrb[66].mxu0 }
0x1f5f   :  { %v2726_v51 = vadd.f32 %v2977_v42, %v2725_v45  ;;  %v3306_v53 = vpop.f32.mrb[67].mxu0  ;;  %v2729_v46 = vadd.f32 %v2723_v34, %v2569_v30 }
0x1f61   :  { %v2735_v47 = vsel %vm310_vm1, %v2729_v46, 0.0  ;;  %v2730_v49 = vadd.f32 %v2726_v51, %v2570_v31 }
0x1f62   :  { %2736 = vadd.xlane.f32.xlu1 %v2735_v47 }
0x1f63   :  { %v2738_v50 = vsel %vm310_vm1, %v2730_v49, 0.0 }
0x1f64   :  { %2739 = vadd.xlane.f32.xlu0 %v2738_v50 }
0x1fef   :  { %v2737_v54 = vpop.xlane.xlu1 %2736 }
0x1ff0   :  { %v2741_v62 = vmul.f32 0.03125, %v2737_v54 }
0x1ff1   :  { %v2740_v3 = vpop.xlane.xlu0 %2739 }
0x1ff2   :  { %v2743_v55 = vsub.f32 %v2729_v46, %v2741_v62  ;;  %v2742_v4 = vmul.f32 0.03125, %v2740_v3 }
0x1ff4   :  { %v2744_v56 = vsub.f32 %v2730_v49, %v2742_v4  ;;  %v2745_v57 = vmul.f32 %v2743_v55, %v2743_v55 }
0x1ff6   :  { %v2747_v48 = vsel %vm310_vm1, %v2745_v57, 0.0  ;;  %v2746_v58 = vmul.f32 %v2744_v56, %v2744_v56 }
0x1ff7   :  { %2748 = vadd.xlane.f32.xlu1 %v2747_v48 }
0x1ff8   :  { %v2750_v52 = vsel %vm310_vm1, %v2746_v58, 0.0 }
0x1ff9   :  { %2751 = vadd.xlane.f32.xlu0 %v2750_v52 }
0x2084   :  { %v2749_v60 = vpop.xlane.xlu1 %2748 }
0x2085   :  { %v2753_v63 = vmul.f32 0.03125, %v2749_v60 }
0x2086   :  { %v2752_v6 = vpop.xlane.xlu0 %2751 }
0x2087   :  { %v2755_v1 = vadd.f32 1e-05, %v2753_v63  ;;  %v2754_v7 = vmul.f32 0.03125, %v2752_v6 }
0x2089   :  { %3463 = vrsqrt.f32 %v2755_v1  ;;  %v2756_v2 = vadd.f32 1e-05, %v2754_v7 }
0x208b   :  { %3465 = vrsqrt.f32 %v2756_v2 }
0x2093   :  { %v3464_v5 = vpop.eup %3463 }
0x2094   :  { %v2759_v9 = vmul.f32 %v3464_v5, %v2743_v55 }
0x2095   :  { %v3466_v10 = vpop.eup %3465 }
0x2096   :  { %v2767_v11 = vmul.f32 %v2985_v8, %v2759_v9  ;;  %v2760_v12 = vmul.f32 %v3466_v10, %v2744_v56 }
0x2098   :  { %v2775_v13 = vadd.f32 %v2986_v0, %v2767_v11  ;;  %v2768_v14 = vmul.f32 %v2985_v8, %v2760_v12 }
0x209a   :  { %v2776_v15 = vadd.f32 %v2986_v0, %v2768_v14  ;;  %v2777_v17 = vmul.f32 %v2775_v13, %v4355_v19 }
0x209c   :  { %v2778_v18 = vmul.f32 %v2776_v15, %v4357_v21 }
0x209e   :  { %v2779_v22 = vpack.c.bf16 %v2778_v18, %v2777_v17 }
0x20a0   :  { %3312 = vmatmul.mubr.msk.bf16.vlgmr.msra.gmra.mrb[68].mxu1 %vm310_vm1, %v2779_v22 }
0x2173   :  { %v2833_v26 = vpop.f32.mrb[68].mxu1 }
0x2174   :  { %2840 = vst [vmem:[#allocation25] sm:$0xff] %v2833_v26  ;;  %v3313_v27 = vpop.f32.mrb[69].mxu1 }
0x2175   :  { %v2836_v16 = vpop.f32.mrb[70].mxu1 }
0x2176   :  { %2841 = vst [vmem:[#allocation25 + $0x8] sm:$0xff] %v2836_v16  ;;  %v3314_v28 = vpop.f32.mrb[71].mxu1 }
0x2177   :  { %3786 = shalt.err (!%p3783_p4)
}
0x2178   :  { %s4778_s6 = sld [smem:[#allocation48_spill]] }
0x217e   :  { %s3787_s11 = scalar_lea.hbm %s4778_s6, 256 }
0x217f   :  { %p3788_p5 = scmp.ne.s32.totalorder %s4778_s6, %s3787_s11  ;;  %p3791_p6 = scmp.lt.u32.totalorder %s3787_s11, %s4778_s6 }
0x2181   :  { %p3793_p7 = pnand %p3791_p6, %p3788_p5 }
0x2183   :  { %3796 = shalt.err (!%p3793_p7)
}
0x2184   :  { %2853 = dma.vmem_to_hbm [thread:$0]  %s2848_s23, 256, %s4778_s6, [#allocation4], %s4769_s25, %s4769_s25, %s3818_s1  }
0x2185   :  { %3813 = dma.done.wait [#allocation4], 256  }
0x2186   :  { %3814 = vsyncadd [#allocation4], 4294967040 }
0x2187   :  { %2857 = vsyncpa [#allocation3], 1 }
0x2188   :  { %2858 = vsyncpa [#allocation6], 1 }
0x2189   :  { %2859 = vsyncpa [#allocation9], 1 }
0x218a   :  { %2860 = vsyncpa [#allocation12], 1 }
0x218b   :  { %2861 = vsyncpa [#allocation15], 1 }
0x218c   :  { %2862 = vsyncpa [#allocation18], 1 }
0x218d   :  { %2863 = vsyncpa [#allocation21], 1 }
0x218e   :  { %2864 = vsyncpa [#allocation24], 1 }
0x218f   :  { %2865 = vsyncpa [#allocation4], 1 }

</bundles_post_ra>
